<compile_context>
chip_gen: v6e
topology: v6e:2x2x1
jax: 0.10.0
libtpu: 0.0.40
codegen_flags: <defaults>
</compile_context>

<pallas_src>
import functools

import jax
import jax.numpy as jnp
from jax.experimental import pallas as pl
from jax.experimental.pallas import tpu as pltpu

# MXU operand dtype: bf16 operands, f32 accumulation (preferred_element_type).
# Set to jnp.float32 if bit-closer parity with the f32 PyTorch reference is
# required (costs ~3x MXU pushes per matmul).
MXU_DTYPE = jnp.bfloat16
LANE = 128
NEG_INF = -1e30


def _mm(a, b):
    """2-D matmul on the MXU: bf16 operands, f32 accumulation."""
    return jnp.dot(a.astype(MXU_DTYPE), b.astype(MXU_DTYPE),
                   preferred_element_type=jnp.float32)


# ----------------------------------------------------------------------------
# Single fused kernel: embedding -> emb_to_hid | enc_to_hid -> AttnRNNBlock
#                      -> hid_to_emb -> tied (lane-padded) output projection.
# The L x S recurrence is fully unrolled (static and small).
# ----------------------------------------------------------------------------
def _fused_decoder_kernel(
    tgt_ref,                 # (S*Bp, 1) int32, time-major rows: s*Bp + b (pad ids = 0)
    enc_hid_ref,             # (B, enc_feat)
    enc_flat_ref,            # (B*S, H)   row = b*S + s
    enc_t_ref,               # (H, B*S)   hoisted transpose (built in wrapper)
    mask_ref,                # (Bp, B*S)  additive block-diagonal score mask (0 / -1e30)
    embp_ref, embp_t_ref,    # (Vp, D), (D, Vp): lane-padded tied embedding
    e2h_w1_ref, e2h_b1_ref, e2h_w2_ref, e2h_b2_ref,
    m2h_w1_ref, m2h_b1_ref, m2h_w2_ref, m2h_b2_ref,
    awi_ref,                 # (L, H, H) = W^T @ W_ih^T   (attention proj folded into W_ih)
    w_ih_ref, w_hh_ref,      # (L, H, H) = W_ih^T, W_hh^T
    b_fused_ref,             # (L, 1, H) = b_ih + b_hh + attn_b @ W_ih^T
    h2e_w1_ref, h2e_b1_ref, h2e_w2_ref, h2e_b2_ref,
    logits_ref,              # (B*S, Vp) output, batch-major, lane-dense
    *, B, Bp, S, H, L, Vp):
    f32 = jnp.float32

    # ---- enc_to_hid: two fused Linear+ReLU on the encoder summary -----------
    x = jnp.maximum(_mm(enc_hid_ref[...], e2h_w1_ref[...]) + e2h_b1_ref[...], 0.0)
    x = jnp.maximum(_mm(x, e2h_w2_ref[...]) + e2h_b2_ref[...], 0.0)    # (B, L*H)

    def layer_h0(l):
        # Faithful to torch `.reshape(L, -1, H)` (flat row-major reshape of the
        # (B, L*H) activation).  One-time static slices, OUTSIDE the recurrence.
        rows = []
        for b in range(B):
            flat = (l * B + b) * H
            r, c = flat // (L * H), flat % (L * H)
            rows.append(x[r:r + 1, c:c + H])
        if Bp > B:
            rows.append(jnp.zeros((Bp - B, H), f32))
        return jnp.concatenate(rows, axis=0)                           # (Bp, H)

    # ---- embedding (one-hot MXU matmul) + emb_to_hid, padded time-major -----
    ids = tgt_ref[...]                                                 # (S*Bp, 1)
    iota = jax.lax.broadcasted_iota(jnp.int32, (S * Bp, Vp), 1)
    onehot = (iota == ids).astype(f32)                                 # (S*Bp, Vp)
    emb = _mm(onehot, embp_ref[...])                                   # (S*Bp, D)
    h = jnp.maximum(_mm(emb, m2h_w1_ref[...]) + m2h_b1_ref[...], 0.0)
    h = jnp.maximum(_mm(h, m2h_w2_ref[...]) + m2h_b2_ref[...], 0.0)    # (S*Bp, H)

    # ---- attention constants hoisted out of the recurrence -------------------
    mask = mask_ref[...]                                               # (Bp, B*S)
    enc_t = enc_t_ref[...]                                             # (H, B*S)
    enc_flat = enc_flat_ref[...]                                       # (B*S, H)

    # ---- AttnRNNBlock: L layers x S timesteps, fully unrolled -----------------
    cur_all = h                                                        # (S*Bp, H)
    outs = []
    for l in range(L):
        w_hh = w_hh_ref[l]                                             # (H, H)
        # Off-chain per-layer precompute:
        #   encwi  = enc @ W^T @ W_ih^T  (context contribution, folded)
        #   cur_ih = (all timestep inputs) @ W_ih^T + fused bias
        encwi = _mm(enc_flat, awi_ref[l])                              # (B*S, H)
        cur_ih = _mm(cur_all, w_ih_ref[l]) + b_fused_ref[l]            # (S*Bp, H)
        hid = layer_h0(l)                                              # (Bp, H)
        outs = []
        for i in range(S):
            # Both matmuls below depend only on the previous hid -> issue together.
            hh = _mm(hid, w_hh)                                        # (Bp, H)
            s = _mm(hid, enc_t) + mask                                 # (Bp, B*S)
            m = jnp.max(s, axis=-1, keepdims=True)
            e = jnp.exp(s - m)
            ctx_un = _mm(e, encwi)                                     # (Bp, H)
            # Deferred normalization: sum/recip overlap with the context push.
            inv = pl.reciprocal(jnp.sum(e, axis=-1, keepdims=True), approx=True)
            hid = jnp.tanh(cur_ih[i * Bp:(i + 1) * Bp, :] + ctx_un * inv + hh)
            outs.append(hid)                                           # aligned (8,H) tile
        if l + 1 < L:
            cur_all = jnp.concatenate(outs, axis=0)                    # (S*Bp, H), aligned

    # ---- reorder to batch-major (row = b*S + s), dropping the padded rows ----
    dec = jnp.concatenate(
        [outs[s][b:b + 1, :] for b in range(B) for s in range(S)], axis=0)  # (B*S, H)

    # ---- hid_to_emb + tied (lane-padded) projection, all rows at once --------
    y = jnp.maximum(_mm(dec, h2e_w1_ref[...]) + h2e_b1_ref[...], 0.0)
    y = _mm(y, h2e_w2_ref[...]) + h2e_b2_ref[...]                      # (B*S, D)
    logits_ref[...] = _mm(y, embp_t_ref[...])                          # (B*S, Vp)


# ----------------------------------------------------------------------------
# One-time parameter re-layout (init time, NOT in the forward path).
# ----------------------------------------------------------------------------
def prepare_params(params, cfg):
    H, L, D, V = cfg["d_hid"], cfg["n_layer"], cfg["d_emb"], cfg["n_vocab"]
    Vp = max(LANE, ((V + LANE - 1) // LANE) * LANE)
    embp = jnp.zeros((Vp, D), jnp.float32).at[:V, :].set(params["emb_w"])

    def t(w):                      # PyTorch (out, in) -> (in, out)
        return jnp.transpose(w).astype(MXU_DTYPE)

    def b2d(b):                    # (out,) -> (1, out), kept in f32
        return b.reshape(1, -1).astype(jnp.float32)

    w_ih_t = jnp.transpose(params["rnn_w_ih"], (0, 2, 1))              # (L,H,H) f32
    w_hh_t = jnp.transpose(params["rnn_w_hh"], (0, 2, 1))              # (L,H,H) f32
    attn_w_t = jnp.transpose(params["attn_W_w"])                       # (H,H) = W^T

    # Fold attention projection through W_ih:  p@enc@W^T@W_ih^T.
    awi = jnp.einsum('ij,ljk->lik', attn_w_t, w_ih_t)                  # (L,H,H) f32
    # Fold attention bias through W_ih into one fused RNN bias per layer.
    attn_b_proj = jnp.einsum('h,lhk->lk', params["attn_W_b"], w_ih_t)  # (L,H)
    b_fused = (params["rnn_b_ih"] + params["rnn_b_hh"] + attn_b_proj)[:, None, :]

    return {
        "embp": embp.astype(MXU_DTYPE),
        "embp_t": jnp.transpose(embp).astype(MXU_DTYPE),
        "e2h_w1": t(params["e2h_w1"]), "e2h_b1": b2d(params["e2h_b1"]),
        "e2h_w2": t(params["e2h_w2"]), "e2h_b2": b2d(params["e2h_b2"]),
        "m2h_w1": t(params["m2h_w1"]), "m2h_b1": b2d(params["m2h_b1"]),
        "m2h_w2": t(params["m2h_w2"]), "m2h_b2": b2d(params["m2h_b2"]),
        "awi": awi.astype(MXU_DTYPE),
        "w_ih": w_ih_t.astype(MXU_DTYPE),
        "w_hh": w_hh_t.astype(MXU_DTYPE),
        "b_fused": b_fused.astype(jnp.float32),
        "h2e_w1": t(params["h2e_w1"]), "h2e_b1": b2d(params["h2e_b1"]),
        "h2e_w2": t(params["h2e_w2"]), "h2e_b2": b2d(params["h2e_b2"]),
    }


# ----------------------------------------------------------------------------
# Forward: one pallas_call + trivial glue (fused under jit).
# ----------------------------------------------------------------------------
def forward(prep, enc_hid, enc_out, tgt, cfg):
    B, S = tgt.shape
    H, L, V = cfg["d_hid"], cfg["n_layer"], cfg["n_vocab"]
    Vp = prep["embp"].shape[0]
    Bp = ((B + 7) // 8) * 8          # pad batch to a full sublane tile

    # Tiny XLA glue (constant-folded / fused under jit): padded time-major ids,
    # hoisted encoder relayouts, block-diagonal additive score mask.
    tgt_tm = jnp.zeros((S, Bp), jnp.int32).at[:, :B].set(
        jnp.transpose(tgt).astype(jnp.int32)).reshape(S * Bp, 1)
    enc_flat = enc_out.reshape(B * S, H)
    enc_t = jnp.transpose(enc_out, (2, 0, 1)).reshape(H, B * S)
    row_b = jnp.arange(Bp, dtype=jnp.int32) % B      # pad rows mirror a real row (no NaNs)
    col_b = jnp.arange(B * S, dtype=jnp.int32) // S
    mask = jnp.where(col_b[None, :] == row_b[:, None], 0.0, NEG_INF).astype(jnp.float32)

    vmem = pl.BlockSpec(memory_space=pltpu.MemorySpace.VMEM)
    kern = functools.partial(_fused_decoder_kernel, B=B, Bp=Bp, S=S, H=H, L=L, Vp=Vp)
    # TODO(synk): for realistic vocab sizes, add a trailing grid axis over Vp
    # tiles (lane-dense embp_t / logits tiles, "arbitrary"), keep the recurrence
    # in persistent scratch, and switch the one-hot embedding to a scalar-prefetch
    # gather — required to stay within v7x's 64 MiB VMEM.
    # TODO(synk): only add a batch grid with dimension_semantics=("parallel",)
    # once B per core >= 8; at B=2 splitting the serial recurrence is a loss.
    logits = pl.pallas_call(
        kern,
        out_shape=jax.ShapeDtypeStruct((B * S, Vp), jnp.float32),
        in_specs=[vmem] * 23,
        out_specs=vmem,
        compiler_params=pltpu.CompilerParams(vmem_limit_bytes=32 * 1024 * 1024),
    )(tgt_tm, enc_hid, enc_flat, enc_t, mask,
      prep["embp"], prep["embp_t"],
      prep["e2h_w1"], prep["e2h_b1"], prep["e2h_w2"], prep["e2h_b2"],
      prep["m2h_w1"], prep["m2h_b1"], prep["m2h_w2"], prep["m2h_b2"],
      prep["awi"], prep["w_ih"], prep["w_hh"], prep["b_fused"],
      prep["h2e_w1"], prep["h2e_b1"], prep["h2e_w2"], prep["h2e_b2"])

    # Already batch-major: free reshape + un-pad the vocab lanes.
    return logits.reshape(B, S, Vp)[:, :, :V]


# ----------------------------------------------------------------------------
# Deterministic parameter initialization (shapes follow the module __init__)
# ----------------------------------------------------------------------------
def init_params(key, cfg):
    V, D, H, L = cfg["n_vocab"], cfg["d_emb"], cfg["d_hid"], cfg["n_layer"]
    enc_feat = cfg["enc_d_hid"] * (cfg["is_bidir"] + 1)

    def nrm(k, shape, scale=0.1):
        return scale * jax.random.normal(k, shape, jnp.float32)

    ks = jax.random.split(key, 24)
    emb_w = nrm(ks[0], (V, D)).at[0].set(0.0)            # padding_idx=0 row is zero
    return {
        "emb_w": emb_w,
        # emb_to_hid: Linear(D->H), Linear(H->H)
        "m2h_w1": nrm(ks[1], (H, D)), "m2h_b1": nrm(ks[2], (H,)),
        "m2h_w2": nrm(ks[3], (H, H)), "m2h_b2": nrm(ks[4], (H,)),
        # enc_to_hid: Linear(enc_feat -> H*L), Linear(H*L -> H*L)
        "e2h_w1": nrm(ks[5], (H * L, enc_feat)), "e2h_b1": nrm(ks[6], (H * L,)),
        "e2h_w2": nrm(ks[7], (H * L, H * L)), "e2h_b2": nrm(ks[8], (H * L,)),
        # AttnRNNBlock: W Linear(H->H), per-layer single-step tanh RNN params
        "attn_W_w": nrm(ks[9], (H, H)), "attn_W_b": nrm(ks[10], (H,)),
        "rnn_w_ih": nrm(ks[11], (L, H, H)), "rnn_w_hh": nrm(ks[12], (L, H, H)),
        "rnn_b_ih": nrm(ks[13], (L, H)), "rnn_b_hh": nrm(ks[14], (L, H)),
        # hid_to_emb: Linear(H->H), Linear(H->D)
        "h2e_w1": nrm(ks[15], (H, H)), "h2e_b1": nrm(ks[16], (H,)),
        "h2e_w2": nrm(ks[17], (D, H)), "h2e_b2": nrm(ks[18], (D,)),
    }


if __name__ == "__main__":
    cfg = dict(n_vocab=40, d_emb=16, d_hid=32, n_layer=2, enc_d_hid=16, is_bidir=1)
    B, S = 2, 8

    key = jax.random.PRNGKey(0)
    pkey, dkey = jax.random.split(key)
    params = init_params(pkey, cfg)
    prep = prepare_params(params, cfg)       # one-time re-layout (init, not per call)

    k1, k2, k3 = jax.random.split(dkey, 3)
    enc_hid = jax.random.normal(
        k1, (B, cfg["enc_d_hid"] * (cfg["is_bidir"] + 1)), jnp.float32)   # (2, 32)
    enc_out = jax.random.normal(k2, (B, S, cfg["d_hid"]), jnp.float32)    # (2, 8, 32)
    tgt = jax.random.randint(k3, (B, S), 0, cfg["n_vocab"], dtype=jnp.int32)

    fwd = jax.jit(functools.partial(forward, cfg=cfg))
    logits = jax.block_until_ready(fwd(prep, enc_hid, enc_out, tgt))

    assert logits.shape == (B, S, cfg["n_vocab"])
    assert bool(jnp.all(jnp.isfinite(logits)))
    print("KERNEL_OK")
</pallas_src>

<mosaic_0001>
module attributes {stable_mosaic.version = 11 : i64} {
  func.func @_fused_decoder_kernel(%arg0: memref<64x1xi32, #tpu.memory_space<vmem>>, %arg1: memref<2x32xf32, #tpu.memory_space<vmem>>, %arg2: memref<16x32xf32, #tpu.memory_space<vmem>>, %arg3: memref<32x16xf32, #tpu.memory_space<vmem>>, %arg4: memref<8x16xf32, #tpu.memory_space<vmem>>, %arg5: memref<128x16xbf16, #tpu.memory_space<vmem>>, %arg6: memref<16x128xbf16, #tpu.memory_space<vmem>>, %arg7: memref<32x64xbf16, #tpu.memory_space<vmem>>, %arg8: memref<1x64xf32, #tpu.memory_space<vmem>>, %arg9: memref<64x64xbf16, #tpu.memory_space<vmem>>, %arg10: memref<1x64xf32, #tpu.memory_space<vmem>>, %arg11: memref<16x32xbf16, #tpu.memory_space<vmem>>, %arg12: memref<1x32xf32, #tpu.memory_space<vmem>>, %arg13: memref<32x32xbf16, #tpu.memory_space<vmem>>, %arg14: memref<1x32xf32, #tpu.memory_space<vmem>>, %arg15: memref<2x32x32xbf16, #tpu.memory_space<vmem>>, %arg16: memref<2x32x32xbf16, #tpu.memory_space<vmem>>, %arg17: memref<2x32x32xbf16, #tpu.memory_space<vmem>>, %arg18: memref<2x1x32xf32, #tpu.memory_space<vmem>>, %arg19: memref<32x32xbf16, #tpu.memory_space<vmem>>, %arg20: memref<1x32xf32, #tpu.memory_space<vmem>>, %arg21: memref<32x16xbf16, #tpu.memory_space<vmem>>, %arg22: memref<1x16xf32, #tpu.memory_space<vmem>>, %arg23: memref<16x128xf32, #tpu.memory_space<vmem>>) attributes {dimension_semantics = [], scalar_prefetch = 0 : i64, scratch_operands = 0 : i64, tpu.core_type = #tpu.core_type<tc>} {
    %c0 = arith.constant 0 : index
    %c0_0 = arith.constant 0 : index
    %0 = vector.load %arg1[%c0, %c0_0] : memref<2x32xf32, #tpu.memory_space<vmem>>, vector<2x32xf32>
    %c0_1 = arith.constant 0 : index
    %c0_2 = arith.constant 0 : index
    %1 = vector.load %arg7[%c0_1, %c0_2] : memref<32x64xbf16, #tpu.memory_space<vmem>>, vector<32x64xbf16>
    %2 = arith.truncf %0 : vector<2x32xf32> to vector<2x32xbf16>
    %cst = arith.constant dense<0.000000e+00> : vector<2x64xf32>
    %3 = tpu.matmul %2, %1, %cst {dimension_numbers = #tpu.dot_dimension_numbers<[1], [0], [0], [1], [0, 0, 1, 1], [], []>} : vector<2x32xbf16>, vector<32x64xbf16>, vector<2x64xf32> -> vector<2x64xf32>
    %c0_3 = arith.constant 0 : index
    %c0_4 = arith.constant 0 : index
    %4 = vector.load %arg8[%c0_3, %c0_4] : memref<1x64xf32, #tpu.memory_space<vmem>>, vector<1x64xf32>
    %5 = vector.broadcast %4 : vector<1x64xf32> to vector<2x64xf32>
    %6 = arith.addf %3, %5 : vector<2x64xf32>
    %cst_5 = arith.constant 0.000000e+00 : f32
    %7 = vector.broadcast %cst_5 : f32 to vector<2x64xf32>
    %8 = arith.maximumf %6, %7 : vector<2x64xf32>
    %c0_6 = arith.constant 0 : index
    %c0_7 = arith.constant 0 : index
    %9 = vector.load %arg9[%c0_6, %c0_7] : memref<64x64xbf16, #tpu.memory_space<vmem>>, vector<64x64xbf16>
    %10 = arith.truncf %8 : vector<2x64xf32> to vector<2x64xbf16>
    %cst_8 = arith.constant dense<0.000000e+00> : vector<2x64xf32>
    %11 = tpu.matmul %10, %9, %cst_8 {dimension_numbers = #tpu.dot_dimension_numbers<[1], [0], [0], [1], [0, 0, 1, 1], [], []>} : vector<2x64xbf16>, vector<64x64xbf16>, vector<2x64xf32> -> vector<2x64xf32>
    %c0_9 = arith.constant 0 : index
    %c0_10 = arith.constant 0 : index
    %12 = vector.load %arg10[%c0_9, %c0_10] : memref<1x64xf32, #tpu.memory_space<vmem>>, vector<1x64xf32>
    %13 = vector.broadcast %12 : vector<1x64xf32> to vector<2x64xf32>
    %14 = arith.addf %11, %13 : vector<2x64xf32>
    %cst_11 = arith.constant 0.000000e+00 : f32
    %15 = vector.broadcast %cst_11 : f32 to vector<2x64xf32>
    %16 = arith.maximumf %14, %15 : vector<2x64xf32>
    %c0_12 = arith.constant 0 : index
    %c0_13 = arith.constant 0 : index
    %17 = vector.load %arg0[%c0_12, %c0_13] : memref<64x1xi32, #tpu.memory_space<vmem>>, vector<64x1xi32>
    %18 = tpu.iota {dimensions = array<i32: 1>} : vector<64x128xi32>
    %19 = vector.broadcast %17 : vector<64x1xi32> to vector<64x128xi32>
    %20 = arith.cmpi eq, %18, %19 : vector<64x128xi32>
    %21 = arith.extui %20 : vector<64x128xi1> to vector<64x128xi32>
    %22 = arith.sitofp %21 : vector<64x128xi32> to vector<64x128xf32>
    %c0_14 = arith.constant 0 : index
    %c0_15 = arith.constant 0 : index
    %23 = vector.load %arg5[%c0_14, %c0_15] : memref<128x16xbf16, #tpu.memory_space<vmem>>, vector<128x16xbf16>
    %24 = arith.truncf %22 : vector<64x128xf32> to vector<64x128xbf16>
    %cst_16 = arith.constant dense<0.000000e+00> : vector<64x16xf32>
    %25 = tpu.matmul %24, %23, %cst_16 {dimension_numbers = #tpu.dot_dimension_numbers<[1], [0], [0], [1], [0, 0, 1, 1], [], []>} : vector<64x128xbf16>, vector<128x16xbf16>, vector<64x16xf32> -> vector<64x16xf32>
    %c0_17 = arith.constant 0 : index
    %c0_18 = arith.constant 0 : index
    %26 = vector.load %arg11[%c0_17, %c0_18] : memref<16x32xbf16, #tpu.memory_space<vmem>>, vector<16x32xbf16>
    %27 = arith.truncf %25 : vector<64x16xf32> to vector<64x16xbf16>
    %cst_19 = arith.constant dense<0.000000e+00> : vector<64x32xf32>
    %28 = tpu.matmul %27, %26, %cst_19 {dimension_numbers = #tpu.dot_dimension_numbers<[1], [0], [0], [1], [0, 0, 1, 1], [], []>} : vector<64x16xbf16>, vector<16x32xbf16>, vector<64x32xf32> -> vector<64x32xf32>
    %c0_20 = arith.constant 0 : index
    %c0_21 = arith.constant 0 : index
    %29 = vector.load %arg12[%c0_20, %c0_21] : memref<1x32xf32, #tpu.memory_space<vmem>>, vector<1x32xf32>
    %30 = vector.broadcast %29 : vector<1x32xf32> to vector<64x32xf32>
    %31 = arith.addf %28, %30 : vector<64x32xf32>
    %cst_22 = arith.constant 0.000000e+00 : f32
    %32 = vector.broadcast %cst_22 : f32 to vector<64x32xf32>
    %33 = arith.maximumf %31, %32 : vector<64x32xf32>
    %c0_23 = arith.constant 0 : index
    %c0_24 = arith.constant 0 : index
    %34 = vector.load %arg13[%c0_23, %c0_24] : memref<32x32xbf16, #tpu.memory_space<vmem>>, vector<32x32xbf16>
    %35 = arith.truncf %33 : vector<64x32xf32> to vector<64x32xbf16>
    %cst_25 = arith.constant dense<0.000000e+00> : vector<64x32xf32>
    %36 = tpu.matmul %35, %34, %cst_25 {dimension_numbers = #tpu.dot_dimension_numbers<[1], [0], [0], [1], [0, 0, 1, 1], [], []>} : vector<64x32xbf16>, vector<32x32xbf16>, vector<64x32xf32> -> vector<64x32xf32>
    %c0_26 = arith.constant 0 : index
    %c0_27 = arith.constant 0 : index
    %37 = vector.load %arg14[%c0_26, %c0_27] : memref<1x32xf32, #tpu.memory_space<vmem>>, vector<1x32xf32>
    %38 = vector.broadcast %37 : vector<1x32xf32> to vector<64x32xf32>
    %39 = arith.addf %36, %38 : vector<64x32xf32>
    %cst_28 = arith.constant 0.000000e+00 : f32
    %40 = vector.broadcast %cst_28 : f32 to vector<64x32xf32>
    %41 = arith.maximumf %39, %40 : vector<64x32xf32>
    %c0_29 = arith.constant 0 : index
    %c0_30 = arith.constant 0 : index
    %42 = vector.load %arg4[%c0_29, %c0_30] : memref<8x16xf32, #tpu.memory_space<vmem>>, vector<8x16xf32>
    %c0_31 = arith.constant 0 : index
    %c0_32 = arith.constant 0 : index
    %43 = vector.load %arg3[%c0_31, %c0_32] : memref<32x16xf32, #tpu.memory_space<vmem>>, vector<32x16xf32>
    %c0_33 = arith.constant 0 : index
    %c0_34 = arith.constant 0 : index
    %44 = vector.load %arg2[%c0_33, %c0_34] : memref<16x32xf32, #tpu.memory_space<vmem>>, vector<16x32xf32>
    %c0_35 = arith.constant 0 : index
    %c0_36 = arith.constant 0 : index
    %c0_37 = arith.constant 0 : index
    %45 = vector.load %arg17[%c0_35, %c0_36, %c0_37] : memref<2x32x32xbf16, #tpu.memory_space<vmem>>, vector<1x32x32xbf16>
    %46 = vector.shape_cast %45 : vector<1x32x32xbf16> to vector<32x32xbf16>
    %c0_38 = arith.constant 0 : index
    %c0_39 = arith.constant 0 : index
    %c0_40 = arith.constant 0 : index
    %47 = vector.load %arg15[%c0_38, %c0_39, %c0_40] : memref<2x32x32xbf16, #tpu.memory_space<vmem>>, vector<1x32x32xbf16>
    %48 = vector.shape_cast %47 : vector<1x32x32xbf16> to vector<32x32xbf16>
    %49 = arith.truncf %44 : vector<16x32xf32> to vector<16x32xbf16>
    %cst_41 = arith.constant dense<0.000000e+00> : vector<16x32xf32>
    %50 = tpu.matmul %49, %48, %cst_41 {dimension_numbers = #tpu.dot_dimension_numbers<[1], [0], [0], [1], [0, 0, 1, 1], [], []>} : vector<16x32xbf16>, vector<32x32xbf16>, vector<16x32xf32> -> vector<16x32xf32>
    %c0_42 = arith.constant 0 : index
    %c0_43 = arith.constant 0 : index
    %c0_44 = arith.constant 0 : index
    %51 = vector.load %arg16[%c0_42, %c0_43, %c0_44] : memref<2x32x32xbf16, #tpu.memory_space<vmem>>, vector<1x32x32xbf16>
    %52 = vector.shape_cast %51 : vector<1x32x32xbf16> to vector<32x32xbf16>
    %53 = arith.truncf %41 : vector<64x32xf32> to vector<64x32xbf16>
    %cst_45 = arith.constant dense<0.000000e+00> : vector<64x32xf32>
    %54 = tpu.matmul %53, %52, %cst_45 {dimension_numbers = #tpu.dot_dimension_numbers<[1], [0], [0], [1], [0, 0, 1, 1], [], []>} : vector<64x32xbf16>, vector<32x32xbf16>, vector<64x32xf32> -> vector<64x32xf32>
    %c0_46 = arith.constant 0 : index
    %c0_47 = arith.constant 0 : index
    %c0_48 = arith.constant 0 : index
    %55 = vector.load %arg18[%c0_46, %c0_47, %c0_48] : memref<2x1x32xf32, #tpu.memory_space<vmem>>, vector<1x1x32xf32>
    %56 = vector.shape_cast %55 : vector<1x1x32xf32> to vector<1x32xf32>
    %57 = vector.broadcast %56 : vector<1x32xf32> to vector<64x32xf32>
    %58 = arith.addf %54, %57 : vector<64x32xf32>
    %59 = vector.extract_strided_slice %16 {offsets = [0, 0], sizes = [1, 32], strides = [1, 1]} : vector<2x64xf32> to vector<1x32xf32>
    %60 = vector.extract_strided_slice %16 {offsets = [0, 32], sizes = [1, 32], strides = [1, 1]} : vector<2x64xf32> to vector<1x32xf32>
    %cst_49 = arith.constant 0.000000e+00 : f32
    %61 = vector.broadcast %cst_49 : f32 to vector<6x32xf32>
    %62 = tpu.concatenate %59, %60, %61 in 0 : vector<1x32xf32>, vector<1x32xf32>, vector<6x32xf32> -> vector<8x32xf32>
    %63 = arith.truncf %62 : vector<8x32xf32> to vector<8x32xbf16>
    %cst_50 = arith.constant dense<0.000000e+00> : vector<8x32xf32>
    %64 = tpu.matmul %63, %46, %cst_50 {dimension_numbers = #tpu.dot_dimension_numbers<[1], [0], [0], [1], [0, 0, 1, 1], [], []>} : vector<8x32xbf16>, vector<32x32xbf16>, vector<8x32xf32> -> vector<8x32xf32>
    %65 = arith.truncf %62 : vector<8x32xf32> to vector<8x32xbf16>
    %66 = arith.truncf %43 : vector<32x16xf32> to vector<32x16xbf16>
    %cst_51 = arith.constant dense<0.000000e+00> : vector<8x16xf32>
    %67 = tpu.matmul %65, %66, %cst_51 {dimension_numbers = #tpu.dot_dimension_numbers<[1], [0], [0], [1], [0, 0, 1, 1], [], []>} : vector<8x32xbf16>, vector<32x16xbf16>, vector<8x16xf32> -> vector<8x16xf32>
    %68 = arith.addf %67, %42 : vector<8x16xf32>
    %cst_52 = arith.constant dense<0xFF800000> : vector<8xf32>
    %69 = vector.multi_reduction <maximumf>, %68, %cst_52 [1] : vector<8x16xf32> to vector<8xf32>
    %70 = vector.shape_cast %69 : vector<8xf32> to vector<8x1xf32>
    %71 = vector.broadcast %70 : vector<8x1xf32> to vector<8x16xf32>
    %72 = arith.subf %68, %71 : vector<8x16xf32>
    %73 = math.exp %72 : vector<8x16xf32>
    %74 = arith.truncf %73 : vector<8x16xf32> to vector<8x16xbf16>
    %75 = arith.truncf %50 : vector<16x32xf32> to vector<16x32xbf16>
    %cst_53 = arith.constant dense<0.000000e+00> : vector<8x32xf32>
    %76 = tpu.matmul %74, %75, %cst_53 {dimension_numbers = #tpu.dot_dimension_numbers<[1], [0], [0], [1], [0, 0, 1, 1], [], []>} : vector<8x16xbf16>, vector<16x32xbf16>, vector<8x32xf32> -> vector<8x32xf32>
    %cst_54 = arith.constant dense<0.000000e+00> : vector<8xf32>
    %77 = vector.multi_reduction <add>, %73, %cst_54 [1] : vector<8x16xf32> to vector<8xf32>
    %78 = vector.shape_cast %77 : vector<8xf32> to vector<8x1xf32>
    %79 = tpu.reciprocal %78 {approx = true} : vector<8x1xf32> -> vector<8x1xf32>
    %80 = vector.extract_strided_slice %58 {offsets = [0, 0], sizes = [8, 32], strides = [1, 1]} : vector<64x32xf32> to vector<8x32xf32>
    %81 = vector.broadcast %79 : vector<8x1xf32> to vector<8x32xf32>
    %82 = arith.mulf %76, %81 : vector<8x32xf32>
    %83 = arith.addf %80, %82 : vector<8x32xf32>
    %84 = arith.addf %83, %64 : vector<8x32xf32>
    %85 = math.tanh %84 : vector<8x32xf32>
    %86 = arith.truncf %85 : vector<8x32xf32> to vector<8x32xbf16>
    %cst_55 = arith.constant dense<0.000000e+00> : vector<8x32xf32>
    %87 = tpu.matmul %86, %46, %cst_55 {dimension_numbers = #tpu.dot_dimension_numbers<[1], [0], [0], [1], [0, 0, 1, 1], [], []>} : vector<8x32xbf16>, vector<32x32xbf16>, vector<8x32xf32> -> vector<8x32xf32>
    %88 = arith.truncf %85 : vector<8x32xf32> to vector<8x32xbf16>
    %89 = arith.truncf %43 : vector<32x16xf32> to vector<32x16xbf16>
    %cst_56 = arith.constant dense<0.000000e+00> : vector<8x16xf32>
    %90 = tpu.matmul %88, %89, %cst_56 {dimension_numbers = #tpu.dot_dimension_numbers<[1], [0], [0], [1], [0, 0, 1, 1], [], []>} : vector<8x32xbf16>, vector<32x16xbf16>, vector<8x16xf32> -> vector<8x16xf32>
    %91 = arith.addf %90, %42 : vector<8x16xf32>
    %cst_57 = arith.constant dense<0xFF800000> : vector<8xf32>
    %92 = vector.multi_reduction <maximumf>, %91, %cst_57 [1] : vector<8x16xf32> to vector<8xf32>
    %93 = vector.shape_cast %92 : vector<8xf32> to vector<8x1xf32>
    %94 = vector.broadcast %93 : vector<8x1xf32> to vector<8x16xf32>
    %95 = arith.subf %91, %94 : vector<8x16xf32>
    %96 = math.exp %95 : vector<8x16xf32>
    %97 = arith.truncf %96 : vector<8x16xf32> to vector<8x16xbf16>
    %98 = arith.truncf %50 : vector<16x32xf32> to vector<16x32xbf16>
    %cst_58 = arith.constant dense<0.000000e+00> : vector<8x32xf32>
    %99 = tpu.matmul %97, %98, %cst_58 {dimension_numbers = #tpu.dot_dimension_numbers<[1], [0], [0], [1], [0, 0, 1, 1], [], []>} : vector<8x16xbf16>, vector<16x32xbf16>, vector<8x32xf32> -> vector<8x32xf32>
    %cst_59 = arith.constant dense<0.000000e+00> : vector<8xf32>
    %100 = vector.multi_reduction <add>, %96, %cst_59 [1] : vector<8x16xf32> to vector<8xf32>
    %101 = vector.shape_cast %100 : vector<8xf32> to vector<8x1xf32>
    %102 = tpu.reciprocal %101 {approx = true} : vector<8x1xf32> -> vector<8x1xf32>
    %103 = vector.extract_strided_slice %58 {offsets = [8, 0], sizes = [8, 32], strides = [1, 1]} : vector<64x32xf32> to vector<8x32xf32>
    %104 = vector.broadcast %102 : vector<8x1xf32> to vector<8x32xf32>
    %105 = arith.mulf %99, %104 : vector<8x32xf32>
    %106 = arith.addf %103, %105 : vector<8x32xf32>
    %107 = arith.addf %106, %87 : vector<8x32xf32>
    %108 = math.tanh %107 : vector<8x32xf32>
    %109 = arith.truncf %108 : vector<8x32xf32> to vector<8x32xbf16>
    %cst_60 = arith.constant dense<0.000000e+00> : vector<8x32xf32>
    %110 = tpu.matmul %109, %46, %cst_60 {dimension_numbers = #tpu.dot_dimension_numbers<[1], [0], [0], [1], [0, 0, 1, 1], [], []>} : vector<8x32xbf16>, vector<32x32xbf16>, vector<8x32xf32> -> vector<8x32xf32>
    %111 = arith.truncf %108 : vector<8x32xf32> to vector<8x32xbf16>
    %112 = arith.truncf %43 : vector<32x16xf32> to vector<32x16xbf16>
    %cst_61 = arith.constant dense<0.000000e+00> : vector<8x16xf32>
    %113 = tpu.matmul %111, %112, %cst_61 {dimension_numbers = #tpu.dot_dimension_numbers<[1], [0], [0], [1], [0, 0, 1, 1], [], []>} : vector<8x32xbf16>, vector<32x16xbf16>, vector<8x16xf32> -> vector<8x16xf32>
    %114 = arith.addf %113, %42 : vector<8x16xf32>
    %cst_62 = arith.constant dense<0xFF800000> : vector<8xf32>
    %115 = vector.multi_reduction <maximumf>, %114, %cst_62 [1] : vector<8x16xf32> to vector<8xf32>
    %116 = vector.shape_cast %115 : vector<8xf32> to vector<8x1xf32>
    %117 = vector.broadcast %116 : vector<8x1xf32> to vector<8x16xf32>
    %118 = arith.subf %114, %117 : vector<8x16xf32>
    %119 = math.exp %118 : vector<8x16xf32>
    %120 = arith.truncf %119 : vector<8x16xf32> to vector<8x16xbf16>
    %121 = arith.truncf %50 : vector<16x32xf32> to vector<16x32xbf16>
    %cst_63 = arith.constant dense<0.000000e+00> : vector<8x32xf32>
    %122 = tpu.matmul %120, %121, %cst_63 {dimension_numbers = #tpu.dot_dimension_numbers<[1], [0], [0], [1], [0, 0, 1, 1], [], []>} : vector<8x16xbf16>, vector<16x32xbf16>, vector<8x32xf32> -> vector<8x32xf32>
    %cst_64 = arith.constant dense<0.000000e+00> : vector<8xf32>
    %123 = vector.multi_reduction <add>, %119, %cst_64 [1] : vector<8x16xf32> to vector<8xf32>
    %124 = vector.shape_cast %123 : vector<8xf32> to vector<8x1xf32>
    %125 = tpu.reciprocal %124 {approx = true} : vector<8x1xf32> -> vector<8x1xf32>
    %126 = vector.extract_strided_slice %58 {offsets = [16, 0], sizes = [8, 32], strides = [1, 1]} : vector<64x32xf32> to vector<8x32xf32>
    %127 = vector.broadcast %125 : vector<8x1xf32> to vector<8x32xf32>
    %128 = arith.mulf %122, %127 : vector<8x32xf32>
    %129 = arith.addf %126, %128 : vector<8x32xf32>
    %130 = arith.addf %129, %110 : vector<8x32xf32>
    %131 = math.tanh %130 : vector<8x32xf32>
    %132 = arith.truncf %131 : vector<8x32xf32> to vector<8x32xbf16>
    %cst_65 = arith.constant dense<0.000000e+00> : vector<8x32xf32>
    %133 = tpu.matmul %132, %46, %cst_65 {dimension_numbers = #tpu.dot_dimension_numbers<[1], [0], [0], [1], [0, 0, 1, 1], [], []>} : vector<8x32xbf16>, vector<32x32xbf16>, vector<8x32xf32> -> vector<8x32xf32>
    %134 = arith.truncf %131 : vector<8x32xf32> to vector<8x32xbf16>
    %135 = arith.truncf %43 : vector<32x16xf32> to vector<32x16xbf16>
    %cst_66 = arith.constant dense<0.000000e+00> : vector<8x16xf32>
    %136 = tpu.matmul %134, %135, %cst_66 {dimension_numbers = #tpu.dot_dimension_numbers<[1], [0], [0], [1], [0, 0, 1, 1], [], []>} : vector<8x32xbf16>, vector<32x16xbf16>, vector<8x16xf32> -> vector<8x16xf32>
    %137 = arith.addf %136, %42 : vector<8x16xf32>
    %cst_67 = arith.constant dense<0xFF800000> : vector<8xf32>
    %138 = vector.multi_reduction <maximumf>, %137, %cst_67 [1] : vector<8x16xf32> to vector<8xf32>
    %139 = vector.shape_cast %138 : vector<8xf32> to vector<8x1xf32>
    %140 = vector.broadcast %139 : vector<8x1xf32> to vector<8x16xf32>
    %141 = arith.subf %137, %140 : vector<8x16xf32>
    %142 = math.exp %141 : vector<8x16xf32>
    %143 = arith.truncf %142 : vector<8x16xf32> to vector<8x16xbf16>
    %144 = arith.truncf %50 : vector<16x32xf32> to vector<16x32xbf16>
    %cst_68 = arith.constant dense<0.000000e+00> : vector<8x32xf32>
    %145 = tpu.matmul %143, %144, %cst_68 {dimension_numbers = #tpu.dot_dimension_numbers<[1], [0], [0], [1], [0, 0, 1, 1], [], []>} : vector<8x16xbf16>, vector<16x32xbf16>, vector<8x32xf32> -> vector<8x32xf32>
    %cst_69 = arith.constant dense<0.000000e+00> : vector<8xf32>
    %146 = vector.multi_reduction <add>, %142, %cst_69 [1] : vector<8x16xf32> to vector<8xf32>
    %147 = vector.shape_cast %146 : vector<8xf32> to vector<8x1xf32>
    %148 = tpu.reciprocal %147 {approx = true} : vector<8x1xf32> -> vector<8x1xf32>
    %149 = vector.extract_strided_slice %58 {offsets = [24, 0], sizes = [8, 32], strides = [1, 1]} : vector<64x32xf32> to vector<8x32xf32>
    %150 = vector.broadcast %148 : vector<8x1xf32> to vector<8x32xf32>
    %151 = arith.mulf %145, %150 : vector<8x32xf32>
    %152 = arith.addf %149, %151 : vector<8x32xf32>
    %153 = arith.addf %152, %133 : vector<8x32xf32>
    %154 = math.tanh %153 : vector<8x32xf32>
    %155 = arith.truncf %154 : vector<8x32xf32> to vector<8x32xbf16>
    %cst_70 = arith.constant dense<0.000000e+00> : vector<8x32xf32>
    %156 = tpu.matmul %155, %46, %cst_70 {dimension_numbers = #tpu.dot_dimension_numbers<[1], [0], [0], [1], [0, 0, 1, 1], [], []>} : vector<8x32xbf16>, vector<32x32xbf16>, vector<8x32xf32> -> vector<8x32xf32>
    %157 = arith.truncf %154 : vector<8x32xf32> to vector<8x32xbf16>
    %158 = arith.truncf %43 : vector<32x16xf32> to vector<32x16xbf16>
    %cst_71 = arith.constant dense<0.000000e+00> : vector<8x16xf32>
    %159 = tpu.matmul %157, %158, %cst_71 {dimension_numbers = #tpu.dot_dimension_numbers<[1], [0], [0], [1], [0, 0, 1, 1], [], []>} : vector<8x32xbf16>, vector<32x16xbf16>, vector<8x16xf32> -> vector<8x16xf32>
    %160 = arith.addf %159, %42 : vector<8x16xf32>
    %cst_72 = arith.constant dense<0xFF800000> : vector<8xf32>
    %161 = vector.multi_reduction <maximumf>, %160, %cst_72 [1] : vector<8x16xf32> to vector<8xf32>
    %162 = vector.shape_cast %161 : vector<8xf32> to vector<8x1xf32>
    %163 = vector.broadcast %162 : vector<8x1xf32> to vector<8x16xf32>
    %164 = arith.subf %160, %163 : vector<8x16xf32>
    %165 = math.exp %164 : vector<8x16xf32>
    %166 = arith.truncf %165 : vector<8x16xf32> to vector<8x16xbf16>
    %167 = arith.truncf %50 : vector<16x32xf32> to vector<16x32xbf16>
    %cst_73 = arith.constant dense<0.000000e+00> : vector<8x32xf32>
    %168 = tpu.matmul %166, %167, %cst_73 {dimension_numbers = #tpu.dot_dimension_numbers<[1], [0], [0], [1], [0, 0, 1, 1], [], []>} : vector<8x16xbf16>, vector<16x32xbf16>, vector<8x32xf32> -> vector<8x32xf32>
    %cst_74 = arith.constant dense<0.000000e+00> : vector<8xf32>
    %169 = vector.multi_reduction <add>, %165, %cst_74 [1] : vector<8x16xf32> to vector<8xf32>
    %170 = vector.shape_cast %169 : vector<8xf32> to vector<8x1xf32>
    %171 = tpu.reciprocal %170 {approx = true} : vector<8x1xf32> -> vector<8x1xf32>
    %172 = vector.extract_strided_slice %58 {offsets = [32, 0], sizes = [8, 32], strides = [1, 1]} : vector<64x32xf32> to vector<8x32xf32>
    %173 = vector.broadcast %171 : vector<8x1xf32> to vector<8x32xf32>
    %174 = arith.mulf %168, %173 : vector<8x32xf32>
    %175 = arith.addf %172, %174 : vector<8x32xf32>
    %176 = arith.addf %175, %156 : vector<8x32xf32>
    %177 = math.tanh %176 : vector<8x32xf32>
    %178 = arith.truncf %177 : vector<8x32xf32> to vector<8x32xbf16>
    %cst_75 = arith.constant dense<0.000000e+00> : vector<8x32xf32>
    %179 = tpu.matmul %178, %46, %cst_75 {dimension_numbers = #tpu.dot_dimension_numbers<[1], [0], [0], [1], [0, 0, 1, 1], [], []>} : vector<8x32xbf16>, vector<32x32xbf16>, vector<8x32xf32> -> vector<8x32xf32>
    %180 = arith.truncf %177 : vector<8x32xf32> to vector<8x32xbf16>
    %181 = arith.truncf %43 : vector<32x16xf32> to vector<32x16xbf16>
    %cst_76 = arith.constant dense<0.000000e+00> : vector<8x16xf32>
    %182 = tpu.matmul %180, %181, %cst_76 {dimension_numbers = #tpu.dot_dimension_numbers<[1], [0], [0], [1], [0, 0, 1, 1], [], []>} : vector<8x32xbf16>, vector<32x16xbf16>, vector<8x16xf32> -> vector<8x16xf32>
    %183 = arith.addf %182, %42 : vector<8x16xf32>
    %cst_77 = arith.constant dense<0xFF800000> : vector<8xf32>
    %184 = vector.multi_reduction <maximumf>, %183, %cst_77 [1] : vector<8x16xf32> to vector<8xf32>
    %185 = vector.shape_cast %184 : vector<8xf32> to vector<8x1xf32>
    %186 = vector.broadcast %185 : vector<8x1xf32> to vector<8x16xf32>
    %187 = arith.subf %183, %186 : vector<8x16xf32>
    %188 = math.exp %187 : vector<8x16xf32>
    %189 = arith.truncf %188 : vector<8x16xf32> to vector<8x16xbf16>
    %190 = arith.truncf %50 : vector<16x32xf32> to vector<16x32xbf16>
    %cst_78 = arith.constant dense<0.000000e+00> : vector<8x32xf32>
    %191 = tpu.matmul %189, %190, %cst_78 {dimension_numbers = #tpu.dot_dimension_numbers<[1], [0], [0], [1], [0, 0, 1, 1], [], []>} : vector<8x16xbf16>, vector<16x32xbf16>, vector<8x32xf32> -> vector<8x32xf32>
    %cst_79 = arith.constant dense<0.000000e+00> : vector<8xf32>
    %192 = vector.multi_reduction <add>, %188, %cst_79 [1] : vector<8x16xf32> to vector<8xf32>
    %193 = vector.shape_cast %192 : vector<8xf32> to vector<8x1xf32>
    %194 = tpu.reciprocal %193 {approx = true} : vector<8x1xf32> -> vector<8x1xf32>
    %195 = vector.extract_strided_slice %58 {offsets = [40, 0], sizes = [8, 32], strides = [1, 1]} : vector<64x32xf32> to vector<8x32xf32>
    %196 = vector.broadcast %194 : vector<8x1xf32> to vector<8x32xf32>
    %197 = arith.mulf %191, %196 : vector<8x32xf32>
    %198 = arith.addf %195, %197 : vector<8x32xf32>
    %199 = arith.addf %198, %179 : vector<8x32xf32>
    %200 = math.tanh %199 : vector<8x32xf32>
    %201 = arith.truncf %200 : vector<8x32xf32> to vector<8x32xbf16>
    %cst_80 = arith.constant dense<0.000000e+00> : vector<8x32xf32>
    %202 = tpu.matmul %201, %46, %cst_80 {dimension_numbers = #tpu.dot_dimension_numbers<[1], [0], [0], [1], [0, 0, 1, 1], [], []>} : vector<8x32xbf16>, vector<32x32xbf16>, vector<8x32xf32> -> vector<8x32xf32>
    %203 = arith.truncf %200 : vector<8x32xf32> to vector<8x32xbf16>
    %204 = arith.truncf %43 : vector<32x16xf32> to vector<32x16xbf16>
    %cst_81 = arith.constant dense<0.000000e+00> : vector<8x16xf32>
    %205 = tpu.matmul %203, %204, %cst_81 {dimension_numbers = #tpu.dot_dimension_numbers<[1], [0], [0], [1], [0, 0, 1, 1], [], []>} : vector<8x32xbf16>, vector<32x16xbf16>, vector<8x16xf32> -> vector<8x16xf32>
    %206 = arith.addf %205, %42 : vector<8x16xf32>
    %cst_82 = arith.constant dense<0xFF800000> : vector<8xf32>
    %207 = vector.multi_reduction <maximumf>, %206, %cst_82 [1] : vector<8x16xf32> to vector<8xf32>
    %208 = vector.shape_cast %207 : vector<8xf32> to vector<8x1xf32>
    %209 = vector.broadcast %208 : vector<8x1xf32> to vector<8x16xf32>
    %210 = arith.subf %206, %209 : vector<8x16xf32>
    %211 = math.exp %210 : vector<8x16xf32>
    %212 = arith.truncf %211 : vector<8x16xf32> to vector<8x16xbf16>
    %213 = arith.truncf %50 : vector<16x32xf32> to vector<16x32xbf16>
    %cst_83 = arith.constant dense<0.000000e+00> : vector<8x32xf32>
    %214 = tpu.matmul %212, %213, %cst_83 {dimension_numbers = #tpu.dot_dimension_numbers<[1], [0], [0], [1], [0, 0, 1, 1], [], []>} : vector<8x16xbf16>, vector<16x32xbf16>, vector<8x32xf32> -> vector<8x32xf32>
    %cst_84 = arith.constant dense<0.000000e+00> : vector<8xf32>
    %215 = vector.multi_reduction <add>, %211, %cst_84 [1] : vector<8x16xf32> to vector<8xf32>
    %216 = vector.shape_cast %215 : vector<8xf32> to vector<8x1xf32>
    %217 = tpu.reciprocal %216 {approx = true} : vector<8x1xf32> -> vector<8x1xf32>
    %218 = vector.extract_strided_slice %58 {offsets = [48, 0], sizes = [8, 32], strides = [1, 1]} : vector<64x32xf32> to vector<8x32xf32>
    %219 = vector.broadcast %217 : vector<8x1xf32> to vector<8x32xf32>
    %220 = arith.mulf %214, %219 : vector<8x32xf32>
    %221 = arith.addf %218, %220 : vector<8x32xf32>
    %222 = arith.addf %221, %202 : vector<8x32xf32>
    %223 = math.tanh %222 : vector<8x32xf32>
    %224 = arith.truncf %223 : vector<8x32xf32> to vector<8x32xbf16>
    %cst_85 = arith.constant dense<0.000000e+00> : vector<8x32xf32>
    %225 = tpu.matmul %224, %46, %cst_85 {dimension_numbers = #tpu.dot_dimension_numbers<[1], [0], [0], [1], [0, 0, 1, 1], [], []>} : vector<8x32xbf16>, vector<32x32xbf16>, vector<8x32xf32> -> vector<8x32xf32>
    %226 = arith.truncf %223 : vector<8x32xf32> to vector<8x32xbf16>
    %227 = arith.truncf %43 : vector<32x16xf32> to vector<32x16xbf16>
    %cst_86 = arith.constant dense<0.000000e+00> : vector<8x16xf32>
    %228 = tpu.matmul %226, %227, %cst_86 {dimension_numbers = #tpu.dot_dimension_numbers<[1], [0], [0], [1], [0, 0, 1, 1], [], []>} : vector<8x32xbf16>, vector<32x16xbf16>, vector<8x16xf32> -> vector<8x16xf32>
    %229 = arith.addf %228, %42 : vector<8x16xf32>
    %cst_87 = arith.constant dense<0xFF800000> : vector<8xf32>
    %230 = vector.multi_reduction <maximumf>, %229, %cst_87 [1] : vector<8x16xf32> to vector<8xf32>
    %231 = vector.shape_cast %230 : vector<8xf32> to vector<8x1xf32>
    %232 = vector.broadcast %231 : vector<8x1xf32> to vector<8x16xf32>
    %233 = arith.subf %229, %232 : vector<8x16xf32>
    %234 = math.exp %233 : vector<8x16xf32>
    %235 = arith.truncf %234 : vector<8x16xf32> to vector<8x16xbf16>
    %236 = arith.truncf %50 : vector<16x32xf32> to vector<16x32xbf16>
    %cst_88 = arith.constant dense<0.000000e+00> : vector<8x32xf32>
    %237 = tpu.matmul %235, %236, %cst_88 {dimension_numbers = #tpu.dot_dimension_numbers<[1], [0], [0], [1], [0, 0, 1, 1], [], []>} : vector<8x16xbf16>, vector<16x32xbf16>, vector<8x32xf32> -> vector<8x32xf32>
    %cst_89 = arith.constant dense<0.000000e+00> : vector<8xf32>
    %238 = vector.multi_reduction <add>, %234, %cst_89 [1] : vector<8x16xf32> to vector<8xf32>
    %239 = vector.shape_cast %238 : vector<8xf32> to vector<8x1xf32>
    %240 = tpu.reciprocal %239 {approx = true} : vector<8x1xf32> -> vector<8x1xf32>
    %241 = vector.extract_strided_slice %58 {offsets = [56, 0], sizes = [8, 32], strides = [1, 1]} : vector<64x32xf32> to vector<8x32xf32>
    %242 = vector.broadcast %240 : vector<8x1xf32> to vector<8x32xf32>
    %243 = arith.mulf %237, %242 : vector<8x32xf32>
    %244 = arith.addf %241, %243 : vector<8x32xf32>
    %245 = arith.addf %244, %225 : vector<8x32xf32>
    %246 = math.tanh %245 : vector<8x32xf32>
    %247 = tpu.concatenate %85, %108, %131, %154, %177, %200, %223, %246 in 0 : vector<8x32xf32>, vector<8x32xf32>, vector<8x32xf32>, vector<8x32xf32>, vector<8x32xf32>, vector<8x32xf32>, vector<8x32xf32>, vector<8x32xf32> -> vector<64x32xf32>
    %c1 = arith.constant 1 : index
    %c0_90 = arith.constant 0 : index
    %c0_91 = arith.constant 0 : index
    %248 = vector.load %arg17[%c1, %c0_90, %c0_91] : memref<2x32x32xbf16, #tpu.memory_space<vmem>>, vector<1x32x32xbf16>
    %249 = vector.shape_cast %248 : vector<1x32x32xbf16> to vector<32x32xbf16>
    %c1_92 = arith.constant 1 : index
    %c0_93 = arith.constant 0 : index
    %c0_94 = arith.constant 0 : index
    %250 = vector.load %arg15[%c1_92, %c0_93, %c0_94] : memref<2x32x32xbf16, #tpu.memory_space<vmem>>, vector<1x32x32xbf16>
    %251 = vector.shape_cast %250 : vector<1x32x32xbf16> to vector<32x32xbf16>
    %252 = arith.truncf %44 : vector<16x32xf32> to vector<16x32xbf16>
    %cst_95 = arith.constant dense<0.000000e+00> : vector<16x32xf32>
    %253 = tpu.matmul %252, %251, %cst_95 {dimension_numbers = #tpu.dot_dimension_numbers<[1], [0], [0], [1], [0, 0, 1, 1], [], []>} : vector<16x32xbf16>, vector<32x32xbf16>, vector<16x32xf32> -> vector<16x32xf32>
    %c1_96 = arith.constant 1 : index
    %c0_97 = arith.constant 0 : index
    %c0_98 = arith.constant 0 : index
    %254 = vector.load %arg16[%c1_96, %c0_97, %c0_98] : memref<2x32x32xbf16, #tpu.memory_space<vmem>>, vector<1x32x32xbf16>
    %255 = vector.shape_cast %254 : vector<1x32x32xbf16> to vector<32x32xbf16>
    %256 = arith.truncf %247 : vector<64x32xf32> to vector<64x32xbf16>
    %cst_99 = arith.constant dense<0.000000e+00> : vector<64x32xf32>
    %257 = tpu.matmul %256, %255, %cst_99 {dimension_numbers = #tpu.dot_dimension_numbers<[1], [0], [0], [1], [0, 0, 1, 1], [], []>} : vector<64x32xbf16>, vector<32x32xbf16>, vector<64x32xf32> -> vector<64x32xf32>
    %c1_100 = arith.constant 1 : index
    %c0_101 = arith.constant 0 : index
    %c0_102 = arith.constant 0 : index
    %258 = vector.load %arg18[%c1_100, %c0_101, %c0_102] : memref<2x1x32xf32, #tpu.memory_space<vmem>>, vector<1x1x32xf32>
    %259 = vector.shape_cast %258 : vector<1x1x32xf32> to vector<1x32xf32>
    %260 = vector.broadcast %259 : vector<1x32xf32> to vector<64x32xf32>
    %261 = arith.addf %257, %260 : vector<64x32xf32>
    %262 = vector.extract_strided_slice %16 {offsets = [1, 0], sizes = [1, 32], strides = [1, 1]} : vector<2x64xf32> to vector<1x32xf32>
    %263 = vector.extract_strided_slice %16 {offsets = [1, 32], sizes = [1, 32], strides = [1, 1]} : vector<2x64xf32> to vector<1x32xf32>
    %cst_103 = arith.constant 0.000000e+00 : f32
    %264 = vector.broadcast %cst_103 : f32 to vector<6x32xf32>
    %265 = tpu.concatenate %262, %263, %264 in 0 : vector<1x32xf32>, vector<1x32xf32>, vector<6x32xf32> -> vector<8x32xf32>
    %266 = arith.truncf %265 : vector<8x32xf32> to vector<8x32xbf16>
    %cst_104 = arith.constant dense<0.000000e+00> : vector<8x32xf32>
    %267 = tpu.matmul %266, %249, %cst_104 {dimension_numbers = #tpu.dot_dimension_numbers<[1], [0], [0], [1], [0, 0, 1, 1], [], []>} : vector<8x32xbf16>, vector<32x32xbf16>, vector<8x32xf32> -> vector<8x32xf32>
    %268 = arith.truncf %265 : vector<8x32xf32> to vector<8x32xbf16>
    %269 = arith.truncf %43 : vector<32x16xf32> to vector<32x16xbf16>
    %cst_105 = arith.constant dense<0.000000e+00> : vector<8x16xf32>
    %270 = tpu.matmul %268, %269, %cst_105 {dimension_numbers = #tpu.dot_dimension_numbers<[1], [0], [0], [1], [0, 0, 1, 1], [], []>} : vector<8x32xbf16>, vector<32x16xbf16>, vector<8x16xf32> -> vector<8x16xf32>
    %271 = arith.addf %270, %42 : vector<8x16xf32>
    %cst_106 = arith.constant dense<0xFF800000> : vector<8xf32>
    %272 = vector.multi_reduction <maximumf>, %271, %cst_106 [1] : vector<8x16xf32> to vector<8xf32>
    %273 = vector.shape_cast %272 : vector<8xf32> to vector<8x1xf32>
    %274 = vector.broadcast %273 : vector<8x1xf32> to vector<8x16xf32>
    %275 = arith.subf %271, %274 : vector<8x16xf32>
    %276 = math.exp %275 : vector<8x16xf32>
    %277 = arith.truncf %276 : vector<8x16xf32> to vector<8x16xbf16>
    %278 = arith.truncf %253 : vector<16x32xf32> to vector<16x32xbf16>
    %cst_107 = arith.constant dense<0.000000e+00> : vector<8x32xf32>
    %279 = tpu.matmul %277, %278, %cst_107 {dimension_numbers = #tpu.dot_dimension_numbers<[1], [0], [0], [1], [0, 0, 1, 1], [], []>} : vector<8x16xbf16>, vector<16x32xbf16>, vector<8x32xf32> -> vector<8x32xf32>
    %cst_108 = arith.constant dense<0.000000e+00> : vector<8xf32>
    %280 = vector.multi_reduction <add>, %276, %cst_108 [1] : vector<8x16xf32> to vector<8xf32>
    %281 = vector.shape_cast %280 : vector<8xf32> to vector<8x1xf32>
    %282 = tpu.reciprocal %281 {approx = true} : vector<8x1xf32> -> vector<8x1xf32>
    %283 = vector.extract_strided_slice %261 {offsets = [0, 0], sizes = [8, 32], strides = [1, 1]} : vector<64x32xf32> to vector<8x32xf32>
    %284 = vector.broadcast %282 : vector<8x1xf32> to vector<8x32xf32>
    %285 = arith.mulf %279, %284 : vector<8x32xf32>
    %286 = arith.addf %283, %285 : vector<8x32xf32>
    %287 = arith.addf %286, %267 : vector<8x32xf32>
    %288 = math.tanh %287 : vector<8x32xf32>
    %289 = arith.truncf %288 : vector<8x32xf32> to vector<8x32xbf16>
    %cst_109 = arith.constant dense<0.000000e+00> : vector<8x32xf32>
    %290 = tpu.matmul %289, %249, %cst_109 {dimension_numbers = #tpu.dot_dimension_numbers<[1], [0], [0], [1], [0, 0, 1, 1], [], []>} : vector<8x32xbf16>, vector<32x32xbf16>, vector<8x32xf32> -> vector<8x32xf32>
    %291 = arith.truncf %288 : vector<8x32xf32> to vector<8x32xbf16>
    %292 = arith.truncf %43 : vector<32x16xf32> to vector<32x16xbf16>
    %cst_110 = arith.constant dense<0.000000e+00> : vector<8x16xf32>
    %293 = tpu.matmul %291, %292, %cst_110 {dimension_numbers = #tpu.dot_dimension_numbers<[1], [0], [0], [1], [0, 0, 1, 1], [], []>} : vector<8x32xbf16>, vector<32x16xbf16>, vector<8x16xf32> -> vector<8x16xf32>
    %294 = arith.addf %293, %42 : vector<8x16xf32>
    %cst_111 = arith.constant dense<0xFF800000> : vector<8xf32>
    %295 = vector.multi_reduction <maximumf>, %294, %cst_111 [1] : vector<8x16xf32> to vector<8xf32>
    %296 = vector.shape_cast %295 : vector<8xf32> to vector<8x1xf32>
    %297 = vector.broadcast %296 : vector<8x1xf32> to vector<8x16xf32>
    %298 = arith.subf %294, %297 : vector<8x16xf32>
    %299 = math.exp %298 : vector<8x16xf32>
    %300 = arith.truncf %299 : vector<8x16xf32> to vector<8x16xbf16>
    %301 = arith.truncf %253 : vector<16x32xf32> to vector<16x32xbf16>
    %cst_112 = arith.constant dense<0.000000e+00> : vector<8x32xf32>
    %302 = tpu.matmul %300, %301, %cst_112 {dimension_numbers = #tpu.dot_dimension_numbers<[1], [0], [0], [1], [0, 0, 1, 1], [], []>} : vector<8x16xbf16>, vector<16x32xbf16>, vector<8x32xf32> -> vector<8x32xf32>
    %cst_113 = arith.constant dense<0.000000e+00> : vector<8xf32>
    %303 = vector.multi_reduction <add>, %299, %cst_113 [1] : vector<8x16xf32> to vector<8xf32>
    %304 = vector.shape_cast %303 : vector<8xf32> to vector<8x1xf32>
    %305 = tpu.reciprocal %304 {approx = true} : vector<8x1xf32> -> vector<8x1xf32>
    %306 = vector.extract_strided_slice %261 {offsets = [8, 0], sizes = [8, 32], strides = [1, 1]} : vector<64x32xf32> to vector<8x32xf32>
    %307 = vector.broadcast %305 : vector<8x1xf32> to vector<8x32xf32>
    %308 = arith.mulf %302, %307 : vector<8x32xf32>
    %309 = arith.addf %306, %308 : vector<8x32xf32>
    %310 = arith.addf %309, %290 : vector<8x32xf32>
    %311 = math.tanh %310 : vector<8x32xf32>
    %312 = arith.truncf %311 : vector<8x32xf32> to vector<8x32xbf16>
    %cst_114 = arith.constant dense<0.000000e+00> : vector<8x32xf32>
    %313 = tpu.matmul %312, %249, %cst_114 {dimension_numbers = #tpu.dot_dimension_numbers<[1], [0], [0], [1], [0, 0, 1, 1], [], []>} : vector<8x32xbf16>, vector<32x32xbf16>, vector<8x32xf32> -> vector<8x32xf32>
    %314 = arith.truncf %311 : vector<8x32xf32> to vector<8x32xbf16>
    %315 = arith.truncf %43 : vector<32x16xf32> to vector<32x16xbf16>
    %cst_115 = arith.constant dense<0.000000e+00> : vector<8x16xf32>
    %316 = tpu.matmul %314, %315, %cst_115 {dimension_numbers = #tpu.dot_dimension_numbers<[1], [0], [0], [1], [0, 0, 1, 1], [], []>} : vector<8x32xbf16>, vector<32x16xbf16>, vector<8x16xf32> -> vector<8x16xf32>
    %317 = arith.addf %316, %42 : vector<8x16xf32>
    %cst_116 = arith.constant dense<0xFF800000> : vector<8xf32>
    %318 = vector.multi_reduction <maximumf>, %317, %cst_116 [1] : vector<8x16xf32> to vector<8xf32>
    %319 = vector.shape_cast %318 : vector<8xf32> to vector<8x1xf32>
    %320 = vector.broadcast %319 : vector<8x1xf32> to vector<8x16xf32>
    %321 = arith.subf %317, %320 : vector<8x16xf32>
    %322 = math.exp %321 : vector<8x16xf32>
    %323 = arith.truncf %322 : vector<8x16xf32> to vector<8x16xbf16>
    %324 = arith.truncf %253 : vector<16x32xf32> to vector<16x32xbf16>
    %cst_117 = arith.constant dense<0.000000e+00> : vector<8x32xf32>
    %325 = tpu.matmul %323, %324, %cst_117 {dimension_numbers = #tpu.dot_dimension_numbers<[1], [0], [0], [1], [0, 0, 1, 1], [], []>} : vector<8x16xbf16>, vector<16x32xbf16>, vector<8x32xf32> -> vector<8x32xf32>
    %cst_118 = arith.constant dense<0.000000e+00> : vector<8xf32>
    %326 = vector.multi_reduction <add>, %322, %cst_118 [1] : vector<8x16xf32> to vector<8xf32>
    %327 = vector.shape_cast %326 : vector<8xf32> to vector<8x1xf32>
    %328 = tpu.reciprocal %327 {approx = true} : vector<8x1xf32> -> vector<8x1xf32>
    %329 = vector.extract_strided_slice %261 {offsets = [16, 0], sizes = [8, 32], strides = [1, 1]} : vector<64x32xf32> to vector<8x32xf32>
    %330 = vector.broadcast %328 : vector<8x1xf32> to vector<8x32xf32>
    %331 = arith.mulf %325, %330 : vector<8x32xf32>
    %332 = arith.addf %329, %331 : vector<8x32xf32>
    %333 = arith.addf %332, %313 : vector<8x32xf32>
    %334 = math.tanh %333 : vector<8x32xf32>
    %335 = arith.truncf %334 : vector<8x32xf32> to vector<8x32xbf16>
    %cst_119 = arith.constant dense<0.000000e+00> : vector<8x32xf32>
    %336 = tpu.matmul %335, %249, %cst_119 {dimension_numbers = #tpu.dot_dimension_numbers<[1], [0], [0], [1], [0, 0, 1, 1], [], []>} : vector<8x32xbf16>, vector<32x32xbf16>, vector<8x32xf32> -> vector<8x32xf32>
    %337 = arith.truncf %334 : vector<8x32xf32> to vector<8x32xbf16>
    %338 = arith.truncf %43 : vector<32x16xf32> to vector<32x16xbf16>
    %cst_120 = arith.constant dense<0.000000e+00> : vector<8x16xf32>
    %339 = tpu.matmul %337, %338, %cst_120 {dimension_numbers = #tpu.dot_dimension_numbers<[1], [0], [0], [1], [0, 0, 1, 1], [], []>} : vector<8x32xbf16>, vector<32x16xbf16>, vector<8x16xf32> -> vector<8x16xf32>
    %340 = arith.addf %339, %42 : vector<8x16xf32>
    %cst_121 = arith.constant dense<0xFF800000> : vector<8xf32>
    %341 = vector.multi_reduction <maximumf>, %340, %cst_121 [1] : vector<8x16xf32> to vector<8xf32>
    %342 = vector.shape_cast %341 : vector<8xf32> to vector<8x1xf32>
    %343 = vector.broadcast %342 : vector<8x1xf32> to vector<8x16xf32>
    %344 = arith.subf %340, %343 : vector<8x16xf32>
    %345 = math.exp %344 : vector<8x16xf32>
    %346 = arith.truncf %345 : vector<8x16xf32> to vector<8x16xbf16>
    %347 = arith.truncf %253 : vector<16x32xf32> to vector<16x32xbf16>
    %cst_122 = arith.constant dense<0.000000e+00> : vector<8x32xf32>
    %348 = tpu.matmul %346, %347, %cst_122 {dimension_numbers = #tpu.dot_dimension_numbers<[1], [0], [0], [1], [0, 0, 1, 1], [], []>} : vector<8x16xbf16>, vector<16x32xbf16>, vector<8x32xf32> -> vector<8x32xf32>
    %cst_123 = arith.constant dense<0.000000e+00> : vector<8xf32>
    %349 = vector.multi_reduction <add>, %345, %cst_123 [1] : vector<8x16xf32> to vector<8xf32>
    %350 = vector.shape_cast %349 : vector<8xf32> to vector<8x1xf32>
    %351 = tpu.reciprocal %350 {approx = true} : vector<8x1xf32> -> vector<8x1xf32>
    %352 = vector.extract_strided_slice %261 {offsets = [24, 0], sizes = [8, 32], strides = [1, 1]} : vector<64x32xf32> to vector<8x32xf32>
    %353 = vector.broadcast %351 : vector<8x1xf32> to vector<8x32xf32>
    %354 = arith.mulf %348, %353 : vector<8x32xf32>
    %355 = arith.addf %352, %354 : vector<8x32xf32>
    %356 = arith.addf %355, %336 : vector<8x32xf32>
    %357 = math.tanh %356 : vector<8x32xf32>
    %358 = arith.truncf %357 : vector<8x32xf32> to vector<8x32xbf16>
    %cst_124 = arith.constant dense<0.000000e+00> : vector<8x32xf32>
    %359 = tpu.matmul %358, %249, %cst_124 {dimension_numbers = #tpu.dot_dimension_numbers<[1], [0], [0], [1], [0, 0, 1, 1], [], []>} : vector<8x32xbf16>, vector<32x32xbf16>, vector<8x32xf32> -> vector<8x32xf32>
    %360 = arith.truncf %357 : vector<8x32xf32> to vector<8x32xbf16>
    %361 = arith.truncf %43 : vector<32x16xf32> to vector<32x16xbf16>
    %cst_125 = arith.constant dense<0.000000e+00> : vector<8x16xf32>
    %362 = tpu.matmul %360, %361, %cst_125 {dimension_numbers = #tpu.dot_dimension_numbers<[1], [0], [0], [1], [0, 0, 1, 1], [], []>} : vector<8x32xbf16>, vector<32x16xbf16>, vector<8x16xf32> -> vector<8x16xf32>
    %363 = arith.addf %362, %42 : vector<8x16xf32>
    %cst_126 = arith.constant dense<0xFF800000> : vector<8xf32>
    %364 = vector.multi_reduction <maximumf>, %363, %cst_126 [1] : vector<8x16xf32> to vector<8xf32>
    %365 = vector.shape_cast %364 : vector<8xf32> to vector<8x1xf32>
    %366 = vector.broadcast %365 : vector<8x1xf32> to vector<8x16xf32>
    %367 = arith.subf %363, %366 : vector<8x16xf32>
    %368 = math.exp %367 : vector<8x16xf32>
    %369 = arith.truncf %368 : vector<8x16xf32> to vector<8x16xbf16>
    %370 = arith.truncf %253 : vector<16x32xf32> to vector<16x32xbf16>
    %cst_127 = arith.constant dense<0.000000e+00> : vector<8x32xf32>
    %371 = tpu.matmul %369, %370, %cst_127 {dimension_numbers = #tpu.dot_dimension_numbers<[1], [0], [0], [1], [0, 0, 1, 1], [], []>} : vector<8x16xbf16>, vector<16x32xbf16>, vector<8x32xf32> -> vector<8x32xf32>
    %cst_128 = arith.constant dense<0.000000e+00> : vector<8xf32>
    %372 = vector.multi_reduction <add>, %368, %cst_128 [1] : vector<8x16xf32> to vector<8xf32>
    %373 = vector.shape_cast %372 : vector<8xf32> to vector<8x1xf32>
    %374 = tpu.reciprocal %373 {approx = true} : vector<8x1xf32> -> vector<8x1xf32>
    %375 = vector.extract_strided_slice %261 {offsets = [32, 0], sizes = [8, 32], strides = [1, 1]} : vector<64x32xf32> to vector<8x32xf32>
    %376 = vector.broadcast %374 : vector<8x1xf32> to vector<8x32xf32>
    %377 = arith.mulf %371, %376 : vector<8x32xf32>
    %378 = arith.addf %375, %377 : vector<8x32xf32>
    %379 = arith.addf %378, %359 : vector<8x32xf32>
    %380 = math.tanh %379 : vector<8x32xf32>
    %381 = arith.truncf %380 : vector<8x32xf32> to vector<8x32xbf16>
    %cst_129 = arith.constant dense<0.000000e+00> : vector<8x32xf32>
    %382 = tpu.matmul %381, %249, %cst_129 {dimension_numbers = #tpu.dot_dimension_numbers<[1], [0], [0], [1], [0, 0, 1, 1], [], []>} : vector<8x32xbf16>, vector<32x32xbf16>, vector<8x32xf32> -> vector<8x32xf32>
    %383 = arith.truncf %380 : vector<8x32xf32> to vector<8x32xbf16>
    %384 = arith.truncf %43 : vector<32x16xf32> to vector<32x16xbf16>
    %cst_130 = arith.constant dense<0.000000e+00> : vector<8x16xf32>
    %385 = tpu.matmul %383, %384, %cst_130 {dimension_numbers = #tpu.dot_dimension_numbers<[1], [0], [0], [1], [0, 0, 1, 1], [], []>} : vector<8x32xbf16>, vector<32x16xbf16>, vector<8x16xf32> -> vector<8x16xf32>
    %386 = arith.addf %385, %42 : vector<8x16xf32>
    %cst_131 = arith.constant dense<0xFF800000> : vector<8xf32>
    %387 = vector.multi_reduction <maximumf>, %386, %cst_131 [1] : vector<8x16xf32> to vector<8xf32>
    %388 = vector.shape_cast %387 : vector<8xf32> to vector<8x1xf32>
    %389 = vector.broadcast %388 : vector<8x1xf32> to vector<8x16xf32>
    %390 = arith.subf %386, %389 : vector<8x16xf32>
    %391 = math.exp %390 : vector<8x16xf32>
    %392 = arith.truncf %391 : vector<8x16xf32> to vector<8x16xbf16>
    %393 = arith.truncf %253 : vector<16x32xf32> to vector<16x32xbf16>
    %cst_132 = arith.constant dense<0.000000e+00> : vector<8x32xf32>
    %394 = tpu.matmul %392, %393, %cst_132 {dimension_numbers = #tpu.dot_dimension_numbers<[1], [0], [0], [1], [0, 0, 1, 1], [], []>} : vector<8x16xbf16>, vector<16x32xbf16>, vector<8x32xf32> -> vector<8x32xf32>
    %cst_133 = arith.constant dense<0.000000e+00> : vector<8xf32>
    %395 = vector.multi_reduction <add>, %391, %cst_133 [1] : vector<8x16xf32> to vector<8xf32>
    %396 = vector.shape_cast %395 : vector<8xf32> to vector<8x1xf32>
    %397 = tpu.reciprocal %396 {approx = true} : vector<8x1xf32> -> vector<8x1xf32>
    %398 = vector.extract_strided_slice %261 {offsets = [40, 0], sizes = [8, 32], strides = [1, 1]} : vector<64x32xf32> to vector<8x32xf32>
    %399 = vector.broadcast %397 : vector<8x1xf32> to vector<8x32xf32>
    %400 = arith.mulf %394, %399 : vector<8x32xf32>
    %401 = arith.addf %398, %400 : vector<8x32xf32>
    %402 = arith.addf %401, %382 : vector<8x32xf32>
    %403 = math.tanh %402 : vector<8x32xf32>
    %404 = arith.truncf %403 : vector<8x32xf32> to vector<8x32xbf16>
    %cst_134 = arith.constant dense<0.000000e+00> : vector<8x32xf32>
    %405 = tpu.matmul %404, %249, %cst_134 {dimension_numbers = #tpu.dot_dimension_numbers<[1], [0], [0], [1], [0, 0, 1, 1], [], []>} : vector<8x32xbf16>, vector<32x32xbf16>, vector<8x32xf32> -> vector<8x32xf32>
    %406 = arith.truncf %403 : vector<8x32xf32> to vector<8x32xbf16>
    %407 = arith.truncf %43 : vector<32x16xf32> to vector<32x16xbf16>
    %cst_135 = arith.constant dense<0.000000e+00> : vector<8x16xf32>
    %408 = tpu.matmul %406, %407, %cst_135 {dimension_numbers = #tpu.dot_dimension_numbers<[1], [0], [0], [1], [0, 0, 1, 1], [], []>} : vector<8x32xbf16>, vector<32x16xbf16>, vector<8x16xf32> -> vector<8x16xf32>
    %409 = arith.addf %408, %42 : vector<8x16xf32>
    %cst_136 = arith.constant dense<0xFF800000> : vector<8xf32>
    %410 = vector.multi_reduction <maximumf>, %409, %cst_136 [1] : vector<8x16xf32> to vector<8xf32>
    %411 = vector.shape_cast %410 : vector<8xf32> to vector<8x1xf32>
    %412 = vector.broadcast %411 : vector<8x1xf32> to vector<8x16xf32>
    %413 = arith.subf %409, %412 : vector<8x16xf32>
    %414 = math.exp %413 : vector<8x16xf32>
    %415 = arith.truncf %414 : vector<8x16xf32> to vector<8x16xbf16>
    %416 = arith.truncf %253 : vector<16x32xf32> to vector<16x32xbf16>
    %cst_137 = arith.constant dense<0.000000e+00> : vector<8x32xf32>
    %417 = tpu.matmul %415, %416, %cst_137 {dimension_numbers = #tpu.dot_dimension_numbers<[1], [0], [0], [1], [0, 0, 1, 1], [], []>} : vector<8x16xbf16>, vector<16x32xbf16>, vector<8x32xf32> -> vector<8x32xf32>
    %cst_138 = arith.constant dense<0.000000e+00> : vector<8xf32>
    %418 = vector.multi_reduction <add>, %414, %cst_138 [1] : vector<8x16xf32> to vector<8xf32>
    %419 = vector.shape_cast %418 : vector<8xf32> to vector<8x1xf32>
    %420 = tpu.reciprocal %419 {approx = true} : vector<8x1xf32> -> vector<8x1xf32>
    %421 = vector.extract_strided_slice %261 {offsets = [48, 0], sizes = [8, 32], strides = [1, 1]} : vector<64x32xf32> to vector<8x32xf32>
    %422 = vector.broadcast %420 : vector<8x1xf32> to vector<8x32xf32>
    %423 = arith.mulf %417, %422 : vector<8x32xf32>
    %424 = arith.addf %421, %423 : vector<8x32xf32>
    %425 = arith.addf %424, %405 : vector<8x32xf32>
    %426 = math.tanh %425 : vector<8x32xf32>
    %427 = arith.truncf %426 : vector<8x32xf32> to vector<8x32xbf16>
    %cst_139 = arith.constant dense<0.000000e+00> : vector<8x32xf32>
    %428 = tpu.matmul %427, %249, %cst_139 {dimension_numbers = #tpu.dot_dimension_numbers<[1], [0], [0], [1], [0, 0, 1, 1], [], []>} : vector<8x32xbf16>, vector<32x32xbf16>, vector<8x32xf32> -> vector<8x32xf32>
    %429 = arith.truncf %426 : vector<8x32xf32> to vector<8x32xbf16>
    %430 = arith.truncf %43 : vector<32x16xf32> to vector<32x16xbf16>
    %cst_140 = arith.constant dense<0.000000e+00> : vector<8x16xf32>
    %431 = tpu.matmul %429, %430, %cst_140 {dimension_numbers = #tpu.dot_dimension_numbers<[1], [0], [0], [1], [0, 0, 1, 1], [], []>} : vector<8x32xbf16>, vector<32x16xbf16>, vector<8x16xf32> -> vector<8x16xf32>
    %432 = arith.addf %431, %42 : vector<8x16xf32>
    %cst_141 = arith.constant dense<0xFF800000> : vector<8xf32>
    %433 = vector.multi_reduction <maximumf>, %432, %cst_141 [1] : vector<8x16xf32> to vector<8xf32>
    %434 = vector.shape_cast %433 : vector<8xf32> to vector<8x1xf32>
    %435 = vector.broadcast %434 : vector<8x1xf32> to vector<8x16xf32>
    %436 = arith.subf %432, %435 : vector<8x16xf32>
    %437 = math.exp %436 : vector<8x16xf32>
    %438 = arith.truncf %437 : vector<8x16xf32> to vector<8x16xbf16>
    %439 = arith.truncf %253 : vector<16x32xf32> to vector<16x32xbf16>
    %cst_142 = arith.constant dense<0.000000e+00> : vector<8x32xf32>
    %440 = tpu.matmul %438, %439, %cst_142 {dimension_numbers = #tpu.dot_dimension_numbers<[1], [0], [0], [1], [0, 0, 1, 1], [], []>} : vector<8x16xbf16>, vector<16x32xbf16>, vector<8x32xf32> -> vector<8x32xf32>
    %cst_143 = arith.constant dense<0.000000e+00> : vector<8xf32>
    %441 = vector.multi_reduction <add>, %437, %cst_143 [1] : vector<8x16xf32> to vector<8xf32>
    %442 = vector.shape_cast %441 : vector<8xf32> to vector<8x1xf32>
    %443 = tpu.reciprocal %442 {approx = true} : vector<8x1xf32> -> vector<8x1xf32>
    %444 = vector.extract_strided_slice %261 {offsets = [56, 0], sizes = [8, 32], strides = [1, 1]} : vector<64x32xf32> to vector<8x32xf32>
    %445 = vector.broadcast %443 : vector<8x1xf32> to vector<8x32xf32>
    %446 = arith.mulf %440, %445 : vector<8x32xf32>
    %447 = arith.addf %444, %446 : vector<8x32xf32>
    %448 = arith.addf %447, %428 : vector<8x32xf32>
    %449 = math.tanh %448 : vector<8x32xf32>
    %450 = vector.extract_strided_slice %288 {offsets = [0, 0], sizes = [1, 32], strides = [1, 1]} : vector<8x32xf32> to vector<1x32xf32>
    %451 = vector.extract_strided_slice %311 {offsets = [0, 0], sizes = [1, 32], strides = [1, 1]} : vector<8x32xf32> to vector<1x32xf32>
    %452 = vector.extract_strided_slice %334 {offsets = [0, 0], sizes = [1, 32], strides = [1, 1]} : vector<8x32xf32> to vector<1x32xf32>
    %453 = vector.extract_strided_slice %357 {offsets = [0, 0], sizes = [1, 32], strides = [1, 1]} : vector<8x32xf32> to vector<1x32xf32>
    %454 = vector.extract_strided_slice %380 {offsets = [0, 0], sizes = [1, 32], strides = [1, 1]} : vector<8x32xf32> to vector<1x32xf32>
    %455 = vector.extract_strided_slice %403 {offsets = [0, 0], sizes = [1, 32], strides = [1, 1]} : vector<8x32xf32> to vector<1x32xf32>
    %456 = vector.extract_strided_slice %426 {offsets = [0, 0], sizes = [1, 32], strides = [1, 1]} : vector<8x32xf32> to vector<1x32xf32>
    %457 = vector.extract_strided_slice %449 {offsets = [0, 0], sizes = [1, 32], strides = [1, 1]} : vector<8x32xf32> to vector<1x32xf32>
    %458 = vector.extract_strided_slice %288 {offsets = [1, 0], sizes = [1, 32], strides = [1, 1]} : vector<8x32xf32> to vector<1x32xf32>
    %459 = vector.extract_strided_slice %311 {offsets = [1, 0], sizes = [1, 32], strides = [1, 1]} : vector<8x32xf32> to vector<1x32xf32>
    %460 = vector.extract_strided_slice %334 {offsets = [1, 0], sizes = [1, 32], strides = [1, 1]} : vector<8x32xf32> to vector<1x32xf32>
    %461 = vector.extract_strided_slice %357 {offsets = [1, 0], sizes = [1, 32], strides = [1, 1]} : vector<8x32xf32> to vector<1x32xf32>
    %462 = vector.extract_strided_slice %380 {offsets = [1, 0], sizes = [1, 32], strides = [1, 1]} : vector<8x32xf32> to vector<1x32xf32>
    %463 = vector.extract_strided_slice %403 {offsets = [1, 0], sizes = [1, 32], strides = [1, 1]} : vector<8x32xf32> to vector<1x32xf32>
    %464 = vector.extract_strided_slice %426 {offsets = [1, 0], sizes = [1, 32], strides = [1, 1]} : vector<8x32xf32> to vector<1x32xf32>
    %465 = vector.extract_strided_slice %449 {offsets = [1, 0], sizes = [1, 32], strides = [1, 1]} : vector<8x32xf32> to vector<1x32xf32>
    %466 = tpu.concatenate %450, %451, %452, %453, %454, %455, %456, %457, %458, %459, %460, %461, %462, %463, %464, %465 in 0 : vector<1x32xf32>, vector<1x32xf32>, vector<1x32xf32>, vector<1x32xf32>, vector<1x32xf32>, vector<1x32xf32>, vector<1x32xf32>, vector<1x32xf32>, vector<1x32xf32>, vector<1x32xf32>, vector<1x32xf32>, vector<1x32xf32>, vector<1x32xf32>, vector<1x32xf32>, vector<1x32xf32>, vector<1x32xf32> -> vector<16x32xf32>
    %c0_144 = arith.constant 0 : index
    %c0_145 = arith.constant 0 : index
    %467 = vector.load %arg19[%c0_144, %c0_145] : memref<32x32xbf16, #tpu.memory_space<vmem>>, vector<32x32xbf16>
    %468 = arith.truncf %466 : vector<16x32xf32> to vector<16x32xbf16>
    %cst_146 = arith.constant dense<0.000000e+00> : vector<16x32xf32>
    %469 = tpu.matmul %468, %467, %cst_146 {dimension_numbers = #tpu.dot_dimension_numbers<[1], [0], [0], [1], [0, 0, 1, 1], [], []>} : vector<16x32xbf16>, vector<32x32xbf16>, vector<16x32xf32> -> vector<16x32xf32>
    %c0_147 = arith.constant 0 : index
    %c0_148 = arith.constant 0 : index
    %470 = vector.load %arg20[%c0_147, %c0_148] : memref<1x32xf32, #tpu.memory_space<vmem>>, vector<1x32xf32>
    %471 = vector.broadcast %470 : vector<1x32xf32> to vector<16x32xf32>
    %472 = arith.addf %469, %471 : vector<16x32xf32>
    %cst_149 = arith.constant 0.000000e+00 : f32
    %473 = vector.broadcast %cst_149 : f32 to vector<16x32xf32>
    %474 = arith.maximumf %472, %473 : vector<16x32xf32>
    %c0_150 = arith.constant 0 : index
    %c0_151 = arith.constant 0 : index
    %475 = vector.load %arg21[%c0_150, %c0_151] : memref<32x16xbf16, #tpu.memory_space<vmem>>, vector<32x16xbf16>
    %476 = arith.truncf %474 : vector<16x32xf32> to vector<16x32xbf16>
    %cst_152 = arith.constant dense<0.000000e+00> : vector<16x16xf32>
    %477 = tpu.matmul %476, %475, %cst_152 {dimension_numbers = #tpu.dot_dimension_numbers<[1], [0], [0], [1], [0, 0, 1, 1], [], []>} : vector<16x32xbf16>, vector<32x16xbf16>, vector<16x16xf32> -> vector<16x16xf32>
    %c0_153 = arith.constant 0 : index
    %c0_154 = arith.constant 0 : index
    %478 = vector.load %arg22[%c0_153, %c0_154] : memref<1x16xf32, #tpu.memory_space<vmem>>, vector<1x16xf32>
    %479 = vector.broadcast %478 : vector<1x16xf32> to vector<16x16xf32>
    %480 = arith.addf %477, %479 : vector<16x16xf32>
    %c0_155 = arith.constant 0 : index
    %c0_156 = arith.constant 0 : index
    %481 = vector.load %arg6[%c0_155, %c0_156] : memref<16x128xbf16, #tpu.memory_space<vmem>>, vector<16x128xbf16>
    %482 = arith.truncf %480 : vector<16x16xf32> to vector<16x16xbf16>
    %cst_157 = arith.constant dense<0.000000e+00> : vector<16x128xf32>
    %483 = tpu.matmul %482, %481, %cst_157 {dimension_numbers = #tpu.dot_dimension_numbers<[1], [0], [0], [1], [0, 0, 1, 1], [], []>} : vector<16x16xbf16>, vector<16x128xbf16>, vector<16x128xf32> -> vector<16x128xf32>
    %c0_158 = arith.constant 0 : index
    %c0_159 = arith.constant 0 : index
    %484 = vector.load %arg23[%c0_158, %c0_159] : memref<16x128xf32, #tpu.memory_space<vmem>>, vector<16x128xf32>
    tpu.vector_store %arg23[%c0_158, %c0_159], %483 {strides = array<i32>} : memref<16x128xf32, #tpu.memory_space<vmem>>, vector<16x128xf32>,
    return
  }
}

</mosaic_0001>

<bundles_post_ra>
// kernel: forward.1
= control target key start
LH: loop header
LB: loop body
LE: loop exit
PB: predicated region body
PF: predicated region fallthrough
CT: control target
= control target key end

     0   :  { %s5394_s0 = inlined_call_operand.vmem [shape: s32[64,1], index: 0, kind: input, shape index: {}]   ;;  %s5395_s1 = inlined_call_operand.vmem [shape: f32[2,32], index: 1, kind: input, shape index: {}]   ;;  %s5396_s2 = inlined_call_operand.vmem [shape: f32[16,32], index: 2, kind: input, shape index: {}]   ;;  %s5397_s3 = inlined_call_operand.vmem [shape: f32[32,16], index: 3, kind: input, shape index: {}]   ;;  %s5398_s4 = inlined_call_operand.vmem [shape: f32[8,16], index: 4, kind: input, shape index: {}]   ;;  %s5399_s5 = inlined_call_operand.vmem [shape: bf16[128,16], index: 5, kind: input, shape index: {}]   ;;  %s5400_s6 = inlined_call_operand.vmem [shape: bf16[16,128], index: 6, kind: input, shape index: {}]   ;;  %s5401_s7 = inlined_call_operand.vmem [shape: bf16[32,64], index: 7, kind: input, shape index: {}]   ;;  %s5402_s8 = inlined_call_operand.vmem [shape: f32[1,64], index: 8, kind: input, shape index: {}]   ;;  %s5403_s9 = inlined_call_operand.vmem [shape: bf16[64,64], index: 9, kind: input, shape index: {}]   ;;  %s5404_s10 = inlined_call_operand.vmem [shape: f32[1,64], index: 10, kind: input, shape index: {}]   ;;  %s5405_s11 = inlined_call_operand.vmem [shape: bf16[16,32], index: 11, kind: input, shape index: {}]   ;;  %s5406_s12 = inlined_call_operand.vmem [shape: f32[1,32], index: 12, kind: input, shape index: {}]   ;;  %s5407_s13 = inlined_call_operand.vmem [shape: bf16[32,32], index: 13, kind: input, shape index: {}]   ;;  %s5408_s14 = inlined_call_operand.vmem [shape: f32[1,32], index: 14, kind: input, shape index: {}]   ;;  %s5409_s15 = inlined_call_operand.vmem [shape: bf16[2,32,32], index: 15, kind: input, shape index: {}]   ;;  %s5410_s16 = inlined_call_operand.vmem [shape: bf16[2,32,32], index: 16, kind: input, shape index: {}]   ;;  %s5411_s17 = inlined_call_operand.vmem [shape: bf16[2,32,32], index: 17, kind: input, shape index: {}]   ;;  %s5412_s18 = inlined_call_operand.vmem [shape: f32[2,1,32], index: 18, kind: input, shape index: {}]   ;;  %s5413_s19 = inlined_call_operand.vmem [shape: bf16[32,32], index: 19, kind: input, shape index: {}]   ;;  %s5414_s20 = inlined_call_operand.vmem [shape: f32[1,32], index: 20, kind: input, shape index: {}]   ;;  %s5415_s21 = inlined_call_operand.vmem [shape: bf16[32,16], index: 21, kind: input, shape index: {}]   ;;  %s5416_s22 = inlined_call_operand.vmem [shape: f32[1,16], index: 22, kind: input, shape index: {}]   ;;  %s5417_s23 = inlined_call_operand.hbm [shape: f32[16,128], index: 23, kind: output, shape index: {}]  }
   0x1   :  { %5424 = sst [smem:[#allocation5_spill]] %s5394_s0 }
   0x2   :  { %5425 = sst [smem:[#allocation6_spill]] %s5395_s1 }
   0x3   :  { %5426 = sst [smem:[#allocation7_spill]] %s5396_s2 }
   0x4   :  { %5427 = sst [smem:[#allocation8_spill]] %s5397_s3 }
   0x5   :  { %5428 = sst [smem:[#allocation9_spill]] %s5398_s4 }
   0x6   :  { %5429 = sst [smem:[#allocation10_spill]] %s5399_s5 }
   0x7   :  { %5430 = sst [smem:[#allocation11_spill]] %s5400_s6 }
   0x8   :  { %5431 = sst [smem:[#allocation12_spill]] %s5401_s7 }
   0x9   :  { %s5432_s24 = sld [smem:[#allocation5_spill]]  ;;  %v4534_v2 = vmov 0   ;;  %v4535_v4 = vmov 0.0   ;;  %vm4536_vm0 = vmmov 0   ;;  %vm101_vm1 = vcmask 261120   ;;  %v4391_v17 = vld [vmem:[%s5403_s9 + $0x18] sm:$0xff]  }
   0xa   :  { %4379 = vset.pattern.permute.xlu0 %v4534_v2  ;;  %4380 = vset.pattern.permute.xlu1 %v4534_v2  ;;  %s5433_s2 = sld [smem:[#allocation12_spill]]  ;;  %v4392_v19 = vld [vmem:[%s5403_s9 + $0x10] sm:$0xff]  }
   0xb   :  { %3891 = vmatprep.subr.bf16.mxu0 %v4535_v4  ;;  %s5434_s0 = sld [smem:[#allocation6_spill]]  ;;  %3895 = vmatprep.mubr.msk.bf16.mxu0 %vm4536_vm0, %v4535_v4 }
   0xc   :  { %s5435_s1 = sld [smem:[#allocation10_spill]]  ;;  %3899 = vmatprep.subr.bf16.mxu1 %v4535_v4  ;;  %3907 = vmatprep.mubr.msk.bf16.mxu1 %vm4536_vm0, %v4535_v4 }
   0xd   :  { %3900 = vmatpush3.bf16.msra.mxu1 %v4391_v17 }
   0xe   :  { %3901 = vmatprep.subr.bf16.mxu1 %v4535_v4 }
   0xf   :  { %v231_v0 = vld [vmem:[%s5432_s24] sm:$0xff]  ;;  %v233_v1 = vld [vmem:[%s5432_s24 + $0x10] sm:$0xff]  ;;  %v232_v5 = vld [vmem:[%s5432_s24 + $0x8] sm:$0xff] }
  0x10   :  { %v4381_v3 = vld [vmem:[%s5433_s2 + $0x8] sm:$0xff]   ;;  %242 = vperm.xlu0 %4379, %v231_v0   ;;  %248 = vperm.xlu1 %4380, %v233_v1   ;;  %v4382_v6 = vld [vmem:[%s5433_s2] sm:$0xff]   ;;  %v234_v8 = vld [vmem:[%s5432_s24 + $0x18] sm:$0xff] }
  0x11   :  { %3892 = vmatpush3.bf16.msra.mxu0 %v4381_v3  ;;  %v76_v7 = vld [vmem:[%s5434_s0] sm:$0x3]  ;;  %v236_v11 = vld [vmem:[%s5432_s24 + $0x28] sm:$0xff]  ;;  %v238_v14 = vld [vmem:[%s5432_s24 + $0x38] sm:$0xff]  ;;  %3902 = vmatpush3.bf16.msra.mxu1 %v4392_v19 }
  0x12   :  { %3893 = vmatprep.subr.bf16.mxu0 %v4535_v4  ;;  %v4383_v9 = vld [vmem:[%s5435_s1 + $0x38] sm:$0xff]   ;;  %v81_v10 = vpack.c.bf16 %v76_v7, %v76_v7  ;;  %v235_v12 = vld [vmem:[%s5432_s24 + $0x20] sm:$0xff]  ;;  %v4384_v13 = vld [vmem:[%s5435_s1 + $0x30] sm:$0xff]   ;;  %3903 = vmatprep.subr.bf16.mxu1 %v4535_v4 }
  0x13   :  { %v237_v15 = vld [vmem:[%s5432_s24 + $0x30] sm:$0xff]  ;;  %v4385_v16 = vld [vmem:[%s5435_s1 + $0x28] sm:$0xff]   ;;  %v4386_v18 = vld [vmem:[%s5435_s1 + $0x20] sm:$0xff]  }
  0x14   :  { %245 = vperm.xlu0 %4379, %v232_v5   ;;  %251 = vperm.xlu1 %4380, %v234_v8   ;;  %v4387_v20 = vld [vmem:[%s5435_s1 + $0x18] sm:$0xff]   ;;  %v4388_v21 = vld [vmem:[%s5435_s1 + $0x10] sm:$0xff]   ;;  %v4389_v22 = vld [vmem:[%s5435_s1 + $0x8] sm:$0xff]  }
  0x15   :  { %3894 = vmatpush3.bf16.msra.mxu0 %v4382_v6 }
  0x16   :  { %3911 = vmatprep.subr.bf16.mxu0 %v4383_v9 }
  0x18   :  { %3896 = vmatmul.mubr.msk.bf16.vlgmr.msra.gmra.mxu0 %vm101_vm1, %v81_v10  ;;  %254 = vperm.xlu0 %4379, %v235_v12  }
  0x19   :  { %257 = vperm.xlu1 %4380, %v236_v11   ;;  %3912 = vmatpush3.bf16.msra.mxu0 %v4383_v9 }
  0x1a   :  { %3913 = vmatprep.subr.bf16.mxu0 %v4384_v13 }
  0x1c   :  { %260 = vperm.xlu0 %4379, %v237_v15  }
  0x1d   :  { %263 = vperm.xlu1 %4380, %v238_v14   ;;  %3914 = vmatpush3.bf16.msra.mxu0 %v4384_v13 }
  0x1e   :  { %3915 = vmatprep.subr.bf16.mxu0 %v4385_v16 }
  0x21   :  { %3916 = vmatpush3.bf16.msra.mxu0 %v4385_v16 }
  0x22   :  { %3917 = vmatprep.subr.bf16.mxu0 %v4386_v18 }
  0x25   :  { %3918 = vmatpush3.bf16.msra.mxu0 %v4386_v18 }
  0x26   :  { %3919 = vmatprep.subr.bf16.mxu0 %v4387_v20 }
  0x29   :  { %3920 = vmatpush3.bf16.msra.mxu0 %v4387_v20 }
  0x2a   :  { %3921 = vmatprep.subr.bf16.mxu0 %v4388_v21 }
  0x2b   :  { %28 = vsyncpa [#allocation3], 0  ;;  %v4390_v23 = vld [vmem:[%s5435_s1] sm:$0xff]   ;;  %v4393_v24 = vld [vmem:[%s5403_s9 + $0x8] sm:$0xff]   ;;  %v239_v26 = vlaneseq  ;;  %v4537_v32 = vmov 1.0|1.0  }
  0x2c   :  { %3904 = vmatpush3.bf16.msra.mxu1 %v4393_v24  ;;  %v4394_v25 = vld [vmem:[%s5403_s9] sm:$0xff]   ;;  %vm186_vm14 = vcmask 523264   ;;  %v4396_v46 = vld [vmem:[%s5409_s15 + $0x8] sm:$0xff]   ;;  %s5436_s0 = sld [smem:[#allocation7_spill]]  ;;  %vm441_vm15 = vcmask 130048   ;;  %s4538_s7 = smov 96  }
  0x2d   :  { %3922 = vmatpush3.bf16.msra.mxu0 %v4388_v21  ;;  %3905 = vmatprep.subr.bf16.mxu1 %v4535_v4  ;;  %v240_v27 = vand.u32 127, %v239_v26  ;;  %v3564_v37 = vld [vmem:[%s5402_s8] ss:$0 sm:$0xff]  ;;  %v4769_v51 = vld [vmem:[%s5411_s17 + $0x8] sm:$0xff]   ;;  %s5437_s29 = sld [smem:[#allocation8_spill]] }
  0x2e   :  { %3923 = vmatprep.subr.bf16.mxu0 %v4389_v22  ;;  %v4395_v39 = vld [vmem:[%s5405_s11] sm:$0xff]   ;;  %v4400_v7 = vld [vmem:[%s5407_s13 + $0x8] sm:$0xff]   ;;  %s5438_s27 = sld [smem:[#allocation9_spill]] }
  0x2f   :  { %v4397_v47 = vld [vmem:[%s5409_s15] sm:$0xff]   ;;  %s5439_s8 = sld [smem:[#allocation11_spill]] }
  0x30   :  { %3906 = vmatpush3.bf16.msra.mxu1 %v4394_v25  ;;  %v4785_v0 = vld [vmem:[%s5411_s17] sm:$0xff]  }
  0x31   :  { %3924 = vmatpush3.bf16.msra.mxu0 %v4389_v22  ;;  %3935 = vmatprep.subr.bf16.mxu1 %v4395_v39  ;;  %v3568_v1 = vld [vmem:[%s5404_s10] ss:$0 sm:$0xff] }
  0x32   :  { %3925 = vmatprep.subr.bf16.mxu0 %v4390_v23  ;;  %v644_v48 = vld [vmem:[%s5436_s0] sm:$0xff]  ;;  %v645_v49 = vld [vmem:[%s5436_s0 + $0x8] sm:$0xff] }
  0x33   :  { %v4764_v50 = vpack.c.bf16 %v645_v49, %v644_v48  ;;  %v4401_v11 = vld [vmem:[%s5407_s13] sm:$0xff]   ;;  %v642_v17 = vld [vmem:[%s5437_s29 + $0x10] sm:$0xff]  ;;  %v643_v18 = vld [vmem:[%s5437_s29 + $0x18] sm:$0xff] }
  0x34   :  { %v4813_v22 = vpack.c.bf16 %v643_v18, %v642_v17  ;;  %v640_v24 = vld [vmem:[%s5437_s29] sm:$0xff]  ;;  %v641_v25 = vld [vmem:[%s5437_s29 + $0x8] sm:$0xff] }
  0x35   :  { %3926 = vmatpush3.bf16.msra.mxu0 %v4390_v23  ;;  %v3598_v26 = vld [vmem:[%s5406_s12] ss:$0 sm:$0xff] }
  0x36   :  { %3957 = vmatprep.subr.bf16.mxu0 %v4535_v4 }
  0x8b   :  { %v243_v28 = vpop.permute.xlu0 %242  ;;  %v249_v29 = vpop.permute.xlu1 %248 }
  0x8c   :  { %vm265_vm2 = vcmp.eq.s32.totalorder %v240_v27, %v243_v28  ;;  %vm267_vm3 = vcmp.eq.s32.totalorder %v240_v27, %v249_v29  ;;  %v4826_v28 = vpack.c.bf16 %v641_v25, %v640_v24 }
  0x8f   :  { %v246_v30 = vpop.permute.xlu0 %245  ;;  %v252_v31 = vpop.permute.xlu1 %251 }
  0x90   :  { %vm266_vm4 = vcmp.eq.s32.totalorder %v240_v27, %v246_v30  ;;  %vm268_vm6 = vcmp.eq.s32.totalorder %v240_v27, %v252_v31 }
  0x91   :  { %vm3590_vm5 = vmpackc.low %vm266_vm4, %vm265_vm2  ;;  %vm820_vm2 = vcmask 1040384   ;;  %vm3338_vm4 = vcmask 1042432  }
  0x92   :  { %vm3592_vm7 = vmpackc.low %vm268_vm6, %vm267_vm3  ;;  %3927 = vmatprep.mubr.msk.bf16.mxu0 %vm3590_vm5, %v4537_v32  ;;  %vm822_vm3 = vcmask 1041408   ;;  %vm3340_vm5 = vcmask 1043456   ;;  %vm3342_vm6 = vcmask 1044480  }
  0x93   :  { %3928 = vmatmul.mubr.msk.bf16.vlgmr.msra.gmra.mxu0 %vm3592_vm7, %v4537_v32  ;;  %v255_v33 = vpop.permute.xlu0 %254  ;;  %vm3344_vm7 = vcmask 1045504  }
  0x94   :  { %v258_v34 = vpop.permute.xlu1 %257  ;;  %vm269_vm8 = vcmp.eq.s32.totalorder %v240_v27, %v255_v33  ;;  %3958 = vmatpush3.bf16.msra.mxu0 %v4396_v46 }
  0x95   :  { %vm270_vm9 = vcmp.eq.s32.totalorder %v240_v27, %v258_v34  ;;  %3959 = vmatprep.subr.bf16.mxu0 %v4535_v4 }
  0x96   :  { %vm3594_vm10 = vmpackc.low %vm270_vm9, %vm269_vm8  ;;  %vm3346_vm8 = vcmask 1046528  }
  0x97   :  { %v261_v35 = vpop.permute.xlu0 %260  ;;  %3931 = vmatprep.mubr.msk.bf16.mxu0 %vm3594_vm10, %v4537_v32 }
  0x98   :  { %v264_v36 = vpop.permute.xlu1 %263  ;;  %vm271_vm11 = vcmp.eq.s32.totalorder %v240_v27, %v261_v35  ;;  %3960 = vmatpush3.bf16.msra.mxu0 %v4397_v47 }
  0x99   :  { %vm272_vm12 = vcmp.eq.s32.totalorder %v240_v27, %v264_v36  ;;  %3977 = vmatprep.subr.bf16.mxu0 %v4535_v4 }
  0x9a   :  { %vm3596_vm13 = vmpackc.low %vm272_vm12, %vm271_vm11 }
  0x9b   :  { %3932 = vmatmul.mubr.msk.bf16.gmra.mxu0 %vm3596_vm13, %v4537_v32 }
  0x9c   :  { %3961 = vmatprep.mubr.msk.bf16.mxu0 %vm4536_vm0, %v4535_v4 }
  0xa3   :  { %3962 = vmatmul.mubr.msk.bf16.vlgmr.msra.gmra.mxu0 %vm101_vm1, %v4764_v50 }
  0xa4   :  { %3978 = vmatpush3.bf16.msra.mxu0 %v4769_v51  ;;  %3981 = vmatprep.mubr.msk.bf16.mxu0 %vm4536_vm0, %v4535_v4 }
  0xa5   :  { %3979 = vmatprep.subr.bf16.mxu0 %v4535_v4 }
  0xa8   :  { %3980 = vmatpush3.bf16.msra.mxu0 %v4785_v0 }
  0xa9   :  { %3985 = vmatprep.subr.bf16.mxu0 %v4535_v4 }
  0xd8   :  { %v139_v38 = vpop.f32.mrf.mxu0 }
  0xd9   :  { %v140_v40 = vadd.f32 %v3564_v37, %v139_v38 }
  0xda   :  { %v3897_v41 = vpop.f32.mrf.mxu0 }
  0xdb   :  { %v145_v42 = vmax.f32 %v140_v40, 0.0 }
  0xdc   :  { %v142_v43 = vpop.f32.mrf.mxu0 }
  0xdd   :  { %v154_v44 = vpack.c.bf16 %v145_v42, %v145_v42 }
  0xde   :  { %v3898_v45 = vpop.f32.mrf.mxu0 }
  0xdf   :  { %3908 = vmatmul.mubr.msk.bf16.vlgmr.msra.gmra.mxu1 %vm186_vm14, %v154_v44 }
  0xe0   :  { %3936 = vmatpush3.bf16.msra.mxu1 %v4395_v39 }
  0xe1   :  { %3945 = vmatprep.subr.bf16.mxu1 %v4400_v7 }
 0x153   :  { %v3929_v52 = vpop.f32.mrf.mxu0 }
 0x155   :  { %v391_v53 = vpop.f32.mrf.mxu0 }
 0x157   :  { %v3930_v54 = vpop.f32.mrf.mxu0 }
 0x158   :  { %v425_v55 = vpack.c.bf16 %v3930_v54, %v3929_v52 }
 0x159   :  { %v394_v56 = vpop.f32.mrf.mxu0 }
 0x15a   :  { %v424_v57 = vpack.c.bf16 %v394_v56, %v391_v53 }
 0x15b   :  { %v3933_v58 = vpop.f32.mrf.mxu0 }
 0x15c   :  { %3937 = vmatprep.mubr.msk.bf16.mxu1 %vm441_vm15, %v424_v57 }
 0x15d   :  { %3938 = vmatmul.mubr.msk.bf16.vlgmr.msra.gmra.mxu1 %vm441_vm15, %v425_v55  ;;  %v407_v59 = vpop.f32.mrf.mxu0 }
 0x15e   :  { %3946 = vmatpush3.bf16.msra.mxu1 %v4400_v7 }
 0x15f   :  { %v3934_v60 = vpop.f32.mrf.mxu0  ;;  %3947 = vmatprep.subr.bf16.mxu1 %v4401_v11 }
 0x160   :  { %v427_v61 = vpack.c.bf16 %v3934_v60, %v3933_v58  ;;  %v4402_v58 = vld [vmem:[%s5410_s16 + $0x8] sm:$0xff]  }
 0x161   :  { %v410_v62 = vpop.f32.mrf.mxu0 }
 0x162   :  { %v426_v63 = vpack.c.bf16 %v410_v62, %v407_v59  ;;  %3948 = vmatpush3.bf16.msra.mxu1 %v4401_v11  ;;  %v4403_v59 = vld [vmem:[%s5410_s16] sm:$0xff]  }
 0x163   :  { %v704_v12 = vpop.f32.mrf.mxu0  ;;  %3965 = vmatprep.subr.bf16.mxu1 %v4402_v58 }
 0x164   :  { %3941 = vmatprep.mubr.msk.bf16.mxu1 %vm441_vm15, %v426_v63 }
 0x165   :  { %3942 = vmatmul.mubr.msk.bf16.gmra.mxu1 %vm441_vm15, %v427_v61  ;;  %v3963_v13 = vpop.f32.mrf.mxu0 }
 0x167   :  { %v707_v14 = vpop.f32.mrf.mxu0 }
 0x168   :  { %v4802_v15 = vpack.c.bf16 %v707_v14, %v704_v12 }
 0x169   :  { %v3964_v16 = vpop.f32.mrf.mxu0 }
 0x19f   :  { %v224_v2 = vpop.f32.mrf.mxu1 }
 0x1a0   :  { %v225_v3 = vadd.f32 %v3568_v1, %v224_v2  ;;  %v4856_v1 = vld [vmem:[%s5438_s27] sm:$0xff] }
 0x1a1   :  { %v3909_v5 = vpop.f32.mrf.mxu1 }
 0x1a2   :  { %v4792_v6 = vmax.f32 %v225_v3, 0.0 }
 0x1a3   :  { %v227_v8 = vpop.f32.mrf.mxu1 }
 0x1a4   :  { %v816_v9 = vrot.slane %v4792_v6, 7 }
 0x1a5   :  { %v3910_v10 = vpop.f32.mrf.mxu1 }
 0x1a6   :  { %817 = vrot.lane.b32.xlu0 %v816_v9, %s4538_s7  ;;  %v3604_v9 = vld [vmem:[%s5408_s14] ss:$0 sm:$0xff] }
 0x218   :  { %v818_v19 = vpop.permute.xlu0 %817 }
 0x219   :  { %v821_v20 = vsel %vm820_vm2, %v4792_v6, %v818_v19 }
 0x21a   :  { %v823_v21 = vsel %vm822_vm3, %v821_v20, 0.0 }
 0x21b   :  { %v824_v23 = vpack.c.bf16 %v823_v21, %v823_v21 }
 0x21d   :  { %v3939_v27 = vpop.f32.mrf.mxu1  ;;  %3982 = vmatmul.mubr.msk.bf16.vlgmr.msra.gmra.mxu0 %vm101_vm1, %v824_v23 }
 0x21e   :  { %3986 = vmatpush3.bf16.msra.mxu0 %v4813_v22  ;;  %3989 = vmatprep.mubr.msk.bf16.mxu0 %vm4536_vm0, %v4535_v4  ;;  %v497_v29 = vadd.f32 %v3939_v27, %v3598_v26 }
 0x21f   :  { %v488_v30 = vpop.f32.mrf.mxu1  ;;  %3987 = vmatprep.subr.bf16.mxu0 %v4535_v4 }
 0x220   :  { %v489_v31 = vadd.f32 %v3598_v26, %v488_v30  ;;  %v521_v34 = vmax.f32 %v497_v29, 0.0 }
 0x221   :  { %v3940_v32 = vpop.f32.mrf.mxu1 }
 0x222   :  { %v500_v33 = vadd.f32 %v3940_v32, %v3598_v26  ;;  %3988 = vmatpush3.bf16.msra.mxu0 %v4826_v28  ;;  %v519_v36 = vmax.f32 %v489_v31, 0.0 }
 0x223   :  { %v491_v35 = vpop.f32.mrf.mxu1  ;;  %3999 = vmatprep.subr.bf16.mxu0 %v4535_v4 }
 0x224   :  { %v522_v37 = vmax.f32 %v500_v33, 0.0  ;;  %v492_v38 = vadd.f32 %v3598_v26, %v491_v35 }
 0x225   :  { %3990 = vmatmul.mubr.msk.bf16.vlgmr.msra.gmra.mxu0 %vm101_vm1, %v824_v23  ;;  %v3943_v39 = vpop.f32.mrf.mxu1 }
 0x226   :  { %v520_v40 = vmax.f32 %v492_v38, 0.0  ;;  %4000 = vmatpush3.bf16.msra.mxu0 %v4769_v51  ;;  %4003 = vmatprep.mubr.msk.bf16.mxu0 %vm4536_vm0, %v4535_v4  ;;  %v532_v41 = vpack.c.bf16 %v522_v37, %v521_v34  ;;  %v513_v42 = vadd.f32 %v3943_v39, %v3598_v26 }
 0x227   :  { %v504_v43 = vpop.f32.mrf.mxu1  ;;  %4001 = vmatprep.subr.bf16.mxu0 %v4535_v4 }
 0x228   :  { %v531_v44 = vpack.c.bf16 %v520_v40, %v519_v36  ;;  %v505_v45 = vadd.f32 %v3598_v26, %v504_v43  ;;  %v525_v48 = vmax.f32 %v513_v42, 0.0 }
 0x229   :  { %v3944_v46 = vpop.f32.mrf.mxu1 }
 0x22a   :  { %3949 = vmatprep.mubr.msk.bf16.mxu1 %vm101_vm1, %v531_v44  ;;  %v516_v47 = vadd.f32 %v3944_v46, %v3598_v26  ;;  %4002 = vmatpush3.bf16.msra.mxu0 %v4785_v0  ;;  %v523_v52 = vmax.f32 %v505_v45, 0.0 }
 0x22b   :  { %3950 = vmatmul.mubr.msk.bf16.vlgmr.msra.gmra.mxu1 %vm101_vm1, %v532_v41  ;;  %v507_v49 = vpop.f32.mrf.mxu1  ;;  %4015 = vmatprep.subr.bf16.mxu0 %v4535_v4 }
 0x22c   :  { %v526_v53 = vmax.f32 %v516_v47, 0.0  ;;  %v508_v54 = vadd.f32 %v3598_v26, %v507_v49  ;;  %3966 = vmatpush3.bf16.msra.mxu1 %v4402_v58 }
 0x22d   :  { %3967 = vmatprep.subr.bf16.mxu1 %v4403_v59 }
 0x22e   :  { %v524_v55 = vmax.f32 %v508_v54, 0.0  ;;  %v534_v56 = vpack.c.bf16 %v526_v53, %v525_v48  ;;  %v4882_v48 = vld [vmem:[%s5412_s18] ss:$0 sm:$0xff] }
 0x230   :  { %v533_v57 = vpack.c.bf16 %v524_v55, %v523_v52  ;;  %3968 = vmatpush3.bf16.msra.mxu1 %v4403_v59 }
 0x231   :  { %3993 = vmatprep.subr.bf16.mxu1 %v4535_v4 }
 0x232   :  { %3953 = vmatprep.mubr.msk.bf16.mxu1 %vm101_vm1, %v533_v57 }
 0x233   :  { %3954 = vmatmul.mubr.msk.bf16.gmra.mxu1 %vm101_vm1, %v534_v56 }
 0x2dd   :  { %v4851_v60 = vpop.f32.mrf.mxu0 }
 0x2df   :  { %v3983_v61 = vpop.f32.mrf.mxu0 }
 0x2e1   :  { %v877_v62 = vpop.f32.mrf.mxu0 }
 0x2e3   :  { %v3984_v63 = vpop.f32.mrf.mxu0 }
 0x2e5   :  { %v916_v2 = vpop.f32.mrf.mxu0 }
 0x2e6   :  { %v917_v3 = vadd.f32 %v916_v2, %v4856_v1 }
 0x2e7   :  { %v3991_v5 = vpop.f32.mrf.mxu0 }
 0x2e8   :  { %v922_v7 = vsel %vm441_vm15, %v917_v3, -inf }
 0x2e9   :  { %923 = vmax.xlane.f32.xlu1 %v922_v7  ;;  %v919_v8 = vpop.f32.mrf.mxu0 }
 0x2eb   :  { %v3951_v10 = vpop.f32.mrf.mxu1  ;;  %v3992_v11 = vpop.f32.mrf.mxu0 }
 0x2ec   :  { %v609_v12 = vadd.f32 %v3951_v10, %v3604_v9 }
 0x2ed   :  { %v600_v13 = vpop.f32.mrf.mxu1 }
 0x2ee   :  { %v601_v14 = vadd.f32 %v3604_v9, %v600_v13  ;;  %v633_v18 = vmax.f32 %v609_v12, 0.0 }
 0x2ef   :  { %v3952_v16 = vpop.f32.mrf.mxu1 }
 0x2f0   :  { %v612_v17 = vadd.f32 %v3952_v16, %v3604_v9  ;;  %v631_v20 = vmax.f32 %v601_v14, 0.0 }
 0x2f1   :  { %v603_v19 = vpop.f32.mrf.mxu1 }
 0x2f2   :  { %v634_v21 = vmax.f32 %v612_v17, 0.0  ;;  %v604_v23 = vadd.f32 %v3604_v9, %v603_v19 }
 0x2f3   :  { %v3955_v24 = vpop.f32.mrf.mxu1 }
 0x2f4   :  { %v632_v25 = vmax.f32 %v604_v23, 0.0  ;;  %v716_v26 = vpack.c.bf16 %v634_v21, %v633_v18  ;;  %v625_v27 = vadd.f32 %v3955_v24, %v3604_v9 }
 0x2f5   :  { %v616_v29 = vpop.f32.mrf.mxu1 }
 0x2f6   :  { %v715_v30 = vpack.c.bf16 %v632_v25, %v631_v20  ;;  %v617_v31 = vadd.f32 %v3604_v9, %v616_v29  ;;  %v637_v34 = vmax.f32 %v625_v27, 0.0 }
 0x2f7   :  { %v3956_v32 = vpop.f32.mrf.mxu1 }
 0x2f8   :  { %3969 = vmatprep.mubr.msk.bf16.mxu1 %vm101_vm1, %v715_v30  ;;  %v628_v33 = vadd.f32 %v3956_v32, %v3604_v9  ;;  %v635_v36 = vmax.f32 %v617_v31, 0.0 }
 0x2f9   :  { %3970 = vmatmul.mubr.msk.bf16.vlgmr.msra.gmra.mxu1 %vm101_vm1, %v716_v26  ;;  %v619_v35 = vpop.f32.mrf.mxu1 }
 0x2fa   :  { %3994 = vmatpush3.bf16.msra.mxu1 %v4802_v15  ;;  %v638_v37 = vmax.f32 %v628_v33, 0.0  ;;  %v620_v38 = vadd.f32 %v3604_v9, %v619_v35 }
 0x2fb   :  { %4007 = vmatprep.subr.bf16.mxu1 %v4535_v4 }
 0x2fc   :  { %v636_v39 = vmax.f32 %v620_v38, 0.0  ;;  %v718_v40 = vpack.c.bf16 %v638_v37, %v637_v34 }
 0x2fe   :  { %v717_v41 = vpack.c.bf16 %v636_v39, %v635_v36 }
 0x300   :  { %3973 = vmatprep.mubr.msk.bf16.mxu1 %vm101_vm1, %v717_v41 }
 0x301   :  { %3974 = vmatmul.mubr.msk.bf16.gmra.mxu1 %vm101_vm1, %v718_v40 }
 0x302   :  { %3995 = vmatprep.mubr.msk.bf16.mxu1 %vm4536_vm0, %v4535_v4 }
 0x372   :  { %v924_v42 = vpop.xlane.xlu1 %923 }
 0x373   :  { %v925_v43 = vsub.f32 %v917_v3, %v924_v42 }
 0x375   :  { %v926_v44 = vmul.f32 1.442695, %v925_v43 }
 0x377   :  { %4415 = vpow2.f32 %v926_v44 }
 0x384   :  { %v4416_v45 = vpop.eup %4415 }
 0x385   :  { %v928_v46 = vpack.c.bf16 %v4416_v45, %v4416_v45  ;;  %v973_v47 = vsel %vm441_vm15, %v4416_v45, 0.0 }
 0x386   :  { %974 = vadd.xlane.f32.xlu0 %v973_v47 }
 0x387   :  { %3996 = vmatmul.mubr.msk.bf16.vlgmr.msra.gmra.mxu1 %vm441_vm15, %v928_v46 }
 0x388   :  { %4008 = vmatpush3.bf16.msra.mxu1 %v4813_v22  ;;  %4011 = vmatprep.mubr.msk.bf16.mxu1 %vm4536_vm0, %v4535_v4 }
 0x389   :  { %4009 = vmatprep.subr.bf16.mxu1 %v4535_v4 }
 0x38c   :  { %4010 = vmatpush3.bf16.msra.mxu1 %v4826_v28 }
 0x38d   :  { %4021 = vmatprep.subr.bf16.mxu1 %v4535_v4 }
 0x3b9   :  { %v3971_v49 = vpop.f32.mrf.mxu1 }
 0x3ba   :  { %v4885_v52 = vadd.f32 %v3971_v49, %v4882_v48 }
 0x3bb   :  { %v784_v53 = vpop.f32.mrf.mxu1 }
 0x3bc   :  { %v785_v9 = vadd.f32 %v4882_v48, %v784_v53 }
 0x3bd   :  { %v3972_v54 = vpop.f32.mrf.mxu1 }
 0x3be   :  { %v4888_v55 = vadd.f32 %v3972_v54, %v4882_v48 }
 0x3bf   :  { %v787_v56 = vpop.f32.mrf.mxu1 }
 0x3c0   :  { %v4891_v57 = vadd.f32 %v4882_v48, %v787_v56 }
 0x3c1   :  { %v3975_v58 = vpop.f32.mrf.mxu1 }
 0x3c2   :  { %v4894_v59 = vadd.f32 %v3975_v58, %v4882_v48 }
 0x3c3   :  { %v800_v61 = vpop.f32.mrf.mxu1 }
 0x3c4   :  { %v4897_v62 = vadd.f32 %v4882_v48, %v800_v61 }
 0x3c5   :  { %v3976_v63 = vpop.f32.mrf.mxu1 }
 0x3c6   :  { %v4900_v2 = vadd.f32 %v3976_v63, %v4882_v48 }
 0x3c7   :  { %v4902_v5 = vpop.f32.mrf.mxu1 }
 0x40f   :  { %v975_v3 = vpop.xlane.xlu0 %974 }
 0x410   :  { %4417 = vrcp.f32 %v975_v3 }
 0x41d   :  { %v4418_v7 = vpop.eup %4417 }
 0x447   :  { %v967_v8 = vpop.f32.mrf.mxu1 }
 0x448   :  { %v977_v10 = vmul.f32 %v4418_v7, %v967_v8 }
 0x449   :  { %v3997_v11 = vpop.f32.mrf.mxu1 }
 0x44a   :  { %v978_v12 = vadd.f32 %v977_v10, %v785_v9 }
 0x44b   :  { %v970_v13 = vpop.f32.mrf.mxu1 }
 0x44c   :  { %v979_v14 = vadd.f32 %v978_v12, %v4851_v60 }
 0x44d   :  { %v3998_v16 = vpop.f32.mrf.mxu1 }
 0x44e   :  { %4419 = vtanh.f32 %v979_v14 }
 0x45b   :  { %v4906_v17 = vpop.eup %4419 }
 0x45c   :  { %v981_v18 = vpack.c.bf16 %v4906_v17, %v4906_v17 }
 0x45e   :  { %4004 = vmatmul.mubr.msk.bf16.vlgmr.msra.gmra.mxu0 %vm101_vm1, %v981_v18  ;;  %4012 = vmatmul.mubr.msk.bf16.vlgmr.msra.gmra.mxu1 %vm101_vm1, %v981_v18 }
 0x45f   :  { %4016 = vmatpush3.bf16.msra.mxu0 %v4802_v15  ;;  %4017 = vmatprep.mubr.msk.bf16.mxu0 %vm4536_vm0, %v4535_v4 }
 0x460   :  { %4029 = vmatprep.subr.bf16.mxu0 %v4535_v4  ;;  %4022 = vmatpush3.bf16.msra.mxu1 %v4769_v51 }
 0x461   :  { %4023 = vmatprep.subr.bf16.mxu1 %v4535_v4  ;;  %4025 = vmatprep.mubr.msk.bf16.mxu1 %vm4536_vm0, %v4535_v4 }
 0x464   :  { %4024 = vmatpush3.bf16.msra.mxu1 %v4785_v0 }
 0x465   :  { %4037 = vmatprep.subr.bf16.mxu1 %v4535_v4 }
 0x51e   :  { %v1019_v60 = vpop.f32.mrf.mxu0  ;;  %v1059_v19 = vpop.f32.mrf.mxu1 }
 0x51f   :  { %v1060_v20 = vadd.f32 %v1059_v19, %v4856_v1 }
 0x520   :  { %v4005_v21 = vpop.f32.mrf.mxu0  ;;  %v4013_v23 = vpop.f32.mrf.mxu1 }
 0x521   :  { %v1065_v24 = vsel %vm441_vm15, %v1060_v20, -inf }
 0x522   :  { %v1022_v25 = vpop.f32.mrf.mxu0  ;;  %1066 = vmax.xlane.f32.xlu0 %v1065_v24  ;;  %v1062_v26 = vpop.f32.mrf.mxu1 }
 0x524   :  { %v4006_v27 = vpop.f32.mrf.mxu0  ;;  %v4014_v29 = vpop.f32.mrf.mxu1 }
 0x5ab   :  { %v1067_v30 = vpop.xlane.xlu0 %1066 }
 0x5ac   :  { %v1068_v31 = vsub.f32 %v1060_v20, %v1067_v30 }
 0x5ae   :  { %v1069_v32 = vmul.f32 1.442695, %v1068_v31 }
 0x5b0   :  { %4421 = vpow2.f32 %v1069_v32 }
 0x5bd   :  { %v4422_v33 = vpop.eup %4421 }
 0x5be   :  { %v1115_v34 = vsel %vm441_vm15, %v4422_v33, 0.0  ;;  %v1071_v35 = vpack.c.bf16 %v4422_v33, %v4422_v33 }
 0x5bf   :  { %1116 = vadd.xlane.f32.xlu1 %v1115_v34 }
 0x5c0   :  { %4018 = vmatmul.mubr.msk.bf16.vlgmr.msra.gmra.mxu0 %vm441_vm15, %v1071_v35 }
 0x5c1   :  { %4030 = vmatpush3.bf16.msra.mxu0 %v4813_v22  ;;  %4033 = vmatprep.mubr.msk.bf16.mxu0 %vm4536_vm0, %v4535_v4 }
 0x5c2   :  { %4031 = vmatprep.subr.bf16.mxu0 %v4535_v4 }
 0x5c5   :  { %4032 = vmatpush3.bf16.msra.mxu0 %v4826_v28 }
 0x5c6   :  { %4043 = vmatprep.subr.bf16.mxu0 %v4535_v4 }
 0x648   :  { %v1117_v36 = vpop.xlane.xlu1 %1116 }
 0x649   :  { %4423 = vrcp.f32 %v1117_v36 }
 0x656   :  { %v4424_v37 = vpop.eup %4423 }
 0x680   :  { %v1109_v38 = vpop.f32.mrf.mxu0 }
 0x681   :  { %v1119_v39 = vmul.f32 %v4424_v37, %v1109_v38 }
 0x682   :  { %v4019_v40 = vpop.f32.mrf.mxu0 }
 0x683   :  { %v1120_v41 = vadd.f32 %v1119_v39, %v4891_v57 }
 0x684   :  { %v1112_v42 = vpop.f32.mrf.mxu0 }
 0x685   :  { %v1121_v43 = vadd.f32 %v1120_v41, %v1019_v60 }
 0x686   :  { %v4020_v44 = vpop.f32.mrf.mxu0 }
 0x687   :  { %4425 = vtanh.f32 %v1121_v43 }
 0x694   :  { %v4933_v45 = vpop.eup %4425 }
 0x695   :  { %v1123_v46 = vpack.c.bf16 %v4933_v45, %v4933_v45 }
 0x697   :  { %4026 = vmatmul.mubr.msk.bf16.vlgmr.msra.gmra.mxu1 %vm101_vm1, %v1123_v46  ;;  %4034 = vmatmul.mubr.msk.bf16.vlgmr.msra.gmra.mxu0 %vm101_vm1, %v1123_v46 }
 0x698   :  { %4038 = vmatpush3.bf16.msra.mxu1 %v4802_v15  ;;  %4039 = vmatprep.mubr.msk.bf16.mxu1 %vm4536_vm0, %v4535_v4 }
 0x699   :  { %4051 = vmatprep.subr.bf16.mxu1 %v4535_v4  ;;  %4044 = vmatpush3.bf16.msra.mxu0 %v4769_v51 }
 0x69a   :  { %4045 = vmatprep.subr.bf16.mxu0 %v4535_v4  ;;  %4047 = vmatprep.mubr.msk.bf16.mxu0 %vm4536_vm0, %v4535_v4 }
 0x69d   :  { %4046 = vmatpush3.bf16.msra.mxu0 %v4785_v0 }
 0x69e   :  { %4059 = vmatprep.subr.bf16.mxu0 %v4535_v4 }
 0x757   :  { %v1161_v47 = vpop.f32.mrf.mxu1  ;;  %v1201_v49 = vpop.f32.mrf.mxu0 }
 0x758   :  { %v1202_v53 = vadd.f32 %v1201_v49, %v4856_v1 }
 0x759   :  { %v4027_v54 = vpop.f32.mrf.mxu1  ;;  %v4035_v56 = vpop.f32.mrf.mxu0 }
 0x75a   :  { %v1207_v57 = vsel %vm441_vm15, %v1202_v53, -inf }
 0x75b   :  { %1208 = vmax.xlane.f32.xlu0 %v1207_v57  ;;  %v1164_v58 = vpop.f32.mrf.mxu1  ;;  %v1204_v61 = vpop.f32.mrf.mxu0 }
 0x75d   :  { %v4028_v63 = vpop.f32.mrf.mxu1  ;;  %v4036_v3 = vpop.f32.mrf.mxu0 }
 0x7e4   :  { %v1209_v7 = vpop.xlane.xlu0 %1208 }
 0x7e5   :  { %v1210_v8 = vsub.f32 %v1202_v53, %v1209_v7 }
 0x7e7   :  { %v1211_v9 = vmul.f32 1.442695, %v1210_v8 }
 0x7e9   :  { %4427 = vpow2.f32 %v1211_v9 }
 0x7f6   :  { %v4428_v10 = vpop.eup %4427 }
 0x7f7   :  { %v1257_v11 = vsel %vm441_vm15, %v4428_v10, 0.0  ;;  %v1213_v12 = vpack.c.bf16 %v4428_v10, %v4428_v10 }
 0x7f8   :  { %1258 = vadd.xlane.f32.xlu1 %v1257_v11 }
 0x7f9   :  { %4040 = vmatmul.mubr.msk.bf16.vlgmr.msra.gmra.mxu1 %vm441_vm15, %v1213_v12 }
 0x7fa   :  { %4052 = vmatpush3.bf16.msra.mxu1 %v4813_v22  ;;  %4055 = vmatprep.mubr.msk.bf16.mxu1 %vm4536_vm0, %v4535_v4 }
 0x7fb   :  { %4053 = vmatprep.subr.bf16.mxu1 %v4535_v4 }
 0x7fe   :  { %4054 = vmatpush3.bf16.msra.mxu1 %v4826_v28 }
 0x7ff   :  { %4065 = vmatprep.subr.bf16.mxu1 %v4535_v4 }
 0x881   :  { %v1259_v13 = vpop.xlane.xlu1 %1258 }
 0x882   :  { %4429 = vrcp.f32 %v1259_v13 }
 0x88f   :  { %v4430_v14 = vpop.eup %4429 }
 0x8b9   :  { %v1251_v16 = vpop.f32.mrf.mxu1 }
 0x8ba   :  { %v1261_v18 = vmul.f32 %v4430_v14, %v1251_v16 }
 0x8bb   :  { %v4041_v60 = vpop.f32.mrf.mxu1 }
 0x8bc   :  { %v1262_v19 = vadd.f32 %v1261_v18, %v4885_v52 }
 0x8bd   :  { %v1254_v20 = vpop.f32.mrf.mxu1 }
 0x8be   :  { %v1263_v21 = vadd.f32 %v1262_v19, %v1161_v47 }
 0x8bf   :  { %v4042_v23 = vpop.f32.mrf.mxu1 }
 0x8c0   :  { %4431 = vtanh.f32 %v1263_v21 }
 0x8cd   :  { %v4960_v24 = vpop.eup %4431 }
 0x8ce   :  { %v1265_v25 = vpack.c.bf16 %v4960_v24, %v4960_v24 }
 0x8d0   :  { %4048 = vmatmul.mubr.msk.bf16.vlgmr.msra.gmra.mxu0 %vm101_vm1, %v1265_v25  ;;  %4056 = vmatmul.mubr.msk.bf16.vlgmr.msra.gmra.mxu1 %vm101_vm1, %v1265_v25 }
 0x8d1   :  { %4060 = vmatpush3.bf16.msra.mxu0 %v4802_v15  ;;  %4061 = vmatprep.mubr.msk.bf16.mxu0 %vm4536_vm0, %v4535_v4 }
 0x8d2   :  { %4073 = vmatprep.subr.bf16.mxu0 %v4535_v4  ;;  %4066 = vmatpush3.bf16.msra.mxu1 %v4769_v51 }
 0x8d3   :  { %4067 = vmatprep.subr.bf16.mxu1 %v4535_v4  ;;  %4069 = vmatprep.mubr.msk.bf16.mxu1 %vm4536_vm0, %v4535_v4 }
 0x8d6   :  { %4068 = vmatpush3.bf16.msra.mxu1 %v4785_v0 }
 0x8d7   :  { %4081 = vmatprep.subr.bf16.mxu1 %v4535_v4 }
 0x990   :  { %v1303_v52 = vpop.f32.mrf.mxu0  ;;  %v1343_v26 = vpop.f32.mrf.mxu1 }
 0x991   :  { %v1344_v27 = vadd.f32 %v1343_v26, %v4856_v1 }
 0x992   :  { %v4049_v29 = vpop.f32.mrf.mxu0  ;;  %v4057_v30 = vpop.f32.mrf.mxu1 }
 0x993   :  { %v1349_v31 = vsel %vm441_vm15, %v1344_v27, -inf }
 0x994   :  { %v1306_v32 = vpop.f32.mrf.mxu0  ;;  %1350 = vmax.xlane.f32.xlu0 %v1349_v31  ;;  %v1346_v33 = vpop.f32.mrf.mxu1 }
 0x996   :  { %v4050_v34 = vpop.f32.mrf.mxu0  ;;  %v4058_v35 = vpop.f32.mrf.mxu1 }
 0xa1d   :  { %v1351_v36 = vpop.xlane.xlu0 %1350 }
 0xa1e   :  { %v1352_v37 = vsub.f32 %v1344_v27, %v1351_v36 }
 0xa20   :  { %v1353_v38 = vmul.f32 1.442695, %v1352_v37 }
 0xa22   :  { %4433 = vpow2.f32 %v1353_v38 }
 0xa2f   :  { %v4434_v39 = vpop.eup %4433 }
 0xa30   :  { %v1399_v40 = vsel %vm441_vm15, %v4434_v39, 0.0  ;;  %v1355_v41 = vpack.c.bf16 %v4434_v39, %v4434_v39 }
 0xa31   :  { %1400 = vadd.xlane.f32.xlu1 %v1399_v40 }
 0xa32   :  { %4062 = vmatmul.mubr.msk.bf16.vlgmr.msra.gmra.mxu0 %vm441_vm15, %v1355_v41 }
 0xa33   :  { %4074 = vmatpush3.bf16.msra.mxu0 %v4813_v22  ;;  %4077 = vmatprep.mubr.msk.bf16.mxu0 %vm4536_vm0, %v4535_v4 }
 0xa34   :  { %4075 = vmatprep.subr.bf16.mxu0 %v4535_v4 }
 0xa37   :  { %4076 = vmatpush3.bf16.msra.mxu0 %v4826_v28 }
 0xa38   :  { %4087 = vmatprep.subr.bf16.mxu0 %v4535_v4 }
 0xaba   :  { %v1401_v42 = vpop.xlane.xlu1 %1400 }
 0xabb   :  { %4435 = vrcp.f32 %v1401_v42 }
 0xac8   :  { %v4436_v43 = vpop.eup %4435 }
 0xaf2   :  { %v1393_v44 = vpop.f32.mrf.mxu0 }
 0xaf3   :  { %v1403_v46 = vmul.f32 %v4436_v43, %v1393_v44 }
 0xaf4   :  { %v4063_v47 = vpop.f32.mrf.mxu0 }
 0xaf5   :  { %v1404_v49 = vadd.f32 %v1403_v46, %v4888_v55 }
 0xaf6   :  { %v1396_v53 = vpop.f32.mrf.mxu0 }
 0xaf7   :  { %v1405_v54 = vadd.f32 %v1404_v49, %v1303_v52 }
 0xaf8   :  { %v4064_v56 = vpop.f32.mrf.mxu0 }
 0xaf9   :  { %4437 = vtanh.f32 %v1405_v54 }
 0xb06   :  { %v4987_v57 = vpop.eup %4437 }
 0xb07   :  { %v1407_v58 = vpack.c.bf16 %v4987_v57, %v4987_v57 }
 0xb09   :  { %4070 = vmatmul.mubr.msk.bf16.vlgmr.msra.gmra.mxu1 %vm101_vm1, %v1407_v58  ;;  %4078 = vmatmul.mubr.msk.bf16.vlgmr.msra.gmra.mxu0 %vm101_vm1, %v1407_v58  ;;  %v804_v58 = vadd.f32 %v4882_v48, %v4902_v5 }
 0xb0a   :  { %4082 = vmatpush3.bf16.msra.mxu1 %v4802_v15  ;;  %4083 = vmatprep.mubr.msk.bf16.mxu1 %vm4536_vm0, %v4535_v4 }
 0xb0b   :  { %4095 = vmatprep.subr.bf16.mxu1 %v4535_v4  ;;  %4088 = vmatpush3.bf16.msra.mxu0 %v4769_v51 }
 0xb0c   :  { %4089 = vmatprep.subr.bf16.mxu0 %v4535_v4  ;;  %4091 = vmatprep.mubr.msk.bf16.mxu0 %vm4536_vm0, %v4535_v4 }
 0xb0f   :  { %4090 = vmatpush3.bf16.msra.mxu0 %v4785_v0 }
 0xb10   :  { %4103 = vmatprep.subr.bf16.mxu0 %v4535_v4 }
 0xbc9   :  { %v1445_v55 = vpop.f32.mrf.mxu1  ;;  %v1485_v61 = vpop.f32.mrf.mxu0 }
 0xbca   :  { %v1486_v63 = vadd.f32 %v1485_v61, %v4856_v1 }
 0xbcb   :  { %v4071_v3 = vpop.f32.mrf.mxu1  ;;  %v4079_v7 = vpop.f32.mrf.mxu0 }
 0xbcc   :  { %v1491_v8 = vsel %vm441_vm15, %v1486_v63, -inf }
 0xbcd   :  { %1492 = vmax.xlane.f32.xlu0 %v1491_v8  ;;  %v1448_v9 = vpop.f32.mrf.mxu1  ;;  %v1488_v10 = vpop.f32.mrf.mxu0 }
 0xbcf   :  { %v4072_v11 = vpop.f32.mrf.mxu1  ;;  %v4080_v12 = vpop.f32.mrf.mxu0 }
 0xc56   :  { %v1493_v13 = vpop.xlane.xlu0 %1492 }
 0xc57   :  { %v1494_v14 = vsub.f32 %v1486_v63, %v1493_v13 }
 0xc59   :  { %v1495_v16 = vmul.f32 1.442695, %v1494_v14 }
 0xc5b   :  { %4439 = vpow2.f32 %v1495_v16 }
 0xc68   :  { %v4440_v18 = vpop.eup %4439 }
 0xc69   :  { %v1541_v60 = vsel %vm441_vm15, %v4440_v18, 0.0  ;;  %v1497_v19 = vpack.c.bf16 %v4440_v18, %v4440_v18 }
 0xc6a   :  { %1542 = vadd.xlane.f32.xlu1 %v1541_v60 }
 0xc6b   :  { %4084 = vmatmul.mubr.msk.bf16.vlgmr.msra.gmra.mxu1 %vm441_vm15, %v1497_v19 }
 0xc6c   :  { %4096 = vmatpush3.bf16.msra.mxu1 %v4813_v22  ;;  %4099 = vmatprep.mubr.msk.bf16.mxu1 %vm4536_vm0, %v4535_v4 }
 0xc6d   :  { %4097 = vmatprep.subr.bf16.mxu1 %v4535_v4 }
 0xc70   :  { %4098 = vmatpush3.bf16.msra.mxu1 %v4826_v28 }
 0xc71   :  { %4109 = vmatprep.subr.bf16.mxu1 %v4535_v4 }
 0xcf3   :  { %v1543_v20 = vpop.xlane.xlu1 %1542 }
 0xcf4   :  { %4441 = vrcp.f32 %v1543_v20 }
 0xd01   :  { %v4442_v21 = vpop.eup %4441 }
 0xd2b   :  { %v1535_v23 = vpop.f32.mrf.mxu1 }
 0xd2c   :  { %v1545_v25 = vmul.f32 %v4442_v21, %v1535_v23 }
 0xd2d   :  { %v4085_v52 = vpop.f32.mrf.mxu1 }
 0xd2e   :  { %v1546_v26 = vadd.f32 %v1545_v25, %v4897_v62 }
 0xd2f   :  { %v1538_v27 = vpop.f32.mrf.mxu1 }
 0xd30   :  { %v1547_v29 = vadd.f32 %v1546_v26, %v1445_v55 }
 0xd31   :  { %v4086_v30 = vpop.f32.mrf.mxu1 }
 0xd32   :  { %4443 = vtanh.f32 %v1547_v29 }
 0xd3f   :  { %v5014_v31 = vpop.eup %4443 }
 0xd40   :  { %v1549_v32 = vpack.c.bf16 %v5014_v31, %v5014_v31 }
 0xd42   :  { %4092 = vmatmul.mubr.msk.bf16.vlgmr.msra.gmra.mxu0 %vm101_vm1, %v1549_v32  ;;  %4100 = vmatmul.mubr.msk.bf16.vlgmr.msra.gmra.mxu1 %vm101_vm1, %v1549_v32 }
 0xd43   :  { %4104 = vmatpush3.bf16.msra.mxu0 %v4802_v15  ;;  %4105 = vmatprep.mubr.msk.bf16.mxu0 %vm4536_vm0, %v4535_v4 }
 0xd44   :  { %4117 = vmatprep.subr.bf16.mxu0 %v4535_v4  ;;  %4110 = vmatpush3.bf16.msra.mxu1 %v4769_v51 }
 0xd45   :  { %4111 = vmatprep.subr.bf16.mxu1 %v4535_v4  ;;  %4113 = vmatprep.mubr.msk.bf16.mxu1 %vm4536_vm0, %v4535_v4 }
 0xd48   :  { %4112 = vmatpush3.bf16.msra.mxu1 %v4785_v0 }
 0xd49   :  { %4125 = vmatprep.subr.bf16.mxu1 %v4535_v4 }
 0xe02   :  { %v1587_v62 = vpop.f32.mrf.mxu0  ;;  %v1627_v33 = vpop.f32.mrf.mxu1 }
 0xe03   :  { %v1628_v34 = vadd.f32 %v1627_v33, %v4856_v1 }
 0xe04   :  { %v4093_v35 = vpop.f32.mrf.mxu0  ;;  %v4101_v36 = vpop.f32.mrf.mxu1 }
 0xe05   :  { %v1633_v37 = vsel %vm441_vm15, %v1628_v34, -inf  ;;  %v4404_v36 = vld [vmem:[%s5409_s15 + $0x18] sm:$0xff]  }
 0xe06   :  { %1634 = vmax.xlane.f32.xlu0 %v1633_v37  ;;  %v1590_v38 = vpop.f32.mrf.mxu0  ;;  %v1630_v39 = vpop.f32.mrf.mxu1 }
 0xe07   :  { %v5092_v39 = vld [vmem:[%s5411_s17 + $0x18] sm:$0xff]  }
 0xe08   :  { %v4094_v40 = vpop.f32.mrf.mxu0  ;;  %v4102_v41 = vpop.f32.mrf.mxu1 }
 0xe09   :  { %v5103_v41 = vld [vmem:[%s5411_s17 + $0x10] sm:$0xff]  }
 0xe8f   :  { %v1635_v42 = vpop.xlane.xlu0 %1634 }
 0xe90   :  { %v1636_v43 = vsub.f32 %v1628_v34, %v1635_v42 }
 0xe92   :  { %v1637_v44 = vmul.f32 1.442695, %v1636_v43 }
 0xe94   :  { %4445 = vpow2.f32 %v1637_v44 }
 0xea1   :  { %v4446_v46 = vpop.eup %4445 }
 0xea2   :  { %v1683_v47 = vsel %vm441_vm15, %v4446_v46, 0.0  ;;  %v1639_v49 = vpack.c.bf16 %v4446_v46, %v4446_v46 }
 0xea3   :  { %1684 = vadd.xlane.f32.xlu1 %v1683_v47 }
 0xea4   :  { %4106 = vmatmul.mubr.msk.bf16.vlgmr.msra.gmra.mxu0 %vm441_vm15, %v1639_v49 }
 0xea5   :  { %4118 = vmatpush3.bf16.msra.mxu0 %v4813_v22  ;;  %4121 = vmatprep.mubr.msk.bf16.mxu0 %vm4536_vm0, %v4535_v4 }
 0xea6   :  { %4119 = vmatprep.subr.bf16.mxu0 %v4535_v4 }
 0xea9   :  { %4120 = vmatpush3.bf16.msra.mxu0 %v4826_v28 }
 0xeaa   :  { %4131 = vmatprep.subr.bf16.mxu0 %v4535_v4 }
 0xf2c   :  { %v1685_v53 = vpop.xlane.xlu1 %1684 }
 0xf2d   :  { %4447 = vrcp.f32 %v1685_v53 }
 0xf3a   :  { %v4448_v54 = vpop.eup %4447 }
 0xf64   :  { %v1677_v56 = vpop.f32.mrf.mxu0 }
 0xf65   :  { %v1687_v55 = vmul.f32 %v4448_v54, %v1677_v56 }
 0xf66   :  { %v4107_v61 = vpop.f32.mrf.mxu0 }
 0xf67   :  { %v1688_v63 = vadd.f32 %v1687_v55, %v804_v58 }
 0xf68   :  { %v1680_v3 = vpop.f32.mrf.mxu0 }
 0xf69   :  { %v1689_v7 = vadd.f32 %v1688_v63, %v1587_v62 }
 0xf6a   :  { %v4108_v8 = vpop.f32.mrf.mxu0 }
 0xf6b   :  { %4449 = vtanh.f32 %v1689_v7 }
 0xf78   :  { %v5042_v9 = vpop.eup %4449 }
 0xf79   :  { %v1691_v10 = vpack.c.bf16 %v5042_v9, %v5042_v9 }
 0xf7b   :  { %4114 = vmatmul.mubr.msk.bf16.vlgmr.msra.gmra.mxu1 %vm101_vm1, %v1691_v10  ;;  %4122 = vmatmul.mubr.msk.bf16.vlgmr.msra.gmra.mxu0 %vm101_vm1, %v1691_v10 }
 0xf7c   :  { %4126 = vmatpush3.bf16.msra.mxu1 %v4802_v15  ;;  %4127 = vmatprep.mubr.msk.bf16.mxu1 %vm4536_vm0, %v4535_v4 }
 0xf7d   :  { %4139 = vmatprep.subr.bf16.mxu1 %v4535_v4  ;;  %4132 = vmatpush3.bf16.msra.mxu0 %v4769_v51 }
 0xf7e   :  { %4133 = vmatprep.subr.bf16.mxu0 %v4535_v4  ;;  %4135 = vmatprep.mubr.msk.bf16.mxu0 %vm4536_vm0, %v4535_v4 }
 0xf81   :  { %4134 = vmatpush3.bf16.msra.mxu0 %v4785_v0 }
 0xf82   :  { %4147 = vmatprep.subr.bf16.mxu0 %v4535_v4 }
0x103b   :  { %v1729_v48 = vpop.f32.mrf.mxu1  ;;  %v1769_v5 = vpop.f32.mrf.mxu0 }
0x103c   :  { %v1770_v11 = vadd.f32 %v1769_v5, %v4856_v1 }
0x103d   :  { %v4115_v12 = vpop.f32.mrf.mxu1  ;;  %v4123_v13 = vpop.f32.mrf.mxu0 }
0x103e   :  { %v1775_v14 = vsel %vm441_vm15, %v1770_v11, -inf }
0x103f   :  { %v1732_v16 = vpop.f32.mrf.mxu1  ;;  %1776 = vmax.xlane.f32.xlu0 %v1775_v14  ;;  %v1772_v51 = vpop.f32.mrf.mxu0 }
0x1040   :  { %v4408_v16 = vld [vmem:[%s5410_s16 + $0x18] sm:$0xff]  }
0x1041   :  { %v4116_v18 = vpop.f32.mrf.mxu1  ;;  %v4124_v60 = vpop.f32.mrf.mxu0 }
0x1055   :  { %2146 = vrot.lane.b32.xlu0 %v4792_v6, %s4538_s7 }
0x10c8   :  { %v1777_v19 = vpop.xlane.xlu0 %1776 }
0x10c9   :  { %v1778_v0 = vsub.f32 %v1770_v11, %v1777_v19 }
0x10cb   :  { %v1779_v20 = vmul.f32 1.442695, %v1778_v0 }
0x10cc   :  { %v2147_v38 = vpop.permute.xlu0 %2146 }
0x10cd   :  { %4451 = vpow2.f32 %v1779_v20 }
0x10da   :  { %v4452_v21 = vpop.eup %4451 }
0x10db   :  { %v1825_v23 = vsel %vm441_vm15, %v4452_v21, 0.0  ;;  %v1781_v25 = vpack.c.bf16 %v4452_v21, %v4452_v21 }
0x10dc   :  { %1826 = vadd.xlane.f32.xlu1 %v1825_v23  ;;  %v4409_v23 = vld [vmem:[%s5410_s16 + $0x10] sm:$0xff]  }
0x10dd   :  { %4128 = vmatmul.mubr.msk.bf16.vlgmr.msra.gmra.mxu1 %vm441_vm15, %v1781_v25  ;;  %v2043_v25 = vpack.c.bf16 %v4933_v45, %v4906_v17 }
0x10de   :  { %4140 = vmatpush3.bf16.msra.mxu1 %v4813_v22  ;;  %4143 = vmatprep.mubr.msk.bf16.mxu1 %vm4536_vm0, %v4535_v4 }
0x10df   :  { %4141 = vmatprep.subr.bf16.mxu1 %v4535_v4 }
0x10e2   :  { %4142 = vmatpush3.bf16.msra.mxu1 %v4826_v28 }
0x10e3   :  { %4153 = vmatprep.subr.bf16.mxu1 %v4535_v4 }
0x1165   :  { %v1827_v52 = vpop.xlane.xlu1 %1826 }
0x1166   :  { %4453 = vrcp.f32 %v1827_v52 }
0x1173   :  { %v4454_v26 = vpop.eup %4453 }
0x119d   :  { %v1819_v27 = vpop.f32.mrf.mxu1 }
0x119e   :  { %v1829_v29 = vmul.f32 %v4454_v26, %v1819_v27  ;;  %v2045_v26 = vpack.c.bf16 %v5042_v9, %v5014_v31 }
0x119f   :  { %v4129_v30 = vpop.f32.mrf.mxu1 }
0x11a0   :  { %v1830_v32 = vadd.f32 %v1829_v29, %v4894_v59  ;;  %v4405_v59 = vld [vmem:[%s5409_s15 + $0x10] sm:$0xff]  }
0x11a1   :  { %v1822_v62 = vpop.f32.mrf.mxu1 }
0x11a2   :  { %v1831_v33 = vadd.f32 %v1830_v32, %v1729_v48 }
0x11a3   :  { %v4130_v34 = vpop.f32.mrf.mxu1 }
0x11a4   :  { %4455 = vtanh.f32 %v1831_v33 }
0x11b1   :  { %v5071_v35 = vpop.eup %4455 }
0x11b2   :  { %v1833_v37 = vpack.c.bf16 %v5071_v35, %v5071_v35 }
0x11b4   :  { %4136 = vmatmul.mubr.msk.bf16.vlgmr.msra.gmra.mxu0 %vm101_vm1, %v1833_v37  ;;  %4144 = vmatmul.mubr.msk.bf16.vlgmr.msra.gmra.mxu1 %vm101_vm1, %v1833_v37 }
0x11b5   :  { %4148 = vmatpush3.bf16.msra.mxu0 %v4802_v15  ;;  %4154 = vmatpush3.bf16.msra.mxu1 %v4404_v36  ;;  %v2144_v15 = vrot.slane %v4792_v6, 1 }
0x11b6   :  { %4155 = vmatprep.subr.bf16.mxu1 %v4535_v4  ;;  %4157 = vmatprep.mubr.msk.bf16.mxu1 %vm4536_vm0, %v4535_v4 }
0x11b7   :  { %4149 = vmatprep.mubr.msk.bf16.mxu0 %vm4536_vm0, %v4535_v4  ;;  %v2149_v40 = vsel %vm820_vm2, %v2144_v15, %v2147_v38  ;;  %4161 = vmatprep.subr.bf16.mxu0 %v4408_v16 }
0x11b8   :  { %v2150_v6 = vsel %vm822_vm3, %v2149_v40, 0.0 }
0x11b9   :  { %4156 = vmatpush3.bf16.msra.mxu1 %v4405_v59  ;;  %v2151_v42 = vpack.c.bf16 %v2150_v6, %v2150_v6 }
0x11ba   :  { %4173 = vmatprep.subr.bf16.mxu1 %v4535_v4 }
0x11bc   :  { %4158 = vmatmul.mubr.msk.bf16.vlgmr.msra.gmra.mxu1 %vm101_vm1, %v4764_v50 }
0x11bd   :  { %4174 = vmatpush3.bf16.msra.mxu1 %v5092_v39  ;;  %4177 = vmatprep.mubr.msk.bf16.mxu1 %vm4536_vm0, %v4535_v4 }
0x11be   :  { %4175 = vmatprep.subr.bf16.mxu1 %v4535_v4 }
0x11c1   :  { %4176 = vmatpush3.bf16.msra.mxu1 %v5103_v41 }
0x11c2   :  { %4181 = vmatprep.subr.bf16.mxu1 %v4535_v4 }
0x11c4   :  { %4178 = vmatmul.mubr.msk.bf16.vlgmr.msra.gmra.mxu1 %vm101_vm1, %v2151_v42 }
0x11c5   :  { %4182 = vmatpush3.bf16.msra.mxu1 %v4813_v22  ;;  %4185 = vmatprep.mubr.msk.bf16.mxu1 %vm4536_vm0, %v4535_v4 }
0x11c6   :  { %4183 = vmatprep.subr.bf16.mxu1 %v4535_v4 }
0x11c9   :  { %4184 = vmatpush3.bf16.msra.mxu1 %v4826_v28 }
0x11ca   :  { %4195 = vmatprep.subr.bf16.mxu1 %v4535_v4 }
0x11cc   :  { %4186 = vmatmul.mubr.msk.bf16.vlgmr.msra.gmra.mxu1 %vm101_vm1, %v2151_v42 }
0x11cd   :  { %4196 = vmatpush3.bf16.msra.mxu1 %v5092_v39  ;;  %4199 = vmatprep.mubr.msk.bf16.mxu1 %vm4536_vm0, %v4535_v4 }
0x11ce   :  { %4197 = vmatprep.subr.bf16.mxu1 %v4535_v4 }
0x11d1   :  { %4198 = vmatpush3.bf16.msra.mxu1 %v5103_v41 }
0x11d2   :  { %4211 = vmatprep.subr.bf16.mxu1 %v4535_v4 }
0x1274   :  { %v5125_v50 = vpop.f32.mrf.mxu0  ;;  %v1911_v43 = vpop.f32.mrf.mxu1 }
0x1275   :  { %v1912_v44 = vadd.f32 %v1911_v43, %v4856_v1 }
0x1276   :  { %v4137_v46 = vpop.f32.mrf.mxu0  ;;  %v4145_v47 = vpop.f32.mrf.mxu1 }
0x1277   :  { %v1917_v49 = vsel %vm441_vm15, %v1912_v44, -inf  ;;  %v5184_v47 = vld [vmem:[%s5412_s18 + $0x1] ss:$0 sm:$0xff] }
0x1278   :  { %1918 = vmax.xlane.f32.xlu1 %v1917_v49  ;;  %v1874_v53 = vpop.f32.mrf.mxu0  ;;  %v1914_v54 = vpop.f32.mrf.mxu1 }
0x127a   :  { %v4138_v56 = vpop.f32.mrf.mxu0  ;;  %v4146_v58 = vpop.f32.mrf.mxu1 }
0x127c   :  { %v2031_v55 = vpop.f32.mrf.mxu1 }
0x127e   :  { %v4159_v61 = vpop.f32.mrf.mxu1 }
0x1280   :  { %v2034_v63 = vpop.f32.mrf.mxu1 }
0x1281   :  { %v5129_v3 = vpack.c.bf16 %v2034_v63, %v2031_v55 }
0x1282   :  { %v4160_v7 = vpop.f32.mrf.mxu1 }
0x1284   :  { %v5131_v8 = vpop.f32.mrf.mxu1 }
0x1286   :  { %v4179_v10 = vpop.f32.mrf.mxu1 }
0x1288   :  { %v2204_v48 = vpop.f32.mrf.mxu1 }
0x128a   :  { %v4180_v5 = vpop.f32.mrf.mxu1 }
0x128b   :  { %v5207_v5 = vld [vmem:[%s5438_s27] sm:$0xff] }
0x128c   :  { %v2241_v11 = vpop.f32.mrf.mxu1 }
0x128d   :  { %v2242_v0 = vadd.f32 %v2241_v11, %v4856_v1  ;;  %v2044_v1 = vpack.c.bf16 %v4987_v57, %v4960_v24 }
0x128e   :  { %v4187_v12 = vpop.f32.mrf.mxu1 }
0x128f   :  { %v2247_v52 = vsel %vm441_vm15, %v2242_v0, -inf }
0x1290   :  { %v2244_v13 = vpop.f32.mrf.mxu1 }
0x1292   :  { %v4188_v14 = vpop.f32.mrf.mxu1 }
0x1301   :  { %v1919_v51 = vpop.xlane.xlu1 %1918 }
0x1302   :  { %v1920_v18 = vsub.f32 %v1912_v44, %v1919_v51 }
0x1304   :  { %v1921_v60 = vmul.f32 1.442695, %v1920_v18 }
0x1306   :  { %4457 = vpow2.f32 %v1921_v60 }
0x1313   :  { %v4458_v19 = vpop.eup %4457 }
0x1314   :  { %v1967_v20 = vsel %vm441_vm15, %v4458_v19, 0.0  ;;  %v1923_v21 = vpack.c.bf16 %v4458_v19, %v4458_v19 }
0x1315   :  { %1968 = vadd.xlane.f32.xlu1 %v1967_v20 }
0x1316   :  { %4150 = vmatmul.mubr.msk.bf16.vlgmr.msra.gmra.mxu0 %vm441_vm15, %v1923_v21 }
0x1317   :  { %4162 = vmatpush3.bf16.msra.mxu0 %v4408_v16  ;;  %4165 = vmatprep.mubr.msk.bf16.mxu0 %vm101_vm1, %v2043_v25 }
0x1318   :  { %4163 = vmatprep.subr.bf16.mxu0 %v4409_v23 }
0x1319   :  { %2248 = vmax.xlane.f32.xlu1 %v2247_v52 }
0x131b   :  { %4164 = vmatpush3.bf16.msra.mxu0 %v4409_v23 }
0x131c   :  { %4189 = vmatprep.subr.bf16.mxu0 %v4535_v4 }
0x131e   :  { %4166 = vmatmul.mubr.msk.bf16.vlgmr.msra.gmra.mxu0 %vm101_vm1, %v2044_v1 }
0x131f   :  { %4169 = vmatprep.mubr.msk.bf16.mxu0 %vm101_vm1, %v2045_v26  ;;  %4190 = vmatpush3.bf16.msra.mxu0 %v5129_v3 }
0x1320   :  { %4203 = vmatprep.subr.bf16.mxu0 %v4535_v4 }
0x139e   :  { %v1969_v17 = vpop.xlane.xlu1 %1968 }
0x13a2   :  { %v2249_v45 = vpop.xlane.xlu1 %2248 }
0x13a3   :  { %v2250_v27 = vsub.f32 %v2242_v0, %v2249_v45 }
0x13a5   :  { %v2251_v29 = vmul.f32 1.442695, %v2250_v27 }
0x13a7   :  { %4459 = vpow2.f32 %v2251_v29 }
0x13a8   :  { %4461 = vrcp.f32 %v1969_v17 }
0x13b4   :  { %v4460_v30 = vpop.eup %4459 }
0x13b5   :  { %v2298_v24 = vsel %vm441_vm15, %v4460_v30, 0.0  ;;  %v4462_v57 = vpop.eup %4461  ;;  %v2253_v38 = vpack.c.bf16 %v4460_v30, %v4460_v30 }
0x13b6   :  { %2299 = vadd.xlane.f32.xlu1 %v2298_v24 }
0x13d6   :  { %v1961_v31 = vpop.f32.mrf.mxu0 }
0x13d7   :  { %v1971_v9 = vmul.f32 %v4462_v57, %v1961_v31 }
0x13d8   :  { %v4151_v32 = vpop.f32.mrf.mxu0 }
0x13d9   :  { %v1972_v62 = vadd.f32 %v1971_v9, %v4900_v2 }
0x13da   :  { %v1964_v33 = vpop.f32.mrf.mxu0 }
0x13db   :  { %v1973_v34 = vadd.f32 %v1972_v62, %v5125_v50 }
0x13dc   :  { %v4152_v36 = vpop.f32.mrf.mxu0 }
0x13dd   :  { %4463 = vtanh.f32 %v1973_v34 }
0x13de   :  { %v5169_v2 = vpop.f32.mrf.mxu0 }
0x13ea   :  { %v4464_v37 = vpop.eup %4463 }
0x13eb   :  { %v2046_v59 = vpack.c.bf16 %v4464_v37, %v5071_v35  ;;  %v2113_v35 = vpop.f32.mrf.mxu0 }
0x13ec   :  { %v2114_v53 = vadd.f32 %v5184_v47, %v2113_v35 }
0x13ed   :  { %4170 = vmatmul.mubr.msk.bf16.gmra.mxu0 %vm101_vm1, %v2046_v59  ;;  %v5171_v40 = vpop.f32.mrf.mxu0 }
0x13ee   :  { %4191 = vmatprep.mubr.msk.bf16.mxu0 %vm4536_vm0, %v4535_v4 }
0x13ef   :  { %v2116_v6 = vpop.f32.mrf.mxu0 }
0x13f0   :  { %v2117_v17 = vadd.f32 %v5184_v47, %v2116_v6 }
0x13f5   :  { %4192 = vmatmul.mubr.msk.bf16.vlgmr.msra.gmra.mxu0 %vm441_vm15, %v2253_v38 }
0x13f6   :  { %4204 = vmatpush3.bf16.msra.mxu0 %v4813_v22  ;;  %4207 = vmatprep.mubr.msk.bf16.mxu0 %vm4536_vm0, %v4535_v4 }
0x13f7   :  { %4205 = vmatprep.subr.bf16.mxu0 %v4535_v4 }
0x13fa   :  { %4206 = vmatpush3.bf16.msra.mxu0 %v4826_v28 }
0x13fb   :  { %4217 = vmatprep.subr.bf16.mxu0 %v4535_v4 }
0x143f   :  { %v2300_v15 = vpop.xlane.xlu1 %2299 }
0x1440   :  { %4465 = vrcp.f32 %v2300_v15 }
0x144d   :  { %v4466_v46 = vpop.eup %4465 }
0x14ad   :  { %v5173_v42 = vpop.f32.mrf.mxu0 }
0x14af   :  { %v5175_v50 = vpop.f32.mrf.mxu0 }
0x14b1   :  { %v5177_v43 = vpop.f32.mrf.mxu0 }
0x14b3   :  { %v5179_v44 = vpop.f32.mrf.mxu0 }
0x14b5   :  { %v2292_v49 = vpop.f32.mrf.mxu0 }
0x14b6   :  { %v2302_v54 = vmul.f32 %v4466_v46, %v2292_v49 }
0x14b7   :  { %v4193_v56 = vpop.f32.mrf.mxu0 }
0x14b8   :  { %v2303_v58 = vadd.f32 %v2302_v54, %v2114_v53 }
0x14b9   :  { %v2295_v55 = vpop.f32.mrf.mxu0 }
0x14ba   :  { %v2304_v61 = vadd.f32 %v2303_v58, %v5131_v8 }
0x14bb   :  { %v4194_v63 = vpop.f32.mrf.mxu0 }
0x14bc   :  { %4467 = vtanh.f32 %v2304_v61  ;;  %v2122_v63 = vadd.f32 %v5169_v2, %v5184_v47 }
0x14c9   :  { %v5188_v7 = vpop.eup %4467 }
0x14ca   :  { %v2306_v10 = vpack.c.bf16 %v5188_v7, %v5188_v7 }
0x14cc   :  { %4200 = vmatmul.mubr.msk.bf16.vlgmr.msra.gmra.mxu1 %vm101_vm1, %v2306_v10  ;;  %4208 = vmatmul.mubr.msk.bf16.vlgmr.msra.gmra.mxu0 %vm101_vm1, %v2306_v10 }
0x14cd   :  { %4212 = vmatpush3.bf16.msra.mxu1 %v5129_v3  ;;  %4213 = vmatprep.mubr.msk.bf16.mxu1 %vm4536_vm0, %v4535_v4 }
0x14ce   :  { %4225 = vmatprep.subr.bf16.mxu1 %v4535_v4  ;;  %4218 = vmatpush3.bf16.msra.mxu0 %v5092_v39 }
0x14cf   :  { %4219 = vmatprep.subr.bf16.mxu0 %v4535_v4  ;;  %4221 = vmatprep.mubr.msk.bf16.mxu0 %vm4536_vm0, %v4535_v4 }
0x14d2   :  { %4220 = vmatpush3.bf16.msra.mxu0 %v5103_v41 }
0x14d3   :  { %4233 = vmatprep.subr.bf16.mxu0 %v4535_v4 }
0x158c   :  { %v2344_v8 = vpop.f32.mrf.mxu1  ;;  %v2384_v48 = vpop.f32.mrf.mxu0 }
0x158d   :  { %v2385_v11 = vadd.f32 %v5207_v5, %v2384_v48 }
0x158e   :  { %v4201_v12 = vpop.f32.mrf.mxu1  ;;  %v4209_v13 = vpop.f32.mrf.mxu0 }
0x158f   :  { %v2390_v14 = vsel %vm441_vm15, %v2385_v11, -inf }
0x1590   :  { %2391 = vmax.xlane.f32.xlu1 %v2390_v14  ;;  %v2347_v16 = vpop.f32.mrf.mxu1  ;;  %v2387_v51 = vpop.f32.mrf.mxu0 }
0x1591   :  { %v3322_v51 = vrot.slane %v5188_v7, 1 }
0x1592   :  { %v4202_v18 = vpop.f32.mrf.mxu1  ;;  %v4210_v60 = vpop.f32.mrf.mxu0 }
0x1619   :  { %v2392_v19 = vpop.xlane.xlu1 %2391 }
0x161a   :  { %v2393_v0 = vsub.f32 %v2385_v11, %v2392_v19 }
0x161c   :  { %v2394_v20 = vmul.f32 1.442695, %v2393_v0 }
0x161e   :  { %4469 = vpow2.f32 %v2394_v20 }
0x162b   :  { %v4470_v21 = vpop.eup %4469 }
0x162c   :  { %v2440_v23 = vsel %vm441_vm15, %v4470_v21, 0.0  ;;  %v2396_v25 = vpack.c.bf16 %v4470_v21, %v4470_v21 }
0x162d   :  { %2441 = vadd.xlane.f32.xlu1 %v2440_v23 }
0x162e   :  { %4214 = vmatmul.mubr.msk.bf16.vlgmr.msra.gmra.mxu1 %vm441_vm15, %v2396_v25 }
0x162f   :  { %4226 = vmatpush3.bf16.msra.mxu1 %v4813_v22  ;;  %4229 = vmatprep.mubr.msk.bf16.mxu1 %vm4536_vm0, %v4535_v4 }
0x1630   :  { %4227 = vmatprep.subr.bf16.mxu1 %v4535_v4 }
0x1633   :  { %4228 = vmatpush3.bf16.msra.mxu1 %v4826_v28 }
0x1634   :  { %4239 = vmatprep.subr.bf16.mxu1 %v4535_v4 }
0x16b6   :  { %v2442_v52 = vpop.xlane.xlu1 %2441 }
0x16b7   :  { %4471 = vrcp.f32 %v2442_v52 }
0x16c4   :  { %v4472_v1 = vpop.eup %4471 }
0x16ee   :  { %v2434_v26 = vpop.f32.mrf.mxu1 }
0x16ef   :  { %v2444_v45 = vmul.f32 %v4472_v1, %v2434_v26 }
0x16f0   :  { %v4215_v27 = vpop.f32.mrf.mxu1 }
0x16f1   :  { %v2445_v29 = vadd.f32 %v2444_v45, %v2117_v17 }
0x16f2   :  { %v2437_v30 = vpop.f32.mrf.mxu1 }
0x16f3   :  { %v2446_v24 = vadd.f32 %v2445_v29, %v2344_v8 }
0x16f4   :  { %v4216_v57 = vpop.f32.mrf.mxu1 }
0x16f5   :  { %4473 = vtanh.f32 %v2446_v24 }
0x1702   :  { %v4474_v31 = vpop.eup %4473 }
0x1703   :  { %v2448_v9 = vpack.c.bf16 %v4474_v31, %v4474_v31  ;;  %v3301_v14 = vrot.slane %v4474_v31, 7  ;;  %v3348_v20 = vsel %vm820_vm2, %v3322_v51, %v4474_v31 }
0x1705   :  { %4222 = vmatmul.mubr.msk.bf16.vlgmr.msra.gmra.mxu0 %vm101_vm1, %v2448_v9  ;;  %4230 = vmatmul.mubr.msk.bf16.vlgmr.msra.gmra.mxu1 %vm101_vm1, %v2448_v9  ;;  %v3336_v0 = vsel %vm820_vm2, %v5188_v7, %v3301_v14 }
0x1706   :  { %4234 = vmatpush3.bf16.msra.mxu0 %v5129_v3  ;;  %4235 = vmatprep.mubr.msk.bf16.mxu0 %vm4536_vm0, %v4535_v4 }
0x1707   :  { %4247 = vmatprep.subr.bf16.mxu0 %v4535_v4  ;;  %4240 = vmatpush3.bf16.msra.mxu1 %v5092_v39 }
0x1708   :  { %4241 = vmatprep.subr.bf16.mxu1 %v4535_v4  ;;  %4243 = vmatprep.mubr.msk.bf16.mxu1 %vm4536_vm0, %v4535_v4 }
0x170b   :  { %4242 = vmatpush3.bf16.msra.mxu1 %v5103_v41 }
0x170c   :  { %4255 = vmatprep.subr.bf16.mxu1 %v4535_v4 }
0x17c5   :  { %v2486_v32 = vpop.f32.mrf.mxu0  ;;  %v2526_v62 = vpop.f32.mrf.mxu1 }
0x17c6   :  { %v2527_v33 = vadd.f32 %v5207_v5, %v2526_v62 }
0x17c7   :  { %v4223_v34 = vpop.f32.mrf.mxu0  ;;  %v4231_v36 = vpop.f32.mrf.mxu1 }
0x17c8   :  { %v2532_v37 = vsel %vm441_vm15, %v2527_v33, -inf  ;;  %v2125_v36 = vadd.f32 %v5171_v40, %v5184_v47 }
0x17c9   :  { %v2489_v59 = vpop.f32.mrf.mxu0  ;;  %2533 = vmax.xlane.f32.xlu0 %v2532_v37  ;;  %v2529_v38 = vpop.f32.mrf.mxu1 }
0x17cb   :  { %v4224_v35 = vpop.f32.mrf.mxu0  ;;  %v4232_v15 = vpop.f32.mrf.mxu1 }
0x1852   :  { %v2534_v6 = vpop.xlane.xlu0 %2533 }
0x1853   :  { %v2535_v46 = vsub.f32 %v2527_v33, %v2534_v6 }
0x1855   :  { %v2536_v49 = vmul.f32 1.442695, %v2535_v46 }
0x1857   :  { %4475 = vpow2.f32 %v2536_v49 }
0x1864   :  { %v4476_v53 = vpop.eup %4475 }
0x1865   :  { %v2582_v54 = vsel %vm441_vm15, %v4476_v53, 0.0  ;;  %v2538_v56 = vpack.c.bf16 %v4476_v53, %v4476_v53 }
0x1866   :  { %2583 = vadd.xlane.f32.xlu1 %v2582_v54 }
0x1867   :  { %4236 = vmatmul.mubr.msk.bf16.vlgmr.msra.gmra.mxu0 %vm441_vm15, %v2538_v56 }
0x1868   :  { %4248 = vmatpush3.bf16.msra.mxu0 %v4813_v22  ;;  %4251 = vmatprep.mubr.msk.bf16.mxu0 %vm4536_vm0, %v4535_v4 }
0x1869   :  { %4249 = vmatprep.subr.bf16.mxu0 %v4535_v4 }
0x186c   :  { %4250 = vmatpush3.bf16.msra.mxu0 %v4826_v28 }
0x186d   :  { %4261 = vmatprep.subr.bf16.mxu0 %v4535_v4 }
0x18ef   :  { %v2584_v58 = vpop.xlane.xlu1 %2583 }
0x18f0   :  { %4477 = vrcp.f32 %v2584_v58 }
0x18fd   :  { %v4478_v55 = vpop.eup %4477 }
0x1927   :  { %v2576_v61 = vpop.f32.mrf.mxu0 }
0x1928   :  { %v2586_v10 = vmul.f32 %v4478_v55, %v2576_v61 }
0x1929   :  { %v4237_v8 = vpop.f32.mrf.mxu0 }
0x192a   :  { %v2587_v48 = vadd.f32 %v2586_v10, %v2122_v63 }
0x192b   :  { %v2579_v11 = vpop.f32.mrf.mxu0 }
0x192c   :  { %v2588_v12 = vadd.f32 %v2587_v48, %v2486_v32 }
0x192d   :  { %v4238_v13 = vpop.f32.mrf.mxu0 }
0x192e   :  { %4479 = vtanh.f32 %v2588_v12 }
0x193b   :  { %v4480_v16 = vpop.eup %4479 }
0x193c   :  { %v2590_v18 = vpack.c.bf16 %v4480_v16, %v4480_v16  ;;  %v3304_v60 = vrot.slane %v4480_v16, 6  ;;  %v3324_v19 = vrot.slane %v4480_v16, 7 }
0x193e   :  { %4244 = vmatmul.mubr.msk.bf16.vlgmr.msra.gmra.mxu1 %vm101_vm1, %v2590_v18  ;;  %4252 = vmatmul.mubr.msk.bf16.vlgmr.msra.gmra.mxu0 %vm101_vm1, %v2590_v18  ;;  %v3337_v2 = vsel %vm822_vm3, %v3336_v0, %v3304_v60  ;;  %v3349_v21 = vsel %vm822_vm3, %v3348_v20, %v3324_v19 }
0x193f   :  { %4256 = vmatpush3.bf16.msra.mxu1 %v5129_v3  ;;  %4257 = vmatprep.mubr.msk.bf16.mxu1 %vm4536_vm0, %v4535_v4 }
0x1940   :  { %4269 = vmatprep.subr.bf16.mxu1 %v4535_v4  ;;  %4262 = vmatpush3.bf16.msra.mxu0 %v5092_v39 }
0x1941   :  { %4263 = vmatprep.subr.bf16.mxu0 %v4535_v4  ;;  %4265 = vmatprep.mubr.msk.bf16.mxu0 %vm4536_vm0, %v4535_v4 }
0x1944   :  { %4264 = vmatpush3.bf16.msra.mxu0 %v5103_v41 }
0x1945   :  { %4277 = vmatprep.subr.bf16.mxu0 %v4535_v4 }
0x19fe   :  { %v2628_v7 = vpop.f32.mrf.mxu1  ;;  %v2668_v23 = vpop.f32.mrf.mxu0 }
0x19ff   :  { %v2669_v25 = vadd.f32 %v5207_v5, %v2668_v23 }
0x1a00   :  { %v4245_v52 = vpop.f32.mrf.mxu1  ;;  %v4253_v1 = vpop.f32.mrf.mxu0 }
0x1a01   :  { %v2674_v26 = vsel %vm441_vm15, %v2669_v25, -inf }
0x1a02   :  { %2675 = vmax.xlane.f32.xlu1 %v2674_v26  ;;  %v2631_v17 = vpop.f32.mrf.mxu1  ;;  %v2671_v45 = vpop.f32.mrf.mxu0 }
0x1a04   :  { %v4246_v27 = vpop.f32.mrf.mxu1  ;;  %v4254_v29 = vpop.f32.mrf.mxu0 }
0x1a8b   :  { %v2676_v30 = vpop.xlane.xlu1 %2675 }
0x1a8c   :  { %v2677_v24 = vsub.f32 %v2669_v25, %v2676_v30 }
0x1a8e   :  { %v2678_v57 = vmul.f32 1.442695, %v2677_v24 }
0x1a90   :  { %4481 = vpow2.f32 %v2678_v57 }
0x1a9d   :  { %v4482_v31 = vpop.eup %4481 }
0x1a9e   :  { %v2724_v9 = vsel %vm441_vm15, %v4482_v31, 0.0  ;;  %v2680_v32 = vpack.c.bf16 %v4482_v31, %v4482_v31 }
0x1a9f   :  { %2725 = vadd.xlane.f32.xlu1 %v2724_v9 }
0x1aa0   :  { %4258 = vmatmul.mubr.msk.bf16.vlgmr.msra.gmra.mxu1 %vm441_vm15, %v2680_v32 }
0x1aa1   :  { %4270 = vmatpush3.bf16.msra.mxu1 %v4813_v22  ;;  %4273 = vmatprep.mubr.msk.bf16.mxu1 %vm4536_vm0, %v4535_v4 }
0x1aa2   :  { %4271 = vmatprep.subr.bf16.mxu1 %v4535_v4 }
0x1aa5   :  { %4272 = vmatpush3.bf16.msra.mxu1 %v4826_v28 }
0x1aa6   :  { %4283 = vmatprep.subr.bf16.mxu1 %v4535_v4 }
0x1b28   :  { %v2726_v62 = vpop.xlane.xlu1 %2725 }
0x1b29   :  { %4483 = vrcp.f32 %v2726_v62 }
0x1b36   :  { %v4484_v33 = vpop.eup %4483 }
0x1b60   :  { %v2718_v34 = vpop.f32.mrf.mxu1 }
0x1b61   :  { %v2728_v37 = vmul.f32 %v4484_v33, %v2718_v34 }
0x1b62   :  { %v4259_v59 = vpop.f32.mrf.mxu1 }
0x1b63   :  { %v2729_v38 = vadd.f32 %v2728_v37, %v2125_v36 }
0x1b64   :  { %v2721_v35 = vpop.f32.mrf.mxu1 }
0x1b65   :  { %v2730_v15 = vadd.f32 %v2729_v38, %v2628_v7 }
0x1b66   :  { %v4260_v6 = vpop.f32.mrf.mxu1 }
0x1b67   :  { %4485 = vtanh.f32 %v2730_v15 }
0x1b74   :  { %v4486_v46 = vpop.eup %4485 }
0x1b75   :  { %v2732_v49 = vpack.c.bf16 %v4486_v46, %v4486_v46  ;;  %v3307_v53 = vrot.slane %v4486_v46, 5  ;;  %v3326_v54 = vrot.slane %v4486_v46, 6 }
0x1b77   :  { %4266 = vmatmul.mubr.msk.bf16.vlgmr.msra.gmra.mxu0 %vm101_vm1, %v2732_v49  ;;  %4274 = vmatmul.mubr.msk.bf16.vlgmr.msra.gmra.mxu1 %vm101_vm1, %v2732_v49  ;;  %v3339_v56 = vsel %vm3338_vm4, %v3337_v2, %v3307_v53  ;;  %v3350_v58 = vsel %vm3338_vm4, %v3349_v21, %v3326_v54  ;;  %v2130_v21 = vadd.f32 %v5184_v47, %v5175_v50 }
0x1b78   :  { %4278 = vmatpush3.bf16.msra.mxu0 %v5129_v3  ;;  %4279 = vmatprep.mubr.msk.bf16.mxu0 %vm4536_vm0, %v4535_v4 }
0x1b79   :  { %4291 = vmatprep.subr.bf16.mxu0 %v4535_v4  ;;  %4284 = vmatpush3.bf16.msra.mxu1 %v5092_v39 }
0x1b7a   :  { %4285 = vmatprep.subr.bf16.mxu1 %v4535_v4  ;;  %4287 = vmatprep.mubr.msk.bf16.mxu1 %vm4536_vm0, %v4535_v4 }
0x1b7d   :  { %4286 = vmatpush3.bf16.msra.mxu1 %v5103_v41 }
0x1b7e   :  { %4299 = vmatprep.subr.bf16.mxu1 %v4535_v4 }
0x1c37   :  { %v2770_v40 = vpop.f32.mrf.mxu0  ;;  %v2810_v55 = vpop.f32.mrf.mxu1 }
0x1c38   :  { %v2811_v61 = vadd.f32 %v5207_v5, %v2810_v55 }
0x1c39   :  { %v4267_v63 = vpop.f32.mrf.mxu0  ;;  %v4275_v10 = vpop.f32.mrf.mxu1 }
0x1c3a   :  { %v2816_v8 = vsel %vm441_vm15, %v2811_v61, -inf }
0x1c3b   :  { %v2773_v48 = vpop.f32.mrf.mxu0  ;;  %2817 = vmax.xlane.f32.xlu1 %v2816_v8  ;;  %v2813_v11 = vpop.f32.mrf.mxu1 }
0x1c3d   :  { %v4268_v12 = vpop.f32.mrf.mxu0  ;;  %v4276_v13 = vpop.f32.mrf.mxu1 }
0x1cc4   :  { %v2818_v14 = vpop.xlane.xlu1 %2817 }
0x1cc5   :  { %v2819_v16 = vsub.f32 %v2811_v61, %v2818_v14 }
0x1cc7   :  { %v2820_v51 = vmul.f32 1.442695, %v2819_v16 }
0x1cc9   :  { %4487 = vpow2.f32 %v2820_v51 }
0x1cd6   :  { %v4488_v18 = vpop.eup %4487 }
0x1cd7   :  { %v2866_v60 = vsel %vm441_vm15, %v4488_v18, 0.0  ;;  %v2822_v19 = vpack.c.bf16 %v4488_v18, %v4488_v18 }
0x1cd8   :  { %2867 = vadd.xlane.f32.xlu1 %v2866_v60 }
0x1cd9   :  { %4280 = vmatmul.mubr.msk.bf16.vlgmr.msra.gmra.mxu0 %vm441_vm15, %v2822_v19 }
0x1cda   :  { %4292 = vmatpush3.bf16.msra.mxu0 %v4813_v22  ;;  %4295 = vmatprep.mubr.msk.bf16.mxu0 %vm4536_vm0, %v4535_v4 }
0x1cdb   :  { %4293 = vmatprep.subr.bf16.mxu0 %v4535_v4 }
0x1cde   :  { %4294 = vmatpush3.bf16.msra.mxu0 %v4826_v28 }
0x1cdf   :  { %4305 = vmatprep.subr.bf16.mxu0 %v4535_v4 }
0x1d61   :  { %v2868_v0 = vpop.xlane.xlu1 %2867 }
0x1d62   :  { %4489 = vrcp.f32 %v2868_v0 }
0x1d6f   :  { %v4490_v20 = vpop.eup %4489 }
0x1d99   :  { %v2860_v2 = vpop.f32.mrf.mxu0 }
0x1d9a   :  { %v2870_v7 = vmul.f32 %v4490_v20, %v2860_v2 }
0x1d9b   :  { %v4281_v23 = vpop.f32.mrf.mxu0 }
0x1d9c   :  { %v2871_v25 = vadd.f32 %v2870_v7, %v2130_v21 }
0x1d9d   :  { %v2863_v52 = vpop.f32.mrf.mxu0 }
0x1d9e   :  { %v2872_v1 = vadd.f32 %v2871_v25, %v2770_v40 }
0x1d9f   :  { %v4282_v26 = vpop.f32.mrf.mxu0 }
0x1da0   :  { %4491 = vtanh.f32 %v2872_v1 }
0x1dad   :  { %v4492_v17 = vpop.eup %4491 }
0x1dae   :  { %v2874_v45 = vpack.c.bf16 %v4492_v17, %v4492_v17  ;;  %v3310_v27 = vrot.slane %v4492_v17, 4  ;;  %v3328_v29 = vrot.slane %v4492_v17, 5 }
0x1db0   :  { %4288 = vmatmul.mubr.msk.bf16.vlgmr.msra.gmra.mxu1 %vm101_vm1, %v2874_v45  ;;  %4296 = vmatmul.mubr.msk.bf16.vlgmr.msra.gmra.mxu0 %vm101_vm1, %v2874_v45  ;;  %v3341_v30 = vsel %vm3340_vm5, %v3339_v56, %v3310_v27  ;;  %v3351_v24 = vsel %vm3340_vm5, %v3350_v58, %v3328_v29  ;;  %v2133_v56 = vadd.f32 %v5184_v47, %v5179_v44 }
0x1db1   :  { %4300 = vmatpush3.bf16.msra.mxu1 %v5129_v3  ;;  %4301 = vmatprep.mubr.msk.bf16.mxu1 %vm4536_vm0, %v4535_v4  ;;  %v2138_v45 = vadd.f32 %v5173_v42, %v5184_v47 }
0x1db2   :  { %4313 = vmatprep.subr.bf16.mxu1 %v4535_v4  ;;  %4306 = vmatpush3.bf16.msra.mxu0 %v5092_v39 }
0x1db3   :  { %4307 = vmatprep.subr.bf16.mxu0 %v4535_v4  ;;  %4309 = vmatprep.mubr.msk.bf16.mxu0 %vm4536_vm0, %v4535_v4 }
0x1db6   :  { %4308 = vmatpush3.bf16.msra.mxu0 %v5103_v41 }
0x1db7   :  { %4321 = vmatprep.subr.bf16.mxu0 %v4535_v4 }
0x1e70   :  { %v2912_v50 = vpop.f32.mrf.mxu1  ;;  %v2952_v57 = vpop.f32.mrf.mxu0 }
0x1e71   :  { %v2953_v31 = vadd.f32 %v5207_v5, %v2952_v57 }
0x1e72   :  { %v4289_v9 = vpop.f32.mrf.mxu1  ;;  %v4297_v32 = vpop.f32.mrf.mxu0 }
0x1e73   :  { %v2958_v62 = vsel %vm441_vm15, %v2953_v31, -inf }
0x1e74   :  { %2959 = vmax.xlane.f32.xlu1 %v2958_v62  ;;  %v2915_v33 = vpop.f32.mrf.mxu1  ;;  %v2955_v34 = vpop.f32.mrf.mxu0 }
0x1e76   :  { %v4290_v36 = vpop.f32.mrf.mxu1  ;;  %v4298_v37 = vpop.f32.mrf.mxu0 }
0x1efd   :  { %v2960_v59 = vpop.xlane.xlu1 %2959 }
0x1efe   :  { %v2961_v38 = vsub.f32 %v2953_v31, %v2960_v59 }
0x1f00   :  { %v2962_v35 = vmul.f32 1.442695, %v2961_v38 }
0x1f02   :  { %4493 = vpow2.f32 %v2962_v35 }
0x1f0f   :  { %v4494_v15 = vpop.eup %4493 }
0x1f10   :  { %v2964_v6 = vpack.c.bf16 %v4494_v15, %v4494_v15  ;;  %v3008_v46 = vsel %vm441_vm15, %v4494_v15, 0.0 }
0x1f11   :  { %3009 = vadd.xlane.f32.xlu1 %v3008_v46 }
0x1f12   :  { %4302 = vmatmul.mubr.msk.bf16.vlgmr.msra.gmra.mxu1 %vm441_vm15, %v2964_v6 }
0x1f13   :  { %4314 = vmatpush3.bf16.msra.mxu1 %v4813_v22  ;;  %4317 = vmatprep.mubr.msk.bf16.mxu1 %vm4536_vm0, %v4535_v4 }
0x1f14   :  { %4315 = vmatprep.subr.bf16.mxu1 %v4535_v4 }
0x1f17   :  { %4316 = vmatpush3.bf16.msra.mxu1 %v4826_v28 }
0x1f18   :  { %4327 = vmatprep.subr.bf16.mxu1 %v4535_v4 }
0x1f9a   :  { %v3010_v49 = vpop.xlane.xlu1 %3009 }
0x1f9b   :  { %4495 = vrcp.f32 %v3010_v49 }
0x1fa8   :  { %v4496_v53 = vpop.eup %4495 }
0x1fd2   :  { %v3002_v54 = vpop.f32.mrf.mxu1 }
0x1fd3   :  { %v3012_v58 = vmul.f32 %v4496_v53, %v3002_v54 }
0x1fd4   :  { %v4303_v40 = vpop.f32.mrf.mxu1 }
0x1fd5   :  { %v3013_v55 = vadd.f32 %v3012_v58, %v2133_v56  ;;  %v4411_v58 = vld [vmem:[%s5413_s19] sm:$0xff]  }
0x1fd6   :  { %v3005_v61 = vpop.f32.mrf.mxu1 }
0x1fd7   :  { %v3014_v63 = vadd.f32 %v3013_v55, %v2912_v50 }
0x1fd8   :  { %v4304_v10 = vpop.f32.mrf.mxu1 }
0x1fd9   :  { %4497 = vtanh.f32 %v3014_v63  ;;  %v2141_v63 = vadd.f32 %v5177_v43, %v5184_v47  ;;  %v4412_v43 = vld [vmem:[%s5415_s21 + $0x8] sm:$0xff]   ;;  %v4413_v47 = vld [vmem:[%s5415_s21] sm:$0xff]  }
0x1fe6   :  { %v4498_v8 = vpop.eup %4497 }
0x1fe7   :  { %v3016_v48 = vpack.c.bf16 %v4498_v8, %v4498_v8  ;;  %v3313_v11 = vrot.slane %v4498_v8, 3  ;;  %v3330_v12 = vrot.slane %v4498_v8, 4 }
0x1fe9   :  { %4310 = vmatmul.mubr.msk.bf16.vlgmr.msra.gmra.mxu0 %vm101_vm1, %v3016_v48  ;;  %4318 = vmatmul.mubr.msk.bf16.vlgmr.msra.gmra.mxu1 %vm101_vm1, %v3016_v48  ;;  %v3343_v13 = vsel %vm3342_vm6, %v3341_v30, %v3313_v11  ;;  %v3352_v14 = vsel %vm3342_vm6, %v3351_v24, %v3330_v12 }
0x1fea   :  { %4322 = vmatpush3.bf16.msra.mxu0 %v5129_v3  ;;  %4323 = vmatprep.mubr.msk.bf16.mxu0 %vm4536_vm0, %v4535_v4 }
0x1feb   :  { %4335 = vmatprep.subr.bf16.mxu0 %v4535_v4  ;;  %4328 = vmatpush3.bf16.msra.mxu1 %v5092_v39 }
0x1fec   :  { %4329 = vmatprep.subr.bf16.mxu1 %v4535_v4  ;;  %4331 = vmatprep.mubr.msk.bf16.mxu1 %vm4536_vm0, %v4535_v4 }
0x1fef   :  { %4330 = vmatpush3.bf16.msra.mxu1 %v5103_v41 }
0x1ff0   :  { %4343 = vmatprep.subr.bf16.mxu1 %v4535_v4 }
0x20a9   :  { %v3054_v44 = vpop.f32.mrf.mxu0  ;;  %v3094_v16 = vpop.f32.mrf.mxu1 }
0x20aa   :  { %v3095_v51 = vadd.f32 %v5207_v5, %v3094_v16 }
0x20ab   :  { %v4311_v18 = vpop.f32.mrf.mxu0  ;;  %v4319_v60 = vpop.f32.mrf.mxu1 }
0x20ac   :  { %v3100_v19 = vsel %vm441_vm15, %v3095_v51, -inf }
0x20ad   :  { %v3057_v0 = vpop.f32.mrf.mxu0  ;;  %3101 = vmax.xlane.f32.xlu0 %v3100_v19  ;;  %v3097_v39 = vpop.f32.mrf.mxu1  ;;  %v3696_v19 = vld [vmem:[%s5414_s20] ss:$0 sm:$0xff]  ;;  %s4539_s20 = smov [#allocation2]  }
0x20ae   :  { %s3553_s11 = sshll.u32 %s4539_s20, 4  ;;  %s3554_s11 = int_to_ptr.vmem [resolvable:$true] %s3553_s11 }
0x20af   :  { %v4312_v20 = vpop.f32.mrf.mxu0  ;;  %v4320_v2 = vpop.f32.mrf.mxu1  ;;  %s4512_s3 = scalar_lea.vmem %s3554_s11, 256  ;;  %p4517_p1 = scmp.lt.s32.totalorder %s3554_s11, %s3554_s11 }
0x20b0   :  { %p4513_p0 = scmp.ne.s32.totalorder %s3554_s11, %s4512_s3  ;;  %p4518_p2 = scmp.lt.s32.totalorder %s4512_s3, %s4512_s3 }
0x20b2   :  { %p4519_p3 = por %p4518_p2, %p4517_p1 }
0x20b4   :  { %p4520_p4 = pnand %p4519_p3, %p4513_p0 }
0x2136   :  { %v3102_v21 = vpop.xlane.xlu0 %3101 }
0x2137   :  { %v3103_v7 = vsub.f32 %v3095_v51, %v3102_v21 }
0x2139   :  { %v3104_v23 = vmul.f32 1.442695, %v3103_v7 }
0x213b   :  { %4499 = vpow2.f32 %v3104_v23 }
0x2148   :  { %v4500_v41 = vpop.eup %4499 }
0x2149   :  { %v3106_v25 = vpack.c.bf16 %v4500_v41, %v4500_v41  ;;  %v3150_v52 = vsel %vm441_vm15, %v4500_v41, 0.0 }
0x214a   :  { %3151 = vadd.xlane.f32.xlu1 %v3150_v52 }
0x214b   :  { %4324 = vmatmul.mubr.msk.bf16.vlgmr.msra.gmra.mxu0 %vm441_vm15, %v3106_v25 }
0x214c   :  { %4336 = vmatpush3.bf16.msra.mxu0 %v4813_v22  ;;  %4339 = vmatprep.mubr.msk.bf16.mxu0 %vm4536_vm0, %v4535_v4 }
0x214d   :  { %4337 = vmatprep.subr.bf16.mxu0 %v4535_v4 }
0x2150   :  { %4338 = vmatpush3.bf16.msra.mxu0 %v4826_v28 }
0x2151   :  { %4349 = vmatprep.subr.bf16.mxu0 %v4535_v4 }
0x21d3   :  { %v3152_v1 = vpop.xlane.xlu1 %3151 }
0x21d4   :  { %4501 = vrcp.f32 %v3152_v1  ;;  %v3700_v1 = vld [vmem:[%s5416_s22] ss:$0 sm:$0xff] }
0x21e1   :  { %v4502_v26 = vpop.eup %4501 }
0x220b   :  { %v3144_v17 = vpop.f32.mrf.mxu0 }
0x220c   :  { %v3154_v27 = vmul.f32 %v4502_v26, %v3144_v17 }
0x220d   :  { %v4325_v29 = vpop.f32.mrf.mxu0 }
0x220e   :  { %v3155_v30 = vadd.f32 %v3154_v27, %v2138_v45 }
0x220f   :  { %v3147_v22 = vpop.f32.mrf.mxu0 }
0x2210   :  { %v3156_v24 = vadd.f32 %v3155_v30, %v3054_v44 }
0x2211   :  { %v4326_v50 = vpop.f32.mrf.mxu0 }
0x2212   :  { %4503 = vtanh.f32 %v3156_v24 }
0x221f   :  { %v4504_v57 = vpop.eup %4503 }
0x2220   :  { %v3158_v31 = vpack.c.bf16 %v4504_v57, %v4504_v57  ;;  %v3316_v28 = vrot.slane %v4504_v57, 2  ;;  %v3332_v9 = vrot.slane %v4504_v57, 3 }
0x2222   :  { %4332 = vmatmul.mubr.msk.bf16.vlgmr.msra.gmra.mxu1 %vm101_vm1, %v3158_v31  ;;  %4340 = vmatmul.mubr.msk.bf16.vlgmr.msra.gmra.mxu0 %vm101_vm1, %v3158_v31  ;;  %v3345_v32 = vsel %vm3344_vm7, %v3343_v13, %v3316_v28  ;;  %v3353_v62 = vsel %vm3344_vm7, %v3352_v14, %v3332_v9 }
0x2223   :  { %4344 = vmatpush3.bf16.msra.mxu1 %v5129_v3  ;;  %4345 = vmatprep.mubr.msk.bf16.mxu1 %vm4536_vm0, %v4535_v4 }
0x2224   :  { %4353 = vmatprep.mubr.msk.bf16.mxu0 %vm4536_vm0, %v4535_v4  ;;  %4357 = vmatprep.subr.bf16.mxu1 %v4535_v4 }
0x22e2   :  { %v3196_v42 = vpop.f32.mrf.mxu1  ;;  %v3236_v33 = vpop.f32.mrf.mxu0 }
0x22e3   :  { %v3237_v34 = vadd.f32 %v5207_v5, %v3236_v33  ;;  %v4410_v5 = vld [vmem:[%s5413_s19 + $0x8] sm:$0xff]  }
0x22e4   :  { %v4333_v36 = vpop.f32.mrf.mxu1  ;;  %v4341_v37 = vpop.f32.mrf.mxu0  ;;  %4350 = vmatpush3.bf16.msra.mxu0 %v4410_v5 }
0x22e5   :  { %v3242_v59 = vsel %vm441_vm15, %v3237_v34, -inf  ;;  %4351 = vmatprep.subr.bf16.mxu0 %v4535_v4 }
0x22e6   :  { %3243 = vmax.xlane.f32.xlu0 %v3242_v59  ;;  %v3199_v38 = vpop.f32.mrf.mxu1  ;;  %v3239_v35 = vpop.f32.mrf.mxu0 }
0x22e8   :  { %v4334_v3 = vpop.f32.mrf.mxu1  ;;  %v4342_v15 = vpop.f32.mrf.mxu0  ;;  %4352 = vmatpush3.bf16.msra.mxu0 %v4411_v58 }
0x22e9   :  { %4365 = vmatprep.subr.bf16.mxu0 %v4535_v4 }
0x236f   :  { %v3244_v6 = vpop.xlane.xlu0 %3243 }
0x2370   :  { %v3245_v46 = vsub.f32 %v3237_v34, %v3244_v6 }
0x2372   :  { %v3246_v49 = vmul.f32 1.442695, %v3245_v46 }
0x2374   :  { %4505 = vpow2.f32 %v3246_v49 }
0x2381   :  { %v4506_v53 = vpop.eup %4505 }
0x2382   :  { %v3248_v54 = vpack.c.bf16 %v4506_v53, %v4506_v53  ;;  %v3292_v56 = vsel %vm441_vm15, %v4506_v53, 0.0 }
0x2383   :  { %3293 = vadd.xlane.f32.xlu1 %v3292_v56 }
0x2384   :  { %4346 = vmatmul.mubr.msk.bf16.vlgmr.msra.gmra.mxu1 %vm441_vm15, %v3248_v54 }
0x2385   :  { %4361 = vmatprep.mubr.msk.bf16.mxu1 %vm4536_vm0, %v4535_v4  ;;  %4358 = vmatpush3.bf16.msra.mxu1 %v4412_v43 }
0x2386   :  { %4359 = vmatprep.subr.bf16.mxu1 %v4535_v4 }
0x2389   :  { %4360 = vmatpush3.bf16.msra.mxu1 %v4413_v47 }
0x240c   :  { %v3294_v40 = vpop.xlane.xlu1 %3293 }
0x240d   :  { %4507 = vrcp.f32 %v3294_v40 }
0x241a   :  { %v4508_v55 = vpop.eup %4507 }
0x2444   :  { %v3286_v61 = vpop.f32.mrf.mxu1 }
0x2445   :  { %v3296_v10 = vmul.f32 %v4508_v55, %v3286_v61 }
0x2446   :  { %v4347_v8 = vpop.f32.mrf.mxu1 }
0x2447   :  { %v3297_v48 = vadd.f32 %v3296_v10, %v2141_v63 }
0x2448   :  { %v3289_v11 = vpop.f32.mrf.mxu1 }
0x2449   :  { %v3298_v12 = vadd.f32 %v3297_v48, %v3196_v42 }
0x244a   :  { %v4348_v13 = vpop.f32.mrf.mxu1 }
0x244b   :  { %4509 = vtanh.f32 %v3298_v12 }
0x2458   :  { %v4510_v14 = vpop.eup %4509 }
0x2459   :  { %v3319_v44 = vrot.slane %v4510_v14, 1  ;;  %v3334_v16 = vrot.slane %v4510_v14, 2 }
0x245b   :  { %v3347_v51 = vsel %vm3346_vm8, %v3345_v32, %v3319_v44  ;;  %v3354_v18 = vsel %vm3346_vm8, %v3353_v62, %v3334_v16 }
0x245c   :  { %v3359_v60 = vpack.c.bf16 %v3354_v18, %v3347_v51 }
0x245e   :  { %4354 = vmatmul.mubr.msk.bf16.vlgmr.msra.gmra.mxu0 %vm101_vm1, %v3359_v60 }
0x245f   :  { %4367 = vmatprep.mubr.msk.bf16.mxu0 %vm4536_vm0, %v4535_v4  ;;  %v4414_v4 = vld [vmem:[%s5439_s8] sm:$0xff]  }
0x2460   :  { %4366 = vmatpush3.bf16.msra.mxu0 %v4414_v4 }
0x251e   :  { %v3416_v0 = vpop.f32.mrf.mxu0 }
0x251f   :  { %v3417_v20 = vadd.f32 %v3696_v19, %v3416_v0 }
0x2520   :  { %v4355_v39 = vpop.f32.mrf.mxu0 }
0x2521   :  { %v3423_v23 = vmax.f32 %v3417_v20, 0.0 }
0x2522   :  { %v3419_v2 = vpop.f32.mrf.mxu0 }
0x2523   :  { %v3420_v21 = vadd.f32 %v3696_v19, %v3419_v2 }
0x2524   :  { %v4356_v7 = vpop.f32.mrf.mxu0 }
0x2525   :  { %v3424_v41 = vmax.f32 %v3420_v21, 0.0 }
0x2527   :  { %v3429_v25 = vpack.c.bf16 %v3424_v41, %v3423_v23 }
0x2529   :  { %4362 = vmatmul.mubr.msk.bf16.vlgmr.msra.gmra.mxu1 %vm101_vm1, %v3429_v25 }
0x25e9   :  { %v3486_v52 = vpop.f32.mrf.mxu1 }
0x25ea   :  { %v3487_v45 = vadd.f32 %v3700_v1, %v3486_v52 }
0x25eb   :  { %v4363_v26 = vpop.f32.mrf.mxu1 }
0x25ed   :  { %v3489_v17 = vpop.f32.mrf.mxu1 }
0x25ee   :  { %v3490_v27 = vadd.f32 %v3700_v1, %v3489_v17 }
0x25ef   :  { %v4364_v29 = vpop.f32.mrf.mxu1 }
0x25f0   :  { %v3495_v30 = vpack.c.bf16 %v3490_v27, %v3487_v45 }
0x25f2   :  { %4368 = vmatmul.mubr.msk.bf16.vlgmr.msra.gmra.mxu0 %vm441_vm15, %v3495_v30 }
0x26b2   :  { %v3539_v22 = vpop.f32.mrf.mxu0 }
0x26b3   :  { %3546 = vst [vmem:[#allocation2] sm:$0xff] %v3539_v22 }
0x26b4   :  { %v4369_v24 = vpop.f32.mrf.mxu0 }
0x26b6   :  { %v3542_v50 = vpop.f32.mrf.mxu0 }
0x26b7   :  { %3547 = vst [vmem:[#allocation2 + $0x8] sm:$0xff] %v3542_v50 }
0x26b8   :  { %v4370_v57 = vpop.f32.mrf.mxu0 }
0x26b9   :  { %4523 = shalt.err (!%p4520_p4)
}
0x26ba   :  { %s4540_s22 = smov 128   ;;  %s4541_s13 = smov 8  }
0x26bb   :  { %3559 = dma.vmem_to_hbm [thread:$0]  %s3554_s11, 256, %s5417_s23, [#allocation3], %s4540_s22, %s4540_s22, %s4541_s13  }
0x26bc   :  { %4532 = dma.done.wait [#allocation3], 256  }
0x26bd   :  { %4533 = vsyncadd [#allocation3], 4294967040 }
0x26be   :  { %3563 = vsyncpa [#allocation3], 1 }

</bundles_post_ra>
